<compile_context>
chip_gen: v7x
topology: tpu7x:2x2x1
jax: 0.10.0
libtpu: 0.0.40
codegen_flags: <defaults>
</compile_context>

<pallas_src>
import functools

import jax
import jax.numpy as jnp
from jax.experimental import pallas as pl
from jax.experimental.pallas import tpu as pltpu

EXPANSION = 4
BN_EPS = 1e-5
_COL0 = 16        # tile-aligned column where h1 data starts inside the scratch
_COL_PAD_R = 8    # extra right padding so tap reads past COL0+W stay in bounds


# ---------------------------------------------------------------------------
# Fused Pallas kernel (one grid step = one batch tile)
# ---------------------------------------------------------------------------
def _bottleneck_kernel(x_ref, w1_ref, b1_ref, w2_ref, b2_ref, w3_ref, b3_ref,
                       o_ref, h1p_ref, *, stride, has_downsample, compute_dtype):
    B, H, W, Cin = x_ref.shape
    planes = w1_ref.shape[1]
    Cexp = w3_ref.shape[1]
    H_out = (H - 1) // stride + 1
    W_out = (W - 1) // stride + 1
    M = H_out * W_out
    cd = compute_dtype

    x = x_ref[...]                                          # (B, H, W, Cin) f32

    # --- conv1 (1x1, BN scale pre-folded into w1) + bias + relu --------------
    h1 = jnp.dot(x.reshape(B * H * W, Cin).astype(cd), w1_ref[...],
                 preferred_element_type=jnp.float32)
    h1 = jnp.maximum(h1 + b1_ref[...], 0.0)

    # --- stage h1 into the padded VMEM scratch --------------------------------
    # Only the 1-wide zero ring is written each step; the interior is fully
    # overwritten, so no full-scratch zeroing is needed.
    zrow = jnp.zeros((B, 1, W + 2, planes), cd)
    zcol = jnp.zeros((B, H, 1, planes), cd)
    h1p_ref[:, 0:1, _COL0 - 1:_COL0 + W + 1, :] = zrow
    h1p_ref[:, H + 1:H + 2, _COL0 - 1:_COL0 + W + 1, :] = zrow
    h1p_ref[:, 1:H + 1, _COL0 - 1:_COL0, :] = zcol
    h1p_ref[:, 1:H + 1, _COL0 + W:_COL0 + W + 1, :] = zcol
    h1p_ref[:, 1:H + 1, _COL0:_COL0 + W, :] = (
        h1.reshape(B, H, W, planes).astype(cd))

    # --- conv2 (3x3, stride, pad=1) as ONE im2col matmul, K = 9*planes -------
    eh = stride * (H_out - 1) + 1
    ew = stride * (W_out - 1) + 1
    taps = []
    for t in range(9):                                      # static unroll
        ky, kx = divmod(t, 3)
        r0, c0 = ky, _COL0 - 1 + kx
        tap = h1p_ref[:, r0:r0 + eh, c0:c0 + ew, :]         # contiguous ref read
        if stride != 1:
            tap = tap[:, ::stride, ::stride, :]             # value-level stride
        taps.append(tap.reshape(B * M, planes))
    col = jnp.concatenate(taps, axis=-1)                    # (B*M, 9*planes) cd
    h2 = jnp.dot(col, w2_ref[...], preferred_element_type=jnp.float32)
    h2 = jnp.maximum(h2 + b2_ref[...], 0.0).astype(cd)

    # --- conv3 (1x1) merged with the 1x1-downsample shortcut -----------------
    if has_downsample:
        xs = x if stride == 1 else x[:, ::stride, ::stride, :]
        cat = jnp.concatenate(
            [h2, xs.reshape(B * M, Cin).astype(cd)], axis=-1)
        y = jnp.dot(cat, w3_ref[...], preferred_element_type=jnp.float32)
        y = y + b3_ref[...]
    else:                                                   # identity shortcut
        y = jnp.dot(h2, w3_ref[...], preferred_element_type=jnp.float32)
        y = y + b3_ref[...] + x.reshape(B * M, Cexp)        # residual in f32

    o_ref[...] = jnp.maximum(y, 0.0).reshape(B, M, Cexp).astype(o_ref.dtype)


# ---------------------------------------------------------------------------
# Wrapper: one pallas_call for the whole block
# ---------------------------------------------------------------------------
def bottleneck_forward(p, x_nchw, stride, compute_dtype=jnp.bfloat16):
    N, Cin, H, W = x_nchw.shape
    planes = int(p["w1"].shape[1])
    Cexp = int(p["w3"].shape[1])
    H_out = (H - 1) // stride + 1
    W_out = (W - 1) // stride + 1
    M = H_out * W_out
    has_ds = p["has_downsample"]
    cd = compute_dtype

    # TODO(synk): drop these transposes if the surrounding model is NHWC.
    x = jnp.transpose(x_nchw, (0, 2, 3, 1))                 # (N, H, W, Cin)

    def vec(v):
        return v.reshape(1, -1).astype(jnp.float32)

    args = [x,
            p["w1"].astype(cd), vec(p["b1"]),
            p["w2"].astype(cd), vec(p["b2"]),
            p["w3"].astype(cd), vec(p["b3"])]

    # --- batch tile from a VMEM activation budget ----------------------------
    cd_bytes = jnp.dtype(cd).itemsize
    w_scr = _COL0 + W + _COL_PAD_R
    per_img = (2 * 4 * H * W * Cin                     # double-buffered input (f32)
               + 2 * 4 * M * Cexp                      # double-buffered output (f32)
               + cd_bytes * (H + 2) * w_scr * planes   # padded h1 scratch
               + cd_bytes * M * 9 * planes             # im2col tile
               + cd_bytes * M * (planes + Cin))        # conv3/shortcut concat
    budget = 24 * 1024 * 1024
    b_cap = max(1, min(N, budget // max(per_img, 1)))
    b_tile = max(d for d in range(1, b_cap + 1) if N % d == 0)

    weight_bytes = sum(int(a.size) * jnp.dtype(a.dtype).itemsize for a in args[1:])
    vmem_need = b_tile * per_img + 2 * weight_bytes + (4 << 20)
    vmem_limit = int(min(max(vmem_need, 32 << 20), 64 << 20))   # cap for v7x

    def resident(a):   # weights / biases: same block every grid step
        shape = a.shape
        return pl.BlockSpec(shape, lambda n, _nd=len(shape): (0,) * _nd)

    in_specs = [pl.BlockSpec((b_tile, H, W, Cin), lambda n: (n, 0, 0, 0))]
    in_specs += [resident(a) for a in args[1:]]

    kernel = functools.partial(_bottleneck_kernel, stride=stride,
                               has_downsample=has_ds, compute_dtype=cd)

    out = pl.pallas_call(
        kernel,
        out_shape=jax.ShapeDtypeStruct((N, M, Cexp), jnp.float32),
        grid=(N // b_tile,),
        in_specs=in_specs,
        out_specs=pl.BlockSpec((b_tile, M, Cexp), lambda n: (n, 0, 0)),
        scratch_shapes=[pltpu.VMEM((b_tile, H + 2, w_scr, planes), cd)],
        compiler_params=pltpu.CompilerParams(
            dimension_semantics=("parallel",),
            vmem_limit_bytes=vmem_limit),
    )(*args)

    out = out.reshape(N, H_out, W_out, Cexp)
    return jnp.transpose(out, (0, 3, 1, 2))                 # back to NCHW


# ---------------------------------------------------------------------------
# Parameter construction (mirrors nn.Module __init__ shapes)
# ---------------------------------------------------------------------------
def init_params(key, in_planes, planes, stride):
    exp_planes = EXPANSION * planes
    ks = jax.random.split(key, 8)

    def conv_w(k, cout, cin, kh, kw):
        fan_in = cin * kh * kw
        return (jax.random.normal(k, (cout, cin, kh, kw), jnp.float32)
                / jnp.sqrt(jnp.float32(fan_in)))

    def bn_p(k, c):
        k1, k2, k3, k4 = jax.random.split(k, 4)
        return dict(gamma=jax.random.uniform(k1, (c,), jnp.float32, 0.5, 1.5),
                    beta=0.1 * jax.random.normal(k2, (c,), jnp.float32),
                    mean=0.1 * jax.random.normal(k3, (c,), jnp.float32),
                    var=jax.random.uniform(k4, (c,), jnp.float32, 0.5, 1.5))

    raw = {
        "conv1": conv_w(ks[0], planes, in_planes, 1, 1),
        "bn1": bn_p(ks[1], planes),
        "conv2": conv_w(ks[2], planes, planes, 3, 3),
        "bn2": bn_p(ks[3], planes),
        "conv3": conv_w(ks[4], exp_planes, planes, 1, 1),
        "bn3": bn_p(ks[5], exp_planes),
        "has_downsample": (stride != 1) or (in_planes != exp_planes),
    }
    if raw["has_downsample"]:
        raw["convd"] = conv_w(ks[6], exp_planes, in_planes, 1, 1)
        raw["bnd"] = bn_p(ks[7], exp_planes)
    return raw


def _bn_fold(bn):
    s = bn["gamma"] / jnp.sqrt(bn["var"] + BN_EPS)
    return s, bn["beta"] - bn["mean"] * s


def fold_params(raw):
    """Fold eval-mode BN scale into conv weights (f32); merge conv3+downsample."""
    s1, b1 = _bn_fold(raw["bn1"])
    s2, b2 = _bn_fold(raw["bn2"])
    s3, b3 = _bn_fold(raw["bn3"])

    p = {}
    p["w1"] = jnp.transpose(raw["conv1"][:, :, 0, 0], (1, 0)) * s1[None, :]   # (Cin, P)
    p["b1"] = b1
    w2 = jnp.transpose(raw["conv2"], (2, 3, 1, 0))            # (3, 3, P, P)
    w2 = w2.reshape(9 * w2.shape[2], w2.shape[3])             # (9P, P): k = (ky*3+kx)*P + cin
    p["w2"] = w2 * s2[None, :]
    p["b2"] = b2
    w3 = jnp.transpose(raw["conv3"][:, :, 0, 0], (1, 0)) * s3[None, :]        # (P, Cexp)
    if raw["has_downsample"]:
        sd, bd = _bn_fold(raw["bnd"])
        wd = jnp.transpose(raw["convd"][:, :, 0, 0], (1, 0)) * sd[None, :]    # (Cin, Cexp)
        p["w3"] = jnp.concatenate([w3, wd], axis=0)           # (P + Cin, Cexp)
        p["b3"] = b3 + bd
    else:
        p["w3"] = w3
        p["b3"] = b3
    p["has_downsample"] = raw["has_downsample"]
    return p


# ---------------------------------------------------------------------------
# Pure-JAX reference (eval-mode PyTorch semantics; matching quantization points)
# ---------------------------------------------------------------------------
def reference_forward(raw, x, stride, compute_dtype=jnp.float32):
    def q(a):   # mimic the kernel's cast of MXU inputs (identity for f32)
        return a.astype(compute_dtype).astype(jnp.float32)

    def conv_bn(x_, w, bn, s_=1, pad=0):
        scale, bias = _bn_fold(bn)
        wf = w * scale[:, None, None, None]                   # fold into OIHW weight
        y = jax.lax.conv_general_dilated(
            q(x_), q(wf), (s_, s_), [(pad, pad), (pad, pad)],
            dimension_numbers=("NCHW", "OIHW", "NCHW"))
        return y + bias[None, :, None, None]

    out = jax.nn.relu(conv_bn(x, raw["conv1"], raw["bn1"]))
    out = jax.nn.relu(conv_bn(out, raw["conv2"], raw["bn2"], s_=stride, pad=1))
    out = conv_bn(out, raw["conv3"], raw["bn3"])
    if raw["has_downsample"]:
        sc = conv_bn(x, raw["convd"], raw["bnd"], s_=stride)
    else:
        sc = x
    return jax.nn.relu(out + sc)


# ---------------------------------------------------------------------------
if __name__ == "__main__":
    key = jax.random.PRNGKey(0)

    configs = [
        # (N, in_planes, H, W, planes, stride)
        (2, 16, 16, 16, 4, 1),   # identity shortcut (in_planes == 4*planes)
        (2, 4, 16, 16, 4, 2),    # 1x1-conv downsample shortcut, stride 2
        (2, 8, 16, 16, 4, 1),    # 1x1-conv downsample shortcut, stride 1
    ]
    for idx, (N, in_planes, H, W, planes, stride) in enumerate(configs):
        k_param, k_x = jax.random.split(jax.random.fold_in(key, idx))
        raw = init_params(k_param, in_planes, planes, stride)
        params = fold_params(raw)
        x = jax.random.normal(k_x, (N, in_planes, H, W), jnp.float32)
        H_out = (H - 1) // stride + 1
        W_out = (W - 1) // stride + 1

        for cd, tol in ((jnp.float32, 1e-4), (jnp.bfloat16, 2e-2)):
            out = jax.block_until_ready(
                bottleneck_forward(params, x, stride, compute_dtype=cd))
            ref = jax.block_until_ready(
                reference_forward(raw, x, stride, compute_dtype=cd))
            assert out.shape == (N, EXPANSION * planes, H_out, W_out), out.shape
            err = float(jnp.max(jnp.abs(out - ref)))
            assert jnp.allclose(out, ref, atol=tol, rtol=tol), (idx, str(cd), err)

    print("KERNEL_OK")
</pallas_src>

<mosaic_0001>
module attributes {stable_mosaic.version = 11 : i64} {
  func.func @_bottleneck_kernel(%arg0: i32, %arg1: memref<2x16x16x16xf32, #tpu.memory_space<vmem>>, %arg2: memref<16x4xf32, #tpu.memory_space<vmem>>, %arg3: memref<1x4xf32, #tpu.memory_space<vmem>>, %arg4: memref<36x4xf32, #tpu.memory_space<vmem>>, %arg5: memref<1x4xf32, #tpu.memory_space<vmem>>, %arg6: memref<4x16xf32, #tpu.memory_space<vmem>>, %arg7: memref<1x16xf32, #tpu.memory_space<vmem>>, %arg8: memref<2x256x16xf32, #tpu.memory_space<vmem>>, %arg9: memref<2x18x40x4xf32, #tpu.memory_space<vmem>>) attributes {dimension_semantics = [#tpu.dimension_semantics<parallel>], iteration_bounds = array<i64: 1>, scalar_prefetch = 0 : i64, scratch_operands = 1 : i64, tpu.core_type = #tpu.core_type<tc>, window_params = [{transform_indices = @transform_0, window_bounds = array<i64: 2, 16, 16, 16>}, {pipeline_mode = #tpu.pipeline_mode<synchronous>, transform_indices = @transform_1, window_bounds = array<i64: 16, 4>}, {pipeline_mode = #tpu.pipeline_mode<synchronous>, transform_indices = @transform_2, window_bounds = array<i64: 1, 4>}, {pipeline_mode = #tpu.pipeline_mode<synchronous>, transform_indices = @transform_3, window_bounds = array<i64: 36, 4>}, {pipeline_mode = #tpu.pipeline_mode<synchronous>, transform_indices = @transform_4, window_bounds = array<i64: 1, 4>}, {pipeline_mode = #tpu.pipeline_mode<synchronous>, transform_indices = @transform_5, window_bounds = array<i64: 4, 16>}, {pipeline_mode = #tpu.pipeline_mode<synchronous>, transform_indices = @transform_6, window_bounds = array<i64: 1, 16>}, {transform_indices = @transform_7, window_bounds = array<i64: 2, 256, 16>}]} {
    %c0 = arith.constant 0 : index
    %c0_0 = arith.constant 0 : index
    %c0_1 = arith.constant 0 : index
    %c0_2 = arith.constant 0 : index
    %0 = vector.load %arg1[%c0, %c0_0, %c0_1, %c0_2] : memref<2x16x16x16xf32, #tpu.memory_space<vmem>>, vector<2x16x16x16xf32>
    %1 = vector.shape_cast %0 : vector<2x16x16x16xf32> to vector<512x16xf32>
    %c0_3 = arith.constant 0 : index
    %c0_4 = arith.constant 0 : index
    %2 = vector.load %arg2[%c0_3, %c0_4] : memref<16x4xf32, #tpu.memory_space<vmem>>, vector<16x4xf32>
    %cst = arith.constant dense<0.000000e+00> : vector<512x4xf32>
    %3 = tpu.matmul %1, %2, %cst {dimension_numbers = #tpu.dot_dimension_numbers<[1], [0], [0], [1], [0, 0, 1, 1], [], []>} : vector<512x16xf32>, vector<16x4xf32>, vector<512x4xf32> -> vector<512x4xf32>
    %c0_5 = arith.constant 0 : index
    %c0_6 = arith.constant 0 : index
    %4 = vector.load %arg3[%c0_5, %c0_6] : memref<1x4xf32, #tpu.memory_space<vmem>>, vector<1x4xf32>
    %5 = vector.broadcast %4 : vector<1x4xf32> to vector<512x4xf32>
    %6 = arith.addf %3, %5 : vector<512x4xf32>
    %cst_7 = arith.constant 0.000000e+00 : f32
    %7 = vector.broadcast %cst_7 : f32 to vector<512x4xf32>
    %8 = arith.maximumf %6, %7 : vector<512x4xf32>
    %cst_8 = arith.constant 0.000000e+00 : f32
    %9 = vector.broadcast %cst_8 : f32 to vector<2x1x18x4xf32>
    %cst_9 = arith.constant 0.000000e+00 : f32
    %10 = vector.broadcast %cst_9 : f32 to vector<2x16x1x4xf32>
    %c0_10 = arith.constant 0 : index
    %c0_11 = arith.constant 0 : index
    %c15 = arith.constant 15 : index
    %c0_12 = arith.constant 0 : index
    %11 = vector.load %arg9[%c0_10, %c0_11, %c15, %c0_12] : memref<2x18x40x4xf32, #tpu.memory_space<vmem>>, vector<2x1x18x4xf32>
    tpu.vector_store %arg9[%c0_10, %c0_11, %c15, %c0_12], %9 {strides = array<i32>} : memref<2x18x40x4xf32, #tpu.memory_space<vmem>>, vector<2x1x18x4xf32>,
    %c0_13 = arith.constant 0 : index
    %c17 = arith.constant 17 : index
    %c15_14 = arith.constant 15 : index
    %c0_15 = arith.constant 0 : index
    %12 = vector.load %arg9[%c0_13, %c17, %c15_14, %c0_15] : memref<2x18x40x4xf32, #tpu.memory_space<vmem>>, vector<2x1x18x4xf32>
    tpu.vector_store %arg9[%c0_13, %c17, %c15_14, %c0_15], %9 {strides = array<i32>} : memref<2x18x40x4xf32, #tpu.memory_space<vmem>>, vector<2x1x18x4xf32>,
    %c0_16 = arith.constant 0 : index
    %c1 = arith.constant 1 : index
    %c15_17 = arith.constant 15 : index
    %c0_18 = arith.constant 0 : index
    %13 = vector.load %arg9[%c0_16, %c1, %c15_17, %c0_18] : memref<2x18x40x4xf32, #tpu.memory_space<vmem>>, vector<2x16x1x4xf32>
    tpu.vector_store %arg9[%c0_16, %c1, %c15_17, %c0_18], %10 {strides = array<i32>} : memref<2x18x40x4xf32, #tpu.memory_space<vmem>>, vector<2x16x1x4xf32>,
    %c0_19 = arith.constant 0 : index
    %c1_20 = arith.constant 1 : index
    %c32 = arith.constant 32 : index
    %c0_21 = arith.constant 0 : index
    %14 = vector.load %arg9[%c0_19, %c1_20, %c32, %c0_21] : memref<2x18x40x4xf32, #tpu.memory_space<vmem>>, vector<2x16x1x4xf32>
    tpu.vector_store %arg9[%c0_19, %c1_20, %c32, %c0_21], %10 {strides = array<i32>} : memref<2x18x40x4xf32, #tpu.memory_space<vmem>>, vector<2x16x1x4xf32>,
    %15 = vector.shape_cast %8 : vector<512x4xf32> to vector<2x16x16x4xf32>
    %c0_22 = arith.constant 0 : index
    %c1_23 = arith.constant 1 : index
    %c16 = arith.constant 16 : index
    %c0_24 = arith.constant 0 : index
    %16 = vector.load %arg9[%c0_22, %c1_23, %c16, %c0_24] : memref<2x18x40x4xf32, #tpu.memory_space<vmem>>, vector<2x16x16x4xf32>
    tpu.vector_store %arg9[%c0_22, %c1_23, %c16, %c0_24], %15 {strides = array<i32>} : memref<2x18x40x4xf32, #tpu.memory_space<vmem>>, vector<2x16x16x4xf32>,
    %c0_25 = arith.constant 0 : index
    %c0_26 = arith.constant 0 : index
    %c15_27 = arith.constant 15 : index
    %c0_28 = arith.constant 0 : index
    %17 = vector.load %arg9[%c0_25, %c0_26, %c15_27, %c0_28] : memref<2x18x40x4xf32, #tpu.memory_space<vmem>>, vector<2x16x16x4xf32>
    %18 = vector.shape_cast %17 : vector<2x16x16x4xf32> to vector<512x4xf32>
    %c0_29 = arith.constant 0 : index
    %c0_30 = arith.constant 0 : index
    %c16_31 = arith.constant 16 : index
    %c0_32 = arith.constant 0 : index
    %19 = vector.load %arg9[%c0_29, %c0_30, %c16_31, %c0_32] : memref<2x18x40x4xf32, #tpu.memory_space<vmem>>, vector<2x16x16x4xf32>
    %20 = vector.shape_cast %19 : vector<2x16x16x4xf32> to vector<512x4xf32>
    %c0_33 = arith.constant 0 : index
    %c0_34 = arith.constant 0 : index
    %c17_35 = arith.constant 17 : index
    %c0_36 = arith.constant 0 : index
    %21 = vector.load %arg9[%c0_33, %c0_34, %c17_35, %c0_36] : memref<2x18x40x4xf32, #tpu.memory_space<vmem>>, vector<2x16x16x4xf32>
    %22 = vector.shape_cast %21 : vector<2x16x16x4xf32> to vector<512x4xf32>
    %c0_37 = arith.constant 0 : index
    %c1_38 = arith.constant 1 : index
    %c15_39 = arith.constant 15 : index
    %c0_40 = arith.constant 0 : index
    %23 = vector.load %arg9[%c0_37, %c1_38, %c15_39, %c0_40] : memref<2x18x40x4xf32, #tpu.memory_space<vmem>>, vector<2x16x16x4xf32>
    %24 = vector.shape_cast %23 : vector<2x16x16x4xf32> to vector<512x4xf32>
    %c0_41 = arith.constant 0 : index
    %c1_42 = arith.constant 1 : index
    %c16_43 = arith.constant 16 : index
    %c0_44 = arith.constant 0 : index
    %25 = vector.load %arg9[%c0_41, %c1_42, %c16_43, %c0_44] : memref<2x18x40x4xf32, #tpu.memory_space<vmem>>, vector<2x16x16x4xf32>
    %26 = vector.shape_cast %25 : vector<2x16x16x4xf32> to vector<512x4xf32>
    %c0_45 = arith.constant 0 : index
    %c1_46 = arith.constant 1 : index
    %c17_47 = arith.constant 17 : index
    %c0_48 = arith.constant 0 : index
    %27 = vector.load %arg9[%c0_45, %c1_46, %c17_47, %c0_48] : memref<2x18x40x4xf32, #tpu.memory_space<vmem>>, vector<2x16x16x4xf32>
    %28 = vector.shape_cast %27 : vector<2x16x16x4xf32> to vector<512x4xf32>
    %c0_49 = arith.constant 0 : index
    %c2 = arith.constant 2 : index
    %c15_50 = arith.constant 15 : index
    %c0_51 = arith.constant 0 : index
    %29 = vector.load %arg9[%c0_49, %c2, %c15_50, %c0_51] : memref<2x18x40x4xf32, #tpu.memory_space<vmem>>, vector<2x16x16x4xf32>
    %30 = vector.shape_cast %29 : vector<2x16x16x4xf32> to vector<512x4xf32>
    %c0_52 = arith.constant 0 : index
    %c2_53 = arith.constant 2 : index
    %c16_54 = arith.constant 16 : index
    %c0_55 = arith.constant 0 : index
    %31 = vector.load %arg9[%c0_52, %c2_53, %c16_54, %c0_55] : memref<2x18x40x4xf32, #tpu.memory_space<vmem>>, vector<2x16x16x4xf32>
    %32 = vector.shape_cast %31 : vector<2x16x16x4xf32> to vector<512x4xf32>
    %c0_56 = arith.constant 0 : index
    %c2_57 = arith.constant 2 : index
    %c17_58 = arith.constant 17 : index
    %c0_59 = arith.constant 0 : index
    %33 = vector.load %arg9[%c0_56, %c2_57, %c17_58, %c0_59] : memref<2x18x40x4xf32, #tpu.memory_space<vmem>>, vector<2x16x16x4xf32>
    %34 = vector.shape_cast %33 : vector<2x16x16x4xf32> to vector<512x4xf32>
    %35 = tpu.concatenate %18, %20, %22, %24, %26, %28, %30, %32, %34 in 1 : vector<512x4xf32>, vector<512x4xf32>, vector<512x4xf32>, vector<512x4xf32>, vector<512x4xf32>, vector<512x4xf32>, vector<512x4xf32>, vector<512x4xf32>, vector<512x4xf32> -> vector<512x36xf32>
    %c0_60 = arith.constant 0 : index
    %c0_61 = arith.constant 0 : index
    %36 = vector.load %arg4[%c0_60, %c0_61] : memref<36x4xf32, #tpu.memory_space<vmem>>, vector<36x4xf32>
    %cst_62 = arith.constant dense<0.000000e+00> : vector<512x4xf32>
    %37 = tpu.matmul %35, %36, %cst_62 {dimension_numbers = #tpu.dot_dimension_numbers<[1], [0], [0], [1], [0, 0, 1, 1], [], []>} : vector<512x36xf32>, vector<36x4xf32>, vector<512x4xf32> -> vector<512x4xf32>
    %c0_63 = arith.constant 0 : index
    %c0_64 = arith.constant 0 : index
    %38 = vector.load %arg5[%c0_63, %c0_64] : memref<1x4xf32, #tpu.memory_space<vmem>>, vector<1x4xf32>
    %39 = vector.broadcast %38 : vector<1x4xf32> to vector<512x4xf32>
    %40 = arith.addf %37, %39 : vector<512x4xf32>
    %cst_65 = arith.constant 0.000000e+00 : f32
    %41 = vector.broadcast %cst_65 : f32 to vector<512x4xf32>
    %42 = arith.maximumf %40, %41 : vector<512x4xf32>
    %c0_66 = arith.constant 0 : index
    %c0_67 = arith.constant 0 : index
    %43 = vector.load %arg6[%c0_66, %c0_67] : memref<4x16xf32, #tpu.memory_space<vmem>>, vector<4x16xf32>
    %cst_68 = arith.constant dense<0.000000e+00> : vector<512x16xf32>
    %44 = tpu.matmul %42, %43, %cst_68 {dimension_numbers = #tpu.dot_dimension_numbers<[1], [0], [0], [1], [0, 0, 1, 1], [], []>} : vector<512x4xf32>, vector<4x16xf32>, vector<512x16xf32> -> vector<512x16xf32>
    %c0_69 = arith.constant 0 : index
    %c0_70 = arith.constant 0 : index
    %45 = vector.load %arg7[%c0_69, %c0_70] : memref<1x16xf32, #tpu.memory_space<vmem>>, vector<1x16xf32>
    %46 = vector.broadcast %45 : vector<1x16xf32> to vector<512x16xf32>
    %47 = arith.addf %44, %46 : vector<512x16xf32>
    %48 = vector.shape_cast %0 : vector<2x16x16x16xf32> to vector<512x16xf32>
    %49 = arith.addf %47, %48 : vector<512x16xf32>
    %cst_71 = arith.constant 0.000000e+00 : f32
    %50 = vector.broadcast %cst_71 : f32 to vector<512x16xf32>
    %51 = arith.maximumf %49, %50 : vector<512x16xf32>
    %52 = vector.shape_cast %51 : vector<512x16xf32> to vector<2x256x16xf32>
    %c0_72 = arith.constant 0 : index
    %c0_73 = arith.constant 0 : index
    %c0_74 = arith.constant 0 : index
    %53 = vector.load %arg8[%c0_72, %c0_73, %c0_74] : memref<2x256x16xf32, #tpu.memory_space<vmem>>, vector<2x256x16xf32>
    tpu.vector_store %arg8[%c0_72, %c0_73, %c0_74], %52 {strides = array<i32>} : memref<2x256x16xf32, #tpu.memory_space<vmem>>, vector<2x256x16xf32>,
    return
  }
  func.func @transform_0(%arg0: i32) -> (i32, i32, i32, i32) {
    %c0_i32 = arith.constant 0 : i32
    %c0_i32_0 = arith.constant 0 : i32
    %c0_i32_1 = arith.constant 0 : i32
    %c0_i32_2 = arith.constant 0 : i32
    return %arg0, %c0_i32, %c0_i32_0, %c0_i32_1 : i32, i32, i32, i32
  }
  func.func @transform_1(%arg0: i32) -> (i32, i32) {
    %c0_i32 = arith.constant 0 : i32
    %c0_i32_0 = arith.constant 0 : i32
    %c0_i32_1 = arith.constant 0 : i32
    return %c0_i32, %c0_i32_0 : i32, i32
  }
  func.func @transform_2(%arg0: i32) -> (i32, i32) {
    %c0_i32 = arith.constant 0 : i32
    %c0_i32_0 = arith.constant 0 : i32
    %c0_i32_1 = arith.constant 0 : i32
    return %c0_i32, %c0_i32_0 : i32, i32
  }
  func.func @transform_3(%arg0: i32) -> (i32, i32) {
    %c0_i32 = arith.constant 0 : i32
    %c0_i32_0 = arith.constant 0 : i32
    %c0_i32_1 = arith.constant 0 : i32
    return %c0_i32, %c0_i32_0 : i32, i32
  }
  func.func @transform_4(%arg0: i32) -> (i32, i32) {
    %c0_i32 = arith.constant 0 : i32
    %c0_i32_0 = arith.constant 0 : i32
    %c0_i32_1 = arith.constant 0 : i32
    return %c0_i32, %c0_i32_0 : i32, i32
  }
  func.func @transform_5(%arg0: i32) -> (i32, i32) {
    %c0_i32 = arith.constant 0 : i32
    %c0_i32_0 = arith.constant 0 : i32
    %c0_i32_1 = arith.constant 0 : i32
    return %c0_i32, %c0_i32_0 : i32, i32
  }
  func.func @transform_6(%arg0: i32) -> (i32, i32) {
    %c0_i32 = arith.constant 0 : i32
    %c0_i32_0 = arith.constant 0 : i32
    %c0_i32_1 = arith.constant 0 : i32
    return %c0_i32, %c0_i32_0 : i32, i32
  }
  func.func @transform_7(%arg0: i32) -> (i32, i32, i32) {
    %c0_i32 = arith.constant 0 : i32
    %c0_i32_0 = arith.constant 0 : i32
    %c0_i32_1 = arith.constant 0 : i32
    return %arg0, %c0_i32, %c0_i32_0 : i32, i32, i32
  }
}

</mosaic_0001>

<bundles_post_ra>
// kernel: tpu_custom_call.1
= control target key start
LH: loop header
LB: loop body
LE: loop exit
PB: predicated region body
PF: predicated region fallthrough
CT: control target
= control target key end

     0   :  { %12 = vsyncpa [#allocation4], 0  ;;  %s6362_s24 = smov [#allocation3]   ;;  %s8972_s0 = inlined_call_operand.hbm [shape: f32[2,16,16,16], index: 0, kind: input, shape index: {}]   ;;  %s8973_s1 = inlined_call_operand.vmem [shape: f32[16,4], index: 1, kind: input, shape index: {}]   ;;  %s8974_s2 = inlined_call_operand.vmem [shape: f32[1,4], index: 2, kind: input, shape index: {}]   ;;  %s8975_s3 = inlined_call_operand.vmem [shape: f32[36,4], index: 3, kind: input, shape index: {}]   ;;  %s8976_s4 = inlined_call_operand.vmem [shape: f32[1,4], index: 4, kind: input, shape index: {}]   ;;  %s8977_s5 = inlined_call_operand.vmem [shape: f32[4,16], index: 5, kind: input, shape index: {}]   ;;  %s8978_s6 = inlined_call_operand.vmem [shape: f32[1,16], index: 6, kind: input, shape index: {}]   ;;  %s8979_s7 = inlined_call_operand.vmem [shape: f32[2,256,16], index: 7, kind: output, shape index: {}]  }
   0x1   :  { %s18_s25 = sshll.u32 %s6362_s24, 4  ;;  %s6338_s28 = scalar_lea.hbm %s8972_s0, 8192  ;;  %s19_s25 = int_to_ptr.vmem [resolvable:$true] %s18_s25 }
   0x2   :  { %p6339_p0 = scmp.ne.s32.totalorder %s8972_s0, %s6338_s28  ;;  %p6342_p1 = scmp.lt.u32.totalorder %s6338_s28, %s8972_s0 }
   0x4   :  { %p6344_p2 = pnand %p6342_p1, %p6339_p0 }
   0x6   :  { %6347 = shalt.err (!%p6344_p2)
}
   0x7   :  { %s6348_s10 = scalar_lea.vmem %s19_s25, 8192  ;;  %p6353_p4 = scmp.lt.s32.totalorder %s19_s25, %s19_s25 }
   0x8   :  { %p6349_p3 = scmp.ne.s32.totalorder %s19_s25, %s6348_s10  ;;  %p6354_p5 = scmp.lt.s32.totalorder %s6348_s10, %s6348_s10 }
   0xa   :  { %p6355_p6 = por %p6354_p5, %p6353_p4 }
   0xc   :  { %p6356_p7 = pnand %p6355_p6, %p6349_p3 }
   0xe   :  { %6359 = shalt.err (!%p6356_p7)
}
   0xf   :  { %s6363_s11 = smov 128   ;;  %s6364_s12 = smov 8  }
  0x10   :  { %24 = dma.hbm_to_vmem [thread:$0]  %s8972_s0, 8192, %s19_s25, [#allocation4], %s6363_s11, %s6363_s11, %s6364_s12  }
  0x11   :  { %6360 = dma.done.wait [#allocation4], 8192  }
  0x12   :  { %6361 = vsyncadd [#allocation4], 4294959104  ;;  %vm755_vm0 = vcmask 31744   ;;  %v6365_v0 = vmov 0.0   ;;  %vm758_vm1 = vcmask 25600   ;;  %vm113_vm2 = vcmask 130048  }
  0x13   :  { %756 = vst.msk [vmem:[#allocation2 + $0xf] sm:$0xff] %vm755_vm0, %v6365_v0  ;;  %757 = vst.msk [vmem:[#allocation2 + $0x17] sm:$0xff] %vm755_vm0, %v6365_v0  ;;  %v104_v1 = vld [vmem:[%s8973_s1] sm:$0xff]  ;;  %v105_v2 = vld [vmem:[%s8973_s1 + $0x8] sm:$0xff]  ;;  %s6366_s1 = smov 4   ;;  %vm771_vm3 = vcmask 24576  }
  0x14   :  { %760 = vst.msk [vmem:[#allocation2 + $0x2df] sm:$0xff] %vm755_vm0, %v6365_v0  ;;  %761 = vst.msk [vmem:[#allocation2 + $0x2e7] sm:$0xff] %vm755_vm0, %v6365_v0  ;;  %v40_v3 = vld [vmem:[#allocation3] sm:$0xff]  ;;  %v6187_v4 = vpack.c.bf16 %v105_v2, %v104_v1  ;;  %v41_v6 = vld [vmem:[#allocation3 + $0x8] sm:$0xff]  ;;  %s6367_s20 = smov 12   ;;  %s6369_s8 = smov 20  }
  0x15   :  { %764 = vst.msk [vmem:[#allocation2 + $0x2b7] sm:$0xff] %vm755_vm0, %v6365_v0  ;;  %765 = vst.msk [vmem:[#allocation2 + $0x2bf] sm:$0xff] %vm755_vm0, %v6365_v0  ;;  %5887 = vmatprep.mubr.msk.f32.mxu0 %vm113_vm2, %v40_v3  ;;  %v72_v5 = vld [vmem:[#allocation3 + $0x100] sm:$0xff]  ;;  %v73_v7 = vld [vmem:[#allocation3 + $0x108] sm:$0xff]  ;;  %vm4248_vm4 = vcmask 1043456   ;;  %s6370_s11 = smov 24  }
  0x16   :  { %767 = vst.msk [vmem:[#allocation2 + $0x587] sm:$0xff] %vm755_vm0, %v6365_v0  ;;  %768 = vst.msk [vmem:[#allocation2 + $0x58f] sm:$0xff] %vm755_vm0, %v6365_v0  ;;  %5935 = vmatprep.mubr.msk.f32.mxu1 %vm113_vm2, %v72_v5  ;;  %6188 = vmatprep.subr.bf16.mxu0 %v6187_v4  ;;  %v42_v8 = vld [vmem:[#allocation3 + $0x10] sm:$0xff]  ;;  %v43_v10 = vld [vmem:[#allocation3 + $0x18] sm:$0xff]  ;;  %vm3589_vm5 = vcmask 64512   ;;  %vm3654_vm6 = vcmask 97280  }
  0x17   :  { %759 = vst.msk [vmem:[#allocation2 + $0x1f] sm:$0x3] %vm758_vm1, %v6365_v0  ;;  %762 = vst.msk [vmem:[#allocation2 + $0x2ef] sm:$0x3] %vm758_vm1, %v6365_v0  ;;  %6199 = vmatprep.subr.bf16.mxu1 %v6187_v4  ;;  %6190 = vmatpush3.bf16.msra.mxu0 %v6187_v4  ;;  %v74_v9 = vld [vmem:[#allocation3 + $0x110] sm:$0xff]  ;;  %v75_v11 = vld [vmem:[#allocation3 + $0x118] sm:$0xff] }
  0x18   :  { %766 = vst.msk [vmem:[#allocation2 + $0x2c7] sm:$0x3] %vm758_vm1, %v6365_v0  ;;  %769 = vst.msk [vmem:[#allocation2 + $0x597] sm:$0x3] %vm758_vm1, %v6365_v0  ;;  %6200 = vmatpush3.bf16.msra.mxu1 %v6187_v4  ;;  %v44_v12 = vld [vmem:[#allocation3 + $0x20] sm:$0xff]  ;;  %v45_v14 = vld [vmem:[#allocation3 + $0x28] sm:$0xff] }
  0x19   :  { %v76_v13 = vld [vmem:[#allocation3 + $0x120] sm:$0xff]  ;;  %v77_v15 = vld [vmem:[#allocation3 + $0x128] sm:$0xff]  ;;  %v46_v16 = vld [vmem:[#allocation3 + $0x30] sm:$0xff]  ;;  %804 = vst.msk [vmem:[#allocation2 + $0x48] sm:$0x1] %vm771_vm3, %v6365_v0  ;;  %vm3783_vm7 = vcmask 162816  }
  0x1a   :  { %5888 = vmatmul.mubr.msk.f32.vlgmr.msra.gmra.mrb[0].mxu0 %vm113_vm2, %v41_v6  ;;  %v78_v17 = vld [vmem:[#allocation3 + $0x130] sm:$0xff]  ;;  %v47_v19 = vld [vmem:[#allocation3 + $0x38] sm:$0xff]  ;;  %v48_v22 = vld [vmem:[#allocation3 + $0x40] sm:$0xff]  ;;  %772 = vst.msk [vmem:[#allocation2 + $0x37] sm:$0x1] %vm771_vm3, %v6365_v0  ;;  %vm3848_vm8 = vcmask 195584  }
  0x1b   :  { %5936 = vmatmul.mubr.msk.f32.vlgmr.msra.gmra.mrb[0].mxu1 %vm113_vm2, %v73_v7  ;;  %5890 = vmatprep.mubr.msk.f32.mxu0 %vm113_vm2, %v42_v8  ;;  %v964_v18 = vld [vmem:[#allocation2 + $0x10] sm:$0xff]  ;;  %v79_v20 = vld [vmem:[#allocation3 + $0x138] sm:$0xff]  ;;  %v80_v23 = vld [vmem:[#allocation3 + $0x140] sm:$0xff]  ;;  %773 = vst.msk [vmem:[#allocation2 + $0x5f] sm:$0x1] %vm771_vm3, %v6365_v0  ;;  %vm3913_vm9 = vcmask 228352  }
  0x1c   :  { %5938 = vmatprep.mubr.msk.f32.mxu1 %vm113_vm2, %v74_v9  ;;  %1541 = vrot.lane.b32.xlu0 %v964_v18, %s6366_s1  ;;  %v49_v26 = vld [vmem:[#allocation3 + $0x48] sm:$0xff]  ;;  %v50_v28 = vld [vmem:[#allocation3 + $0x50] sm:$0xff]  ;;  %v996_v30 = vld [vmem:[#allocation2 + $0x2e0] sm:$0xff]  ;;  %774 = vst.msk [vmem:[#allocation2 + $0x87] sm:$0x1] %vm771_vm3, %v6365_v0  ;;  %vm3978_vm10 = vcmask 261120  }
  0x1d   :  { %v81_v27 = vld [vmem:[#allocation3 + $0x148] sm:$0xff]  ;;  %v82_v29 = vld [vmem:[#allocation3 + $0x150] sm:$0xff]  ;;  %v51_v31 = vld [vmem:[#allocation3 + $0x58] sm:$0xff]  ;;  %775 = vst.msk [vmem:[#allocation2 + $0xaf] sm:$0x1] %vm771_vm3, %v6365_v0  ;;  %vm4055_vm11 = vcmask 293888  }
  0x1e   :  { %5891 = vmatmul.mubr.msk.f32.gmra.mrb[2].mxu0 %vm113_vm2, %v43_v10  ;;  %v997_v21 = vld [vmem:[#allocation2 + $0x2e8] sm:$0xff]  ;;  %v965_v24 = vld [vmem:[#allocation2 + $0x18] sm:$0xff]  ;;  %v52_v33 = vld [vmem:[#allocation3 + $0x60] sm:$0xff]  ;;  %776 = vst.msk [vmem:[#allocation2 + $0xd7] sm:$0x1] %vm771_vm3, %v6365_v0 }
  0x1f   :  { %5939 = vmatmul.mubr.msk.f32.gmra.mrb[2].mxu1 %vm113_vm2, %v75_v11  ;;  %5893 = vmatprep.mubr.msk.f32.mxu0 %vm113_vm2, %v44_v12  ;;  %v1029_v25 = vld [vmem:[#allocation2 + $0x19] sm:$0xff]  ;;  %v53_v35 = vld [vmem:[#allocation3 + $0x68] sm:$0xff]  ;;  %v54_v37 = vld [vmem:[#allocation3 + $0x70] sm:$0xff]  ;;  %777 = vst.msk [vmem:[#allocation2 + $0xff] sm:$0x1] %vm771_vm3, %v6365_v0 }
  0x20   :  { %5941 = vmatprep.mubr.msk.f32.mxu1 %vm113_vm2, %v76_v13  ;;  %1607 = vrot.lane.b32.xlu1 %v997_v21, %s6366_s1  ;;  %v83_v32 = vld [vmem:[#allocation3 + $0x158] sm:$0xff]  ;;  %v84_v34 = vld [vmem:[#allocation3 + $0x160] sm:$0xff]  ;;  %v85_v36 = vld [vmem:[#allocation3 + $0x168] sm:$0xff]  ;;  %778 = vst.msk [vmem:[#allocation2 + $0x127] sm:$0x1] %vm771_vm3, %v6365_v0 }
  0x21   :  { %1543 = vrot.lane.b32.xlu0 %v965_v24, %s6366_s1  ;;  %v86_v38 = vld [vmem:[#allocation3 + $0x170] sm:$0xff]  ;;  %v55_v39 = vld [vmem:[#allocation3 + $0x78] sm:$0xff]  ;;  %v56_v41 = vld [vmem:[#allocation3 + $0x80] sm:$0xff]  ;;  %779 = vst.msk [vmem:[#allocation2 + $0x14f] sm:$0x1] %vm771_vm3, %v6365_v0 }
  0x22   :  { %5894 = vmatmul.mubr.msk.f32.gmra.mrb[4].mxu0 %vm113_vm2, %v45_v14  ;;  %v87_v40 = vld [vmem:[#allocation3 + $0x178] sm:$0xff]  ;;  %v88_v42 = vld [vmem:[#allocation3 + $0x180] sm:$0xff]  ;;  %v57_v43 = vld [vmem:[#allocation3 + $0x88] sm:$0xff]  ;;  %780 = vst.msk [vmem:[#allocation2 + $0x177] sm:$0x1] %vm771_vm3, %v6365_v0 }
  0x23   :  { %5942 = vmatmul.mubr.msk.f32.gmra.mrb[4].mxu1 %vm113_vm2, %v77_v15  ;;  %5896 = vmatprep.mubr.msk.f32.mxu0 %vm113_vm2, %v46_v16  ;;  %v89_v44 = vld [vmem:[#allocation3 + $0x188] sm:$0xff]  ;;  %v58_v45 = vld [vmem:[#allocation3 + $0x90] sm:$0xff]  ;;  %v59_v47 = vld [vmem:[#allocation3 + $0x98] sm:$0xff]  ;;  %781 = vst.msk [vmem:[#allocation2 + $0x19f] sm:$0x1] %vm771_vm3, %v6365_v0 }
  0x24   :  { %5944 = vmatprep.mubr.msk.f32.mxu1 %vm113_vm2, %v78_v17  ;;  %1799 = vrot.lane.b32.xlu1 %v1029_v25, %s6364_s12  ;;  %v90_v46 = vld [vmem:[#allocation3 + $0x190] sm:$0xff]  ;;  %v91_v48 = vld [vmem:[#allocation3 + $0x198] sm:$0xff]  ;;  %v60_v49 = vld [vmem:[#allocation3 + $0xa0] sm:$0xff]  ;;  %782 = vst.msk [vmem:[#allocation2 + $0x1c7] sm:$0x1] %vm771_vm3, %v6365_v0 }
  0x25   :  { %1605 = vrot.lane.b32.xlu0 %v996_v30, %s6366_s1  ;;  %v92_v50 = vld [vmem:[#allocation3 + $0x1a0] sm:$0xff]  ;;  %v61_v51 = vld [vmem:[#allocation3 + $0xa8] sm:$0xff]  ;;  %v62_v53 = vld [vmem:[#allocation3 + $0xb0] sm:$0xff]  ;;  %783 = vst.msk [vmem:[#allocation2 + $0x1ef] sm:$0x1] %vm771_vm3, %v6365_v0 }
  0x26   :  { %5897 = vmatmul.mubr.msk.f32.gmra.mrb[6].mxu0 %vm113_vm2, %v47_v19  ;;  %v93_v52 = vld [vmem:[#allocation3 + $0x1a8] sm:$0xff]  ;;  %v1028_v54 = vld [vmem:[#allocation2 + $0x11] sm:$0xff]  ;;  %784 = vst.msk [vmem:[#allocation2 + $0x217] sm:$0x1] %vm771_vm3, %v6365_v0  ;;  %785 = vst.msk [vmem:[#allocation2 + $0x23f] sm:$0x1] %vm771_vm3, %v6365_v0 }
  0x27   :  { %5945 = vmatmul.mubr.msk.f32.gmra.mrb[6].mxu1 %vm113_vm2, %v79_v20  ;;  %5899 = vmatprep.mubr.msk.f32.mxu0 %vm113_vm2, %v48_v22  ;;  %v63_v55 = vld [vmem:[#allocation3 + $0xb8] sm:$0xff]  ;;  %v1061_v56 = vld [vmem:[#allocation2 + $0x2e9] sm:$0xff]  ;;  %786 = vst.msk [vmem:[#allocation2 + $0x267] sm:$0x1] %vm771_vm3, %v6365_v0  ;;  %787 = vst.msk [vmem:[#allocation2 + $0x28f] sm:$0x1] %vm771_vm3, %v6365_v0 }
  0x28   :  { %5947 = vmatprep.mubr.msk.f32.mxu1 %vm113_vm2, %v80_v23  ;;  %1863 = vrot.lane.b32.xlu1 %v1061_v56, %s6364_s12  ;;  %v94_v57 = vld [vmem:[#allocation3 + $0x1b0] sm:$0xff]  ;;  %v95_v58 = vld [vmem:[#allocation3 + $0x1b8] sm:$0xff]  ;;  %788 = vst.msk [vmem:[#allocation2 + $0x307] sm:$0x1] %vm771_vm3, %v6365_v0  ;;  %789 = vst.msk [vmem:[#allocation2 + $0x32f] sm:$0x1] %vm771_vm3, %v6365_v0 }
  0x29   :  { %1797 = vrot.lane.b32.xlu0 %v1028_v54, %s6364_s12  ;;  %790 = vst.msk [vmem:[#allocation2 + $0x357] sm:$0x1] %vm771_vm3, %v6365_v0  ;;  %791 = vst.msk [vmem:[#allocation2 + $0x37f] sm:$0x1] %vm771_vm3, %v6365_v0  ;;  %v1060_v59 = vld [vmem:[#allocation2 + $0x2e1] sm:$0xff]  ;;  %v66_v1 = vld [vmem:[#allocation3 + $0xd0] sm:$0xff] }
  0x2a   :  { %5900 = vmatmul.mubr.msk.f32.gmra.mrb[8].mxu0 %vm113_vm2, %v49_v26  ;;  %792 = vst.msk [vmem:[#allocation2 + $0x3a7] sm:$0x1] %vm771_vm3, %v6365_v0  ;;  %793 = vst.msk [vmem:[#allocation2 + $0x3cf] sm:$0x1] %vm771_vm3, %v6365_v0  ;;  %v64_v60 = vld [vmem:[#allocation3 + $0xc0] sm:$0xff]  ;;  %v65_v61 = vld [vmem:[#allocation3 + $0xc8] sm:$0xff] }
  0x2b   :  { %5948 = vmatmul.mubr.msk.f32.gmra.mrb[8].mxu1 %vm113_vm2, %v81_v27  ;;  %5902 = vmatprep.mubr.msk.f32.mxu0 %vm113_vm2, %v50_v28  ;;  %794 = vst.msk [vmem:[#allocation2 + $0x3f7] sm:$0x1] %vm771_vm3, %v6365_v0  ;;  %795 = vst.msk [vmem:[#allocation2 + $0x41f] sm:$0x1] %vm771_vm3, %v6365_v0  ;;  %v96_v62 = vld [vmem:[#allocation3 + $0x1c0] sm:$0xff]  ;;  %v97_v63 = vld [vmem:[#allocation3 + $0x1c8] sm:$0xff] }
  0x2c   :  { %5950 = vmatprep.mubr.msk.f32.mxu1 %vm113_vm2, %v82_v29  ;;  %796 = vst.msk [vmem:[#allocation2 + $0x447] sm:$0x1] %vm771_vm3, %v6365_v0  ;;  %797 = vst.msk [vmem:[#allocation2 + $0x46f] sm:$0x1] %vm771_vm3, %v6365_v0  ;;  %v67_v2 = vld [vmem:[#allocation3 + $0xd8] sm:$0xff]  ;;  %v68_v4 = vld [vmem:[#allocation3 + $0xe0] sm:$0xff] }
  0x2d   :  { %798 = vst.msk [vmem:[#allocation2 + $0x497] sm:$0x1] %vm771_vm3, %v6365_v0  ;;  %799 = vst.msk [vmem:[#allocation2 + $0x4bf] sm:$0x1] %vm771_vm3, %v6365_v0  ;;  %1861 = vrot.lane.b32.xlu0 %v1060_v59, %s6364_s12  ;;  %v99_v3 = vld [vmem:[#allocation3 + $0x1d8] sm:$0xff]  ;;  %v69_v5 = vld [vmem:[#allocation3 + $0xe8] sm:$0xff] }
  0x2e   :  { %5903 = vmatmul.mubr.msk.f32.gmra.mrb[10].mxu0 %vm113_vm2, %v51_v31  ;;  %800 = vst.msk [vmem:[#allocation2 + $0x4e7] sm:$0x1] %vm771_vm3, %v6365_v0  ;;  %801 = vst.msk [vmem:[#allocation2 + $0x50f] sm:$0x1] %vm771_vm3, %v6365_v0  ;;  %v100_v6 = vld [vmem:[#allocation3 + $0x1e0] sm:$0xff]  ;;  %v101_v7 = vld [vmem:[#allocation3 + $0x1e8] sm:$0xff] }
  0x2f   :  { %5951 = vmatmul.mubr.msk.f32.gmra.mrb[10].mxu1 %vm113_vm2, %v83_v32  ;;  %5905 = vmatprep.mubr.msk.f32.mxu0 %vm113_vm2, %v52_v33  ;;  %802 = vst.msk [vmem:[#allocation2 + $0x537] sm:$0x1] %vm771_vm3, %v6365_v0  ;;  %803 = vst.msk [vmem:[#allocation2 + $0x55f] sm:$0x1] %vm771_vm3, %v6365_v0  ;;  %v70_v8 = vld [vmem:[#allocation3 + $0xf0] sm:$0xff]  ;;  %v71_v9 = vld [vmem:[#allocation3 + $0xf8] sm:$0xff] }
  0x30   :  { %5953 = vmatprep.mubr.msk.f32.mxu1 %vm113_vm2, %v84_v34  ;;  %805 = vst.msk [vmem:[#allocation2 + $0x70] sm:$0x1] %vm771_vm3, %v6365_v0  ;;  %806 = vst.msk [vmem:[#allocation2 + $0x98] sm:$0x1] %vm771_vm3, %v6365_v0  ;;  %v6653_v10 = vld [vmem:[%s8974_s2] ss:$0 sm:$0xff] }
  0x31   :  { %807 = vst.msk [vmem:[#allocation2 + $0xc0] sm:$0x1] %vm771_vm3, %v6365_v0  ;;  %808 = vst.msk [vmem:[#allocation2 + $0xe8] sm:$0x1] %vm771_vm3, %v6365_v0 }
  0x32   :  { %5906 = vmatmul.mubr.msk.f32.gmra.mrb[12].mxu0 %vm113_vm2, %v53_v35  ;;  %809 = vst.msk [vmem:[#allocation2 + $0x110] sm:$0x1] %vm771_vm3, %v6365_v0  ;;  %810 = vst.msk [vmem:[#allocation2 + $0x138] sm:$0x1] %vm771_vm3, %v6365_v0 }
  0x33   :  { %5954 = vmatmul.mubr.msk.f32.gmra.mrb[12].mxu1 %vm113_vm2, %v85_v36  ;;  %5908 = vmatprep.mubr.msk.f32.mxu0 %vm113_vm2, %v54_v37  ;;  %811 = vst.msk [vmem:[#allocation2 + $0x160] sm:$0x1] %vm771_vm3, %v6365_v0  ;;  %812 = vst.msk [vmem:[#allocation2 + $0x188] sm:$0x1] %vm771_vm3, %v6365_v0 }
  0x34   :  { %5956 = vmatprep.mubr.msk.f32.mxu1 %vm113_vm2, %v86_v38  ;;  %813 = vst.msk [vmem:[#allocation2 + $0x1b0] sm:$0x1] %vm771_vm3, %v6365_v0  ;;  %814 = vst.msk [vmem:[#allocation2 + $0x1d8] sm:$0x1] %vm771_vm3, %v6365_v0 }
  0x35   :  { %815 = vst.msk [vmem:[#allocation2 + $0x200] sm:$0x1] %vm771_vm3, %v6365_v0  ;;  %816 = vst.msk [vmem:[#allocation2 + $0x228] sm:$0x1] %vm771_vm3, %v6365_v0 }
  0x36   :  { %5909 = vmatmul.mubr.msk.f32.gmra.mrb[14].mxu0 %vm113_vm2, %v55_v39  ;;  %817 = vst.msk [vmem:[#allocation2 + $0x250] sm:$0x1] %vm771_vm3, %v6365_v0  ;;  %818 = vst.msk [vmem:[#allocation2 + $0x278] sm:$0x1] %vm771_vm3, %v6365_v0 }
  0x37   :  { %5957 = vmatmul.mubr.msk.f32.gmra.mrb[14].mxu1 %vm113_vm2, %v87_v40  ;;  %5911 = vmatprep.mubr.msk.f32.mxu0 %vm113_vm2, %v56_v41  ;;  %819 = vst.msk [vmem:[#allocation2 + $0x2a0] sm:$0x1] %vm771_vm3, %v6365_v0  ;;  %820 = vst.msk [vmem:[#allocation2 + $0x318] sm:$0x1] %vm771_vm3, %v6365_v0 }
  0x38   :  { %5959 = vmatprep.mubr.msk.f32.mxu1 %vm113_vm2, %v88_v42  ;;  %821 = vst.msk [vmem:[#allocation2 + $0x340] sm:$0x1] %vm771_vm3, %v6365_v0  ;;  %822 = vst.msk [vmem:[#allocation2 + $0x368] sm:$0x1] %vm771_vm3, %v6365_v0 }
  0x39   :  { %823 = vst.msk [vmem:[#allocation2 + $0x390] sm:$0x1] %vm771_vm3, %v6365_v0  ;;  %824 = vst.msk [vmem:[#allocation2 + $0x3b8] sm:$0x1] %vm771_vm3, %v6365_v0 }
  0x3a   :  { %5912 = vmatmul.mubr.msk.f32.gmra.mrb[16].mxu0 %vm113_vm2, %v57_v43  ;;  %825 = vst.msk [vmem:[#allocation2 + $0x3e0] sm:$0x1] %vm771_vm3, %v6365_v0  ;;  %826 = vst.msk [vmem:[#allocation2 + $0x408] sm:$0x1] %vm771_vm3, %v6365_v0 }
  0x3b   :  { %5960 = vmatmul.mubr.msk.f32.gmra.mrb[16].mxu1 %vm113_vm2, %v89_v44  ;;  %5914 = vmatprep.mubr.msk.f32.mxu0 %vm113_vm2, %v58_v45  ;;  %827 = vst.msk [vmem:[#allocation2 + $0x430] sm:$0x1] %vm771_vm3, %v6365_v0  ;;  %828 = vst.msk [vmem:[#allocation2 + $0x458] sm:$0x1] %vm771_vm3, %v6365_v0 }
  0x3c   :  { %5962 = vmatprep.mubr.msk.f32.mxu1 %vm113_vm2, %v90_v46  ;;  %829 = vst.msk [vmem:[#allocation2 + $0x480] sm:$0x1] %vm771_vm3, %v6365_v0  ;;  %830 = vst.msk [vmem:[#allocation2 + $0x4a8] sm:$0x1] %vm771_vm3, %v6365_v0 }
  0x3d   :  { %831 = vst.msk [vmem:[#allocation2 + $0x4d0] sm:$0x1] %vm771_vm3, %v6365_v0  ;;  %832 = vst.msk [vmem:[#allocation2 + $0x4f8] sm:$0x1] %vm771_vm3, %v6365_v0 }
  0x3e   :  { %5915 = vmatmul.mubr.msk.f32.gmra.mrb[18].mxu0 %vm113_vm2, %v59_v47  ;;  %833 = vst.msk [vmem:[#allocation2 + $0x520] sm:$0x1] %vm771_vm3, %v6365_v0  ;;  %834 = vst.msk [vmem:[#allocation2 + $0x548] sm:$0x1] %vm771_vm3, %v6365_v0 }
  0x3f   :  { %5963 = vmatmul.mubr.msk.f32.gmra.mrb[18].mxu1 %vm113_vm2, %v91_v48  ;;  %5917 = vmatprep.mubr.msk.f32.mxu0 %vm113_vm2, %v60_v49  ;;  %835 = vst.msk [vmem:[#allocation2 + $0x570] sm:$0x1] %vm771_vm3, %v6365_v0  ;;  %v98_v0 = vld [vmem:[#allocation3 + $0x1d0] sm:$0xff] }
  0x40   :  { %5965 = vmatprep.mubr.msk.f32.mxu1 %vm113_vm2, %v92_v50 }
  0x42   :  { %5918 = vmatmul.mubr.msk.f32.gmra.mrb[20].mxu0 %vm113_vm2, %v61_v51 }
  0x43   :  { %5966 = vmatmul.mubr.msk.f32.gmra.mrb[20].mxu1 %vm113_vm2, %v93_v52  ;;  %5920 = vmatprep.mubr.msk.f32.mxu0 %vm113_vm2, %v62_v53 }
  0x44   :  { %5968 = vmatprep.mubr.msk.f32.mxu1 %vm113_vm2, %v94_v57 }
  0x46   :  { %5921 = vmatmul.mubr.msk.f32.gmra.mrb[22].mxu0 %vm113_vm2, %v63_v55 }
  0x47   :  { %5969 = vmatmul.mubr.msk.f32.gmra.mrb[22].mxu1 %vm113_vm2, %v95_v58  ;;  %5923 = vmatprep.mubr.msk.f32.mxu0 %vm113_vm2, %v64_v60 }
  0x48   :  { %5971 = vmatprep.mubr.msk.f32.mxu1 %vm113_vm2, %v96_v62 }
  0x4a   :  { %5924 = vmatmul.mubr.msk.f32.gmra.mrb[24].mxu0 %vm113_vm2, %v65_v61 }
  0x4b   :  { %5972 = vmatmul.mubr.msk.f32.gmra.mrb[24].mxu1 %vm113_vm2, %v97_v63  ;;  %5926 = vmatprep.mubr.msk.f32.mxu0 %vm113_vm2, %v66_v1 }
  0x4c   :  { %5974 = vmatprep.mubr.msk.f32.mxu1 %vm113_vm2, %v98_v0 }
  0x4e   :  { %5927 = vmatmul.mubr.msk.f32.gmra.mrb[26].mxu0 %vm113_vm2, %v67_v2 }
  0x4f   :  { %5975 = vmatmul.mubr.msk.f32.gmra.mrb[26].mxu1 %vm113_vm2, %v99_v3  ;;  %5929 = vmatprep.mubr.msk.f32.mxu0 %vm113_vm2, %v68_v4 }
  0x50   :  { %5977 = vmatprep.mubr.msk.f32.mxu1 %vm113_vm2, %v100_v6 }
  0x52   :  { %5930 = vmatmul.mubr.msk.f32.gmra.mrb[28].mxu0 %vm113_vm2, %v69_v5 }
  0x53   :  { %5978 = vmatmul.mubr.msk.f32.gmra.mrb[28].mxu1 %vm113_vm2, %v101_v7  ;;  %5932 = vmatprep.mubr.msk.f32.mxu0 %vm113_vm2, %v70_v8 }
  0x56   :  { %5933 = vmatmul.mubr.msk.f32.gmra.mrb[30].mxu0 %vm113_vm2, %v71_v9 }
  0xed   :  { %v5889_v11 = vpop.f32.mrb[0].mxu0 }
  0xee   :  { %v5937_v12 = vpop.f32.mrb[0].mxu1  ;;  %v378_v13 = vadd.f32 %v5889_v11, %v6653_v10  ;;  %v372_v15 = vpop.f32.mrb[1].mxu0 }
  0xef   :  { %v538_v14 = vadd.f32 %v5937_v12, %v6653_v10  ;;  %v532_v16 = vpop.f32.mrb[1].mxu1  ;;  %v373_v17 = vadd.f32 %v6653_v10, %v372_v15 }
  0xf0   :  { %v533_v18 = vadd.f32 %v6653_v10, %v532_v16  ;;  %v692_v19 = vmax.f32 %v378_v13, 0.0 }
  0xf1   :  { %v724_v20 = vmax.f32 %v538_v14, 0.0  ;;  %v691_v21 = vmax.f32 %v373_v17, 0.0  ;;  %v5892_v23 = vpop.f32.mrb[2].mxu0 }
  0xf2   :  { %v723_v22 = vmax.f32 %v533_v18, 0.0  ;;  %v5940_v24 = vpop.f32.mrb[2].mxu1  ;;  %837 = vst.msk [vmem:[#allocation2 + $0x40] sm:$0xff] %vm755_vm0, %v692_v19  ;;  %v388_v25 = vadd.f32 %v5892_v23, %v6653_v10  ;;  %v382_v26 = vpop.f32.mrb[3].mxu0  ;;  %v102_v23 = vld [vmem:[#allocation3 + $0x1f0] sm:$0xff] }
  0xf3   :  { %869 = vst.msk [vmem:[#allocation2 + $0x310] sm:$0xff] %vm755_vm0, %v724_v20  ;;  %v548_v27 = vadd.f32 %v5940_v24, %v6653_v10  ;;  %v542_v28 = vpop.f32.mrb[3].mxu1  ;;  %836 = vst.msk [vmem:[#allocation2 + $0x38] sm:$0xff] %vm755_vm0, %v691_v21  ;;  %v383_v29 = vadd.f32 %v6653_v10, %v382_v26  ;;  %v103_v24 = vld [vmem:[#allocation3 + $0x1f8] sm:$0xff]  ;;  %5980 = vmatprep.mubr.msk.f32.mxu1 %vm113_vm2, %v102_v23 }
  0xf4   :  { %868 = vst.msk [vmem:[#allocation2 + $0x308] sm:$0xff] %vm755_vm0, %v723_v22  ;;  %v543_v30 = vadd.f32 %v6653_v10, %v542_v28  ;;  %v694_v31 = vmax.f32 %v388_v25, 0.0  ;;  %5981 = vmatmul.mubr.msk.f32.gmra.mrb[30].mxu1 %vm113_vm2, %v103_v24 }
  0xf5   :  { %v726_v32 = vmax.f32 %v548_v27, 0.0  ;;  %v693_v33 = vmax.f32 %v383_v29, 0.0  ;;  %v5895_v35 = vpop.f32.mrb[4].mxu0 }
  0xf6   :  { %v725_v34 = vmax.f32 %v543_v30, 0.0  ;;  %v5943_v36 = vpop.f32.mrb[4].mxu1  ;;  %839 = vst.msk [vmem:[#allocation2 + $0x68] sm:$0xff] %vm755_vm0, %v694_v31  ;;  %v398_v37 = vadd.f32 %v5895_v35, %v6653_v10  ;;  %v392_v38 = vpop.f32.mrb[5].mxu0 }
  0xf7   :  { %871 = vst.msk [vmem:[#allocation2 + $0x338] sm:$0xff] %vm755_vm0, %v726_v32  ;;  %v558_v39 = vadd.f32 %v5943_v36, %v6653_v10  ;;  %v552_v40 = vpop.f32.mrb[5].mxu1  ;;  %838 = vst.msk [vmem:[#allocation2 + $0x60] sm:$0xff] %vm755_vm0, %v693_v33  ;;  %v393_v41 = vadd.f32 %v6653_v10, %v392_v38 }
  0xf8   :  { %870 = vst.msk [vmem:[#allocation2 + $0x330] sm:$0xff] %vm755_vm0, %v725_v34  ;;  %v553_v42 = vadd.f32 %v6653_v10, %v552_v40  ;;  %v696_v43 = vmax.f32 %v398_v37, 0.0 }
  0xf9   :  { %v728_v44 = vmax.f32 %v558_v39, 0.0  ;;  %v967_v45 = vld [vmem:[#allocation2 + $0x40] sm:$0xff]  ;;  %v695_v46 = vmax.f32 %v393_v41, 0.0  ;;  %v5898_v48 = vpop.f32.mrb[6].mxu0 }
  0xfa   :  { %v727_v47 = vmax.f32 %v553_v42, 0.0  ;;  %1547 = vrot.lane.b32.xlu1 %v967_v45, %s6366_s1  ;;  %841 = vst.msk [vmem:[#allocation2 + $0x90] sm:$0xff] %vm755_vm0, %v696_v43  ;;  %v408_v50 = vadd.f32 %v5898_v48, %v6653_v10  ;;  %v402_v51 = vpop.f32.mrb[7].mxu0  ;;  %v5946_v52 = vpop.f32.mrb[6].mxu1  ;;  %v999_v53 = vld [vmem:[#allocation2 + $0x310] sm:$0xff]  ;;  %v1030_v62 = vld [vmem:[#allocation2 + $0x39] sm:$0xff] }
  0xfb   :  { %v998_v49 = vld [vmem:[#allocation2 + $0x308] sm:$0xff]  ;;  %873 = vst.msk [vmem:[#allocation2 + $0x360] sm:$0xff] %vm755_vm0, %v728_v44  ;;  %840 = vst.msk [vmem:[#allocation2 + $0x88] sm:$0xff] %vm755_vm0, %v695_v46  ;;  %v403_v54 = vadd.f32 %v6653_v10, %v402_v51  ;;  %v568_v55 = vadd.f32 %v5946_v52, %v6653_v10  ;;  %v562_v56 = vpop.f32.mrb[7].mxu1  ;;  %v1063_v25 = vld [vmem:[#allocation2 + $0x311] sm:$0xff] }
  0xfc   :  { %1609 = vrot.lane.b32.xlu0 %v998_v49, %s6366_s1  ;;  %872 = vst.msk [vmem:[#allocation2 + $0x358] sm:$0xff] %vm755_vm0, %v727_v47  ;;  %v698_v57 = vmax.f32 %v408_v50, 0.0  ;;  %v563_v58 = vadd.f32 %v6653_v10, %v562_v56  ;;  %v1031_v8 = vld [vmem:[#allocation2 + $0x41] sm:$0xff]  ;;  %v1062_v13 = vld [vmem:[#allocation2 + $0x309] sm:$0xff]  ;;  %v1092_v30 = vld [vmem:[#allocation2 + $0x37] sm:$0xff] }
  0xfd   :  { %v697_v59 = vmax.f32 %v403_v54, 0.0  ;;  %v730_v60 = vmax.f32 %v568_v55, 0.0  ;;  %v5901_v61 = vpop.f32.mrb[8].mxu0  ;;  %v966_v41 = vld [vmem:[#allocation2 + $0x38] sm:$0xff] }
  0xfe   :  { %1611 = vrot.lane.b32.xlu1 %v999_v53, %s6366_s1  ;;  %843 = vst.msk [vmem:[#allocation2 + $0xb8] sm:$0xff] %vm755_vm0, %v698_v57  ;;  %v729_v63 = vmax.f32 %v563_v58, 0.0  ;;  %v418_v1 = vadd.f32 %v5901_v61, %v6653_v10  ;;  %v412_v2 = vpop.f32.mrb[9].mxu0  ;;  %v5949_v0 = vpop.f32.mrb[8].mxu1  ;;  %v968_v38 = vld [vmem:[#allocation2 + $0x60] sm:$0xff] }
  0xff   :  { %842 = vst.msk [vmem:[#allocation2 + $0xb0] sm:$0xff] %vm755_vm0, %v697_v59  ;;  %875 = vst.msk [vmem:[#allocation2 + $0x388] sm:$0xff] %vm755_vm0, %v730_v60  ;;  %v413_v3 = vadd.f32 %v6653_v10, %v412_v2  ;;  %v578_v4 = vadd.f32 %v5949_v0, %v6653_v10  ;;  %v572_v5 = vpop.f32.mrb[9].mxu1  ;;  %v1000_v52 = vld [vmem:[#allocation2 + $0x330] sm:$0xff]  ;;  %v1093_v55 = vld [vmem:[#allocation2 + $0x3f] sm:$0xff] }
 0x100   :  { %1801 = vrot.lane.b32.xlu0 %v1030_v62, %s6364_s12  ;;  %874 = vst.msk [vmem:[#allocation2 + $0x380] sm:$0xff] %vm755_vm0, %v729_v63  ;;  %v700_v6 = vmax.f32 %v418_v1, 0.0  ;;  %v573_v7 = vadd.f32 %v6653_v10, %v572_v5 }
 0x101   :  { %v699_v9 = vmax.f32 %v413_v3, 0.0  ;;  %v732_v11 = vmax.f32 %v578_v4, 0.0  ;;  %v5904_v12 = vpop.f32.mrb[10].mxu0  ;;  %v969_v4 = vld [vmem:[#allocation2 + $0x68] sm:$0xff] }
 0x102   :  { %1803 = vrot.lane.b32.xlu1 %v1031_v8, %s6364_s12  ;;  %845 = vst.msk [vmem:[#allocation2 + $0xe0] sm:$0xff] %vm755_vm0, %v700_v6  ;;  %v731_v14 = vmax.f32 %v573_v7, 0.0  ;;  %v428_v15 = vadd.f32 %v5904_v12, %v6653_v10  ;;  %v422_v16 = vpop.f32.mrb[11].mxu0  ;;  %v5952_v17 = vpop.f32.mrb[10].mxu1  ;;  %v1032_v7 = vld [vmem:[#allocation2 + $0x61] sm:$0xff]  ;;  %v1001_v8 = vld [vmem:[#allocation2 + $0x338] sm:$0xff] }
 0x103   :  { %844 = vst.msk [vmem:[#allocation2 + $0xd8] sm:$0xff] %vm755_vm0, %v699_v9  ;;  %877 = vst.msk [vmem:[#allocation2 + $0x3b0] sm:$0xff] %vm755_vm0, %v732_v11  ;;  %v423_v18 = vadd.f32 %v6653_v10, %v422_v16  ;;  %v588_v19 = vadd.f32 %v5952_v17, %v6653_v10  ;;  %v582_v20 = vpop.f32.mrb[11].mxu1  ;;  %v1064_v9 = vld [vmem:[#allocation2 + $0x331] sm:$0xff]  ;;  %v1033_v11 = vld [vmem:[#allocation2 + $0x69] sm:$0xff] }
 0x104   :  { %1865 = vrot.lane.b32.xlu0 %v1062_v13, %s6364_s12  ;;  %876 = vst.msk [vmem:[#allocation2 + $0x3a8] sm:$0xff] %vm755_vm0, %v731_v14  ;;  %v702_v21 = vmax.f32 %v428_v15, 0.0  ;;  %v583_v22 = vadd.f32 %v6653_v10, %v582_v20  ;;  %v1094_v12 = vld [vmem:[#allocation2 + $0x5f] sm:$0xff]  ;;  %v970_v13 = vld [vmem:[#allocation2 + $0x88] sm:$0xff] }
 0x105   :  { %v701_v26 = vmax.f32 %v423_v18, 0.0  ;;  %v734_v27 = vmax.f32 %v588_v19, 0.0  ;;  %v5907_v28 = vpop.f32.mrb[12].mxu0  ;;  %v1065_v14 = vld [vmem:[#allocation2 + $0x339] sm:$0xff] }
 0x106   :  { %v5955_v29 = vpop.f32.mrb[12].mxu1  ;;  %1867 = vrot.lane.b32.xlu1 %v1063_v25, %s6364_s12  ;;  %847 = vst.msk [vmem:[#allocation2 + $0x108] sm:$0xff] %vm755_vm0, %v702_v21  ;;  %v733_v31 = vmax.f32 %v583_v22, 0.0  ;;  %v438_v32 = vadd.f32 %v5907_v28, %v6653_v10  ;;  %v432_v33 = vpop.f32.mrb[13].mxu0  ;;  %v1002_v19 = vld [vmem:[#allocation2 + $0x358] sm:$0xff]  ;;  %v1095_v21 = vld [vmem:[#allocation2 + $0x67] sm:$0xff] }
 0x107   :  { %v598_v34 = vadd.f32 %v5955_v29, %v6653_v10  ;;  %v592_v35 = vpop.f32.mrb[13].mxu1  ;;  %846 = vst.msk [vmem:[#allocation2 + $0x100] sm:$0xff] %vm755_vm0, %v701_v26  ;;  %879 = vst.msk [vmem:[#allocation2 + $0x3d8] sm:$0xff] %vm755_vm0, %v734_v27  ;;  %v433_v36 = vadd.f32 %v6653_v10, %v432_v33  ;;  %v971_v28 = vld [vmem:[#allocation2 + $0x90] sm:$0xff] }
 0x108   :  { %2053 = vrot.lane.b32.xlu0 %v1092_v30, %s6367_s20  ;;  %v593_v37 = vadd.f32 %v6653_v10, %v592_v35  ;;  %878 = vst.msk [vmem:[#allocation2 + $0x3d0] sm:$0xff] %vm755_vm0, %v733_v31  ;;  %v704_v39 = vmax.f32 %v438_v32, 0.0  ;;  %v1034_v30 = vld [vmem:[#allocation2 + $0x89] sm:$0xff]  ;;  %v1003_v31 = vld [vmem:[#allocation2 + $0x360] sm:$0xff]  ;;  %v1035_v33 = vld [vmem:[#allocation2 + $0x91] sm:$0xff] }
 0x109   :  { %v736_v40 = vmax.f32 %v598_v34, 0.0  ;;  %v703_v42 = vmax.f32 %v433_v36, 0.0  ;;  %v5910_v44 = vpop.f32.mrb[14].mxu0  ;;  %v1066_v32 = vld [vmem:[#allocation2 + $0x359] sm:$0xff]  ;;  %v1096_v34 = vld [vmem:[#allocation2 + $0x87] sm:$0xff]  ;;  %v972_v35 = vld [vmem:[#allocation2 + $0xb0] sm:$0xff] }
 0x10a   :  { %v735_v43 = vmax.f32 %v593_v37, 0.0  ;;  %v5958_v45 = vpop.f32.mrb[14].mxu1  ;;  %1545 = vrot.lane.b32.xlu1 %v966_v41, %s6366_s1  ;;  %849 = vst.msk [vmem:[#allocation2 + $0x130] sm:$0xff] %vm755_vm0, %v704_v39  ;;  %v448_v46 = vadd.f32 %v5910_v44, %v6653_v10  ;;  %v442_v47 = vpop.f32.mrb[15].mxu0  ;;  %v1067_v36 = vld [vmem:[#allocation2 + $0x361] sm:$0xff] }
 0x10b   :  { %881 = vst.msk [vmem:[#allocation2 + $0x400] sm:$0xff] %vm755_vm0, %v736_v40  ;;  %v608_v48 = vadd.f32 %v5958_v45, %v6653_v10  ;;  %v602_v49 = vpop.f32.mrb[15].mxu1  ;;  %848 = vst.msk [vmem:[#allocation2 + $0x128] sm:$0xff] %vm755_vm0, %v703_v42  ;;  %v443_v50 = vadd.f32 %v6653_v10, %v442_v47  ;;  %v1004_v41 = vld [vmem:[#allocation2 + $0x380] sm:$0xff] }
 0x10c   :  { %1549 = vrot.lane.b32.xlu0 %v968_v38, %s6366_s1  ;;  %880 = vst.msk [vmem:[#allocation2 + $0x3f8] sm:$0xff] %vm755_vm0, %v735_v43  ;;  %v603_v51 = vadd.f32 %v6653_v10, %v602_v49  ;;  %v706_v53 = vmax.f32 %v448_v46, 0.0  ;;  %v1097_v43 = vld [vmem:[#allocation2 + $0x8f] sm:$0xff] }
 0x10d   :  { %v738_v54 = vmax.f32 %v608_v48, 0.0  ;;  %v705_v56 = vmax.f32 %v443_v50, 0.0  ;;  %v5913_v58 = vpop.f32.mrb[16].mxu0  ;;  %v973_v50 = vld [vmem:[#allocation2 + $0xb8] sm:$0xff] }
 0x10e   :  { %v737_v57 = vmax.f32 %v603_v51, 0.0  ;;  %v5961_v59 = vpop.f32.mrb[16].mxu1  ;;  %2055 = vrot.lane.b32.xlu1 %v1093_v55, %s6367_s20  ;;  %851 = vst.msk [vmem:[#allocation2 + $0x158] sm:$0xff] %vm755_vm0, %v706_v53  ;;  %v458_v60 = vadd.f32 %v5913_v58, %v6653_v10  ;;  %v452_v61 = vpop.f32.mrb[17].mxu0  ;;  %v1005_v53 = vld [vmem:[#allocation2 + $0x388] sm:$0xff]  ;;  %v1037_v55 = vld [vmem:[#allocation2 + $0xb9] sm:$0xff] }
 0x10f   :  { %883 = vst.msk [vmem:[#allocation2 + $0x428] sm:$0xff] %vm755_vm0, %v738_v54  ;;  %v618_v62 = vadd.f32 %v5961_v59, %v6653_v10  ;;  %v612_v63 = vpop.f32.mrb[17].mxu1  ;;  %850 = vst.msk [vmem:[#allocation2 + $0x150] sm:$0xff] %vm755_vm0, %v705_v56  ;;  %v453_v1 = vadd.f32 %v6653_v10, %v452_v61  ;;  %v1068_v54 = vld [vmem:[#allocation2 + $0x381] sm:$0xff]  ;;  %v974_v61 = vld [vmem:[#allocation2 + $0xd8] sm:$0xff] }
 0x110   :  { %1613 = vrot.lane.b32.xlu0 %v1000_v52, %s6366_s1  ;;  %882 = vst.msk [vmem:[#allocation2 + $0x420] sm:$0xff] %vm755_vm0, %v737_v57  ;;  %v613_v2 = vadd.f32 %v6653_v10, %v612_v63  ;;  %v708_v0 = vmax.f32 %v458_v60, 0.0  ;;  %v1036_v52 = vld [vmem:[#allocation2 + $0xb1] sm:$0xff]  ;;  %v1069_v63 = vld [vmem:[#allocation2 + $0x389] sm:$0xff] }
 0x111   :  { %v740_v3 = vmax.f32 %v618_v62, 0.0  ;;  %v707_v5 = vmax.f32 %v453_v1, 0.0  ;;  %v5916_v15 = vpop.f32.mrb[18].mxu0  ;;  %v1098_v57 = vld [vmem:[#allocation2 + $0xaf] sm:$0xff] }
 0x112   :  { %v739_v6 = vmax.f32 %v613_v2, 0.0  ;;  %1551 = vrot.lane.b32.xlu1 %v969_v4, %s6366_s1  ;;  %853 = vst.msk [vmem:[#allocation2 + $0x180] sm:$0xff] %vm755_vm0, %v708_v0  ;;  %v468_v16 = vadd.f32 %v5916_v15, %v6653_v10  ;;  %v462_v17 = vpop.f32.mrb[19].mxu0  ;;  %v5964_v23 = vpop.f32.mrb[18].mxu1  ;;  %v1070_v15 = vld [vmem:[#allocation2 + $0x3a9] sm:$0xff] }
 0x113   :  { %885 = vst.msk [vmem:[#allocation2 + $0x450] sm:$0xff] %vm755_vm0, %v740_v3  ;;  %852 = vst.msk [vmem:[#allocation2 + $0x178] sm:$0xff] %vm755_vm0, %v707_v5  ;;  %v463_v18 = vadd.f32 %v6653_v10, %v462_v17  ;;  %v628_v24 = vadd.f32 %v5964_v23, %v6653_v10  ;;  %v622_v25 = vpop.f32.mrb[19].mxu1  ;;  %v1006_v5 = vld [vmem:[#allocation2 + $0x3a8] sm:$0xff]  ;;  %v1100_v23 = vld [vmem:[#allocation2 + $0xd7] sm:$0xff] }
 0x114   :  { %1805 = vrot.lane.b32.xlu0 %v1032_v7, %s6364_s12  ;;  %884 = vst.msk [vmem:[#allocation2 + $0x448] sm:$0xff] %vm755_vm0, %v739_v6  ;;  %v710_v20 = vmax.f32 %v468_v16, 0.0  ;;  %v623_v26 = vadd.f32 %v6653_v10, %v622_v25  ;;  %v1099_v7 = vld [vmem:[#allocation2 + $0xb7] sm:$0xff] }
 0x115   :  { %v709_v22 = vmax.f32 %v463_v18, 0.0  ;;  %v742_v27 = vmax.f32 %v628_v24, 0.0  ;;  %v5919_v37 = vpop.f32.mrb[20].mxu0 }
 0x116   :  { %1615 = vrot.lane.b32.xlu1 %v1001_v8, %s6366_s1  ;;  %855 = vst.msk [vmem:[#allocation2 + $0x1a8] sm:$0xff] %vm755_vm0, %v710_v20  ;;  %v741_v29 = vmax.f32 %v623_v26, 0.0  ;;  %v478_v38 = vadd.f32 %v5919_v37, %v6653_v10  ;;  %v472_v39 = vpop.f32.mrb[21].mxu0  ;;  %v5967_v45 = vpop.f32.mrb[20].mxu1  ;;  %v1039_v20 = vld [vmem:[#allocation2 + $0xe1] sm:$0xff] }
 0x117   :  { %854 = vst.msk [vmem:[#allocation2 + $0x1a0] sm:$0xff] %vm755_vm0, %v709_v22  ;;  %887 = vst.msk [vmem:[#allocation2 + $0x478] sm:$0xff] %vm755_vm0, %v742_v27  ;;  %v473_v40 = vadd.f32 %v6653_v10, %v472_v39  ;;  %v638_v46 = vadd.f32 %v5967_v45, %v6653_v10  ;;  %v632_v47 = vpop.f32.mrb[21].mxu1  ;;  %v1040_v39 = vld [vmem:[#allocation2 + $0x101] sm:$0xff]  ;;  %v1009_v45 = vld [vmem:[#allocation2 + $0x3d8] sm:$0xff] }
 0x118   :  { %1869 = vrot.lane.b32.xlu0 %v1064_v9, %s6364_s12  ;;  %886 = vst.msk [vmem:[#allocation2 + $0x470] sm:$0xff] %vm755_vm0, %v741_v29  ;;  %v712_v42 = vmax.f32 %v478_v38, 0.0  ;;  %v633_v48 = vadd.f32 %v6653_v10, %v632_v47  ;;  %v975_v9 = vld [vmem:[#allocation2 + $0xe0] sm:$0xff] }
 0x119   :  { %v711_v44 = vmax.f32 %v473_v40, 0.0  ;;  %v744_v49 = vmax.f32 %v638_v46, 0.0  ;;  %v5922_v56 = vpop.f32.mrb[22].mxu0 }
 0x11a   :  { %1807 = vrot.lane.b32.xlu1 %v1033_v11, %s6364_s12  ;;  %857 = vst.msk [vmem:[#allocation2 + $0x1d0] sm:$0xff] %vm755_vm0, %v712_v42  ;;  %v743_v51 = vmax.f32 %v633_v48, 0.0  ;;  %v488_v58 = vadd.f32 %v5922_v56, %v6653_v10  ;;  %v482_v59 = vpop.f32.mrb[23].mxu0  ;;  %v5970_v2 = vpop.f32.mrb[22].mxu1  ;;  %v1038_v11 = vld [vmem:[#allocation2 + $0xd9] sm:$0xff]  ;;  %v1072_v48 = vld [vmem:[#allocation2 + $0x3d1] sm:$0xff] }
 0x11b   :  { %856 = vst.msk [vmem:[#allocation2 + $0x1c8] sm:$0xff] %vm755_vm0, %v711_v44  ;;  %889 = vst.msk [vmem:[#allocation2 + $0x4a0] sm:$0xff] %vm755_vm0, %v744_v49  ;;  %v483_v60 = vadd.f32 %v6653_v10, %v482_v59  ;;  %v648_v0 = vadd.f32 %v5970_v2, %v6653_v10  ;;  %v642_v3 = vpop.f32.mrb[23].mxu1  ;;  %v978_v59 = vld [vmem:[#allocation2 + $0x128] sm:$0xff] }
 0x11c   :  { %2057 = vrot.lane.b32.xlu0 %v1094_v12, %s6367_s20  ;;  %888 = vst.msk [vmem:[#allocation2 + $0x498] sm:$0xff] %vm755_vm0, %v743_v51  ;;  %v714_v62 = vmax.f32 %v488_v58, 0.0  ;;  %v643_v4 = vadd.f32 %v6653_v10, %v642_v3  ;;  %v1007_v12 = vld [vmem:[#allocation2 + $0x3b0] sm:$0xff]  ;;  %v1103_v2 = vld [vmem:[#allocation2 + $0x107] sm:$0xff] }
 0x11d   :  { %v713_v1 = vmax.f32 %v483_v60, 0.0  ;;  %v746_v6 = vmax.f32 %v648_v0, 0.0 }
 0x11e   :  { %1871 = vrot.lane.b32.xlu1 %v1065_v14, %s6364_s12  ;;  %859 = vst.msk [vmem:[#allocation2 + $0x1f8] sm:$0xff] %vm755_vm0, %v714_v62  ;;  %v745_v8 = vmax.f32 %v643_v4, 0.0  ;;  %v5925_v14 = vpop.f32.mrb[24].mxu0  ;;  %v5973_v22 = vpop.f32.mrb[24].mxu1 }
 0x11f   :  { %858 = vst.msk [vmem:[#allocation2 + $0x1f0] sm:$0xff] %vm755_vm0, %v713_v1  ;;  %891 = vst.msk [vmem:[#allocation2 + $0x4c8] sm:$0xff] %vm755_vm0, %v746_v6  ;;  %v498_v16 = vadd.f32 %v5925_v14, %v6653_v10  ;;  %v492_v17 = vpop.f32.mrb[25].mxu0  ;;  %v658_v24 = vadd.f32 %v5973_v22, %v6653_v10  ;;  %v652_v25 = vpop.f32.mrb[25].mxu1  ;;  %v1042_v14 = vld [vmem:[#allocation2 + $0x129] sm:$0xff] }
 0x120   :  { %1553 = vrot.lane.b32.xlu0 %v970_v13, %s6366_s1  ;;  %890 = vst.msk [vmem:[#allocation2 + $0x4c0] sm:$0xff] %vm755_vm0, %v745_v8  ;;  %v6797_v13 = vpop.permute.xlu0 %1541  ;;  %v493_v18 = vadd.f32 %v6653_v10, %v492_v17  ;;  %v653_v27 = vadd.f32 %v6653_v10, %v652_v25 }
 0x121   :  { %v748_v29 = vmax.f32 %v658_v24, 0.0  ;;  %v5928_v37 = vpop.f32.mrb[26].mxu0 }
 0x122   :  { %2059 = vrot.lane.b32.xlu1 %v1095_v21, %s6367_s20  ;;  %v715_v21 = vmax.f32 %v493_v18, 0.0  ;;  %v508_v40 = vadd.f32 %v5928_v37, %v6653_v10  ;;  %v5976_v47 = vpop.f32.mrb[26].mxu1 }
 0x123   :  { %893 = vst.msk [vmem:[#allocation2 + $0x4f0] sm:$0xff] %vm755_vm0, %v748_v29  ;;  %v668_v49 = vadd.f32 %v5976_v47, %v6653_v10  ;;  %v1013_v47 = vld [vmem:[#allocation2 + $0x428] sm:$0xff] }
 0x124   :  { %1617 = vrot.lane.b32.xlu0 %v1002_v19, %s6366_s1  ;;  %v716_v19 = vmax.f32 %v498_v16, 0.0  ;;  %v6807_v26 = vpop.permute.xlu0 %1543  ;;  %860 = vst.msk [vmem:[#allocation2 + $0x218] sm:$0xff] %vm755_vm0, %v715_v21  ;;  %v718_v44 = vmax.f32 %v508_v40, 0.0  ;;  %v1011_v21 = vld [vmem:[#allocation2 + $0x400] sm:$0xff] }
 0x126   :  { %1555 = vrot.lane.b32.xlu1 %v971_v28, %s6366_s1  ;;  %861 = vst.msk [vmem:[#allocation2 + $0x220] sm:$0xff] %vm755_vm0, %v716_v19  ;;  %v976_v28 = vld [vmem:[#allocation2 + $0x100] sm:$0xff]  ;;  %863 = vst.msk [vmem:[#allocation2 + $0x248] sm:$0xff] %vm755_vm0, %v718_v44  ;;  %v1044_v44 = vld [vmem:[#allocation2 + $0x151] sm:$0xff] }
 0x128   :  { %1809 = vrot.lane.b32.xlu0 %v1034_v30, %s6364_s12  ;;  %v1071_v30 = vld [vmem:[#allocation2 + $0x3b1] sm:$0xff] }
 0x12a   :  { %1619 = vrot.lane.b32.xlu1 %v1003_v31, %s6366_s1  ;;  %v747_v31 = vmax.f32 %v653_v27, 0.0  ;;  %v1043_v27 = vld [vmem:[#allocation2 + $0x131] sm:$0xff] }
 0x12c   :  { %1873 = vrot.lane.b32.xlu0 %v1066_v32, %s6364_s12  ;;  %892 = vst.msk [vmem:[#allocation2 + $0x4e8] sm:$0xff] %vm755_vm0, %v747_v31  ;;  %v6815_v32 = vpop.permute.xlu1 %1607 }
 0x12d   :  { %8980 = vst [vmem:[#allocation6_spill] sm:$0xff] %v6815_v32 }
 0x12e   :  { %1811 = vrot.lane.b32.xlu1 %v1035_v33, %s6364_s12  ;;  %v1008_v33 = vld [vmem:[#allocation2 + $0x3d0] sm:$0xff] }
 0x130   :  { %2061 = vrot.lane.b32.xlu0 %v1096_v34, %s6367_s20  ;;  %v6817_v34 = vpop.permute.xlu0 %1605  ;;  %v6821_v38 = vpop.permute.xlu1 %1799 }
 0x131   :  { %8981 = vst [vmem:[#allocation7_spill] sm:$0xff] %v6817_v34  ;;  %v1115_v34 = vld [vmem:[#allocation2 + $0x1f7] sm:$0xff] }
 0x132   :  { %1875 = vrot.lane.b32.xlu1 %v1067_v36, %s6364_s12  ;;  %v977_v36 = vld [vmem:[#allocation2 + $0x108] sm:$0xff] }
 0x134   :  { %1557 = vrot.lane.b32.xlu0 %v972_v35, %s6366_s1  ;;  %v1101_v35 = vld [vmem:[#allocation2 + $0xdf] sm:$0xff]  ;;  %v6825_v42 = vpop.permute.xlu0 %1797 }
 0x136   :  { %2063 = vrot.lane.b32.xlu1 %v1097_v43, %s6367_s20 }
 0x138   :  { %1621 = vrot.lane.b32.xlu0 %v1004_v41, %s6366_s1  ;;  %v502_v41 = vpop.f32.mrb[27].mxu0  ;;  %v6833_v51 = vpop.permute.xlu0 %1861 }
 0x139   :  { %v503_v43 = vadd.f32 %v6653_v10, %v502_v41  ;;  %8982 = vst [vmem:[#allocation8_spill] sm:$0xff] %v6833_v51  ;;  %v5931_v0 = vpop.f32.mrb[28].mxu0 }
 0x13a   :  { %1559 = vrot.lane.b32.xlu1 %v973_v50, %s6366_s1  ;;  %v662_v50 = vpop.f32.mrb[27].mxu1  ;;  %v518_v3 = vadd.f32 %v5931_v0, %v6653_v10  ;;  %v512_v4 = vpop.f32.mrb[29].mxu0 }
 0x13b   :  { %v717_v46 = vmax.f32 %v503_v43, 0.0  ;;  %v981_v43 = vld [vmem:[#allocation2 + $0x158] sm:$0xff] }
 0x13c   :  { %1813 = vrot.lane.b32.xlu0 %v1036_v52, %s6364_s12  ;;  %v663_v52 = vadd.f32 %v6653_v10, %v662_v50 }
 0x13d   :  { %862 = vst.msk [vmem:[#allocation2 + $0x240] sm:$0xff] %vm755_vm0, %v717_v46 }
 0x13e   :  { %1623 = vrot.lane.b32.xlu1 %v1005_v53, %s6366_s1  ;;  %v6837_v53 = vpop.permute.xlu1 %1863  ;;  %v749_v56 = vmax.f32 %v663_v52, 0.0  ;;  %v1045_v52 = vld [vmem:[#allocation2 + $0x159] sm:$0xff] }
 0x13f   :  { %8983 = vst [vmem:[#allocation9_spill] sm:$0xff] %v6837_v53 }
 0x140   :  { %1877 = vrot.lane.b32.xlu0 %v1068_v54, %s6364_s12  ;;  %v750_v54 = vmax.f32 %v668_v49, 0.0  ;;  %894 = vst.msk [vmem:[#allocation2 + $0x510] sm:$0xff] %vm755_vm0, %v749_v56  ;;  %v982_v56 = vld [vmem:[#allocation2 + $0x178] sm:$0xff] }
 0x142   :  { %1815 = vrot.lane.b32.xlu1 %v1037_v55, %s6364_s12  ;;  %v1041_v55 = vld [vmem:[#allocation2 + $0x109] sm:$0xff]  ;;  %895 = vst.msk [vmem:[#allocation2 + $0x518] sm:$0xff] %vm755_vm0, %v750_v54 }
 0x143   :  { %v1106_v54 = vld [vmem:[#allocation2 + $0x14f] sm:$0xff] }
 0x144   :  { %2065 = vrot.lane.b32.xlu0 %v1098_v57, %s6367_s20  ;;  %v1102_v57 = vld [vmem:[#allocation2 + $0xff] sm:$0xff] }
 0x146   :  { %1879 = vrot.lane.b32.xlu1 %v1069_v63, %s6364_s12  ;;  %v1010_v63 = vld [vmem:[#allocation2 + $0x3f8] sm:$0xff] }
 0x148   :  { %1561 = vrot.lane.b32.xlu0 %v974_v61, %s6366_s1  ;;  %v1073_v61 = vld [vmem:[#allocation2 + $0x3d9] sm:$0xff] }
 0x14a   :  { %2067 = vrot.lane.b32.xlu1 %v1099_v7, %s6367_s20  ;;  %v720_v7 = vmax.f32 %v518_v3, 0.0 }
 0x14c   :  { %1625 = vrot.lane.b32.xlu0 %v1006_v5, %s6366_s1  ;;  %v513_v5 = vadd.f32 %v6653_v10, %v512_v4  ;;  %865 = vst.msk [vmem:[#allocation2 + $0x270] sm:$0xff] %vm755_vm0, %v720_v7  ;;  %v1014_v4 = vld [vmem:[#allocation2 + $0x448] sm:$0xff] }
 0x14e   :  { %1563 = vrot.lane.b32.xlu1 %v975_v9, %s6366_s1  ;;  %v979_v9 = vld [vmem:[#allocation2 + $0x130] sm:$0xff] }
 0x150   :  { %1817 = vrot.lane.b32.xlu0 %v1038_v11, %s6364_s12  ;;  %v719_v11 = vmax.f32 %v513_v5, 0.0 }
 0x152   :  { %1627 = vrot.lane.b32.xlu1 %v1007_v12, %s6366_s1  ;;  %v5979_v12 = vpop.f32.mrb[28].mxu1  ;;  %864 = vst.msk [vmem:[#allocation2 + $0x268] sm:$0xff] %vm755_vm0, %v719_v11 }
 0x153   :  { %v672_v16 = vpop.f32.mrb[29].mxu1 }
 0x154   :  { %1881 = vrot.lane.b32.xlu0 %v1070_v15, %s6364_s12  ;;  %v678_v15 = vadd.f32 %v5979_v12, %v6653_v10  ;;  %v673_v17 = vadd.f32 %v6653_v10, %v672_v16 }
 0x156   :  { %1819 = vrot.lane.b32.xlu1 %v1039_v20, %s6364_s12  ;;  %v752_v19 = vmax.f32 %v678_v15, 0.0  ;;  %v751_v22 = vmax.f32 %v673_v17, 0.0  ;;  %v1046_v15 = vld [vmem:[#allocation2 + $0x179] sm:$0xff] }
 0x158   :  { %2069 = vrot.lane.b32.xlu0 %v1100_v23, %s6367_s20  ;;  %v1074_v23 = vld [vmem:[#allocation2 + $0x3f9] sm:$0xff]  ;;  %897 = vst.msk [vmem:[#allocation2 + $0x540] sm:$0xff] %vm755_vm0, %v752_v19  ;;  %896 = vst.msk [vmem:[#allocation2 + $0x538] sm:$0xff] %vm755_vm0, %v751_v22  ;;  %v1015_v19 = vld [vmem:[#allocation2 + $0x450] sm:$0xff] }
 0x15a   :  { %1883 = vrot.lane.b32.xlu1 %v1071_v30, %s6364_s12  ;;  %v980_v30 = vld [vmem:[#allocation2 + $0x150] sm:$0xff] }
 0x15c   :  { %1565 = vrot.lane.b32.xlu0 %v976_v28, %s6366_s1  ;;  %v1104_v28 = vld [vmem:[#allocation2 + $0x127] sm:$0xff] }
 0x15e   :  { %2071 = vrot.lane.b32.xlu1 %v1101_v35, %s6367_s20 }
 0x15f   :  { %v1091_v53 = vld [vmem:[#allocation2 + $0x541] sm:$0xff] }
 0x160   :  { %1629 = vrot.lane.b32.xlu0 %v1008_v33, %s6366_s1  ;;  %v1075_v33 = vld [vmem:[#allocation2 + $0x401] sm:$0xff] }
 0x162   :  { %1567 = vrot.lane.b32.xlu1 %v977_v36, %s6366_s1  ;;  %v1012_v36 = vld [vmem:[#allocation2 + $0x420] sm:$0xff] }
 0x164   :  { %1821 = vrot.lane.b32.xlu0 %v1040_v39, %s6364_s12  ;;  %v1105_v39 = vld [vmem:[#allocation2 + $0x12f] sm:$0xff] }
 0x166   :  { %1631 = vrot.lane.b32.xlu1 %v1009_v45, %s6366_s1 }
 0x168   :  { %1885 = vrot.lane.b32.xlu0 %v1072_v48, %s6364_s12  ;;  %v1076_v48 = vld [vmem:[#allocation2 + $0x421] sm:$0xff] }
 0x16a   :  { %1823 = vrot.lane.b32.xlu1 %v1041_v55, %s6364_s12 }
 0x16c   :  { %2073 = vrot.lane.b32.xlu0 %v1102_v57, %s6367_s20  ;;  %v6843_v58 = vpop.permute.xlu1 %1547 }
 0x16e   :  { %v6845_v60 = vpop.permute.xlu0 %1609  ;;  %1887 = vrot.lane.b32.xlu1 %v1073_v61, %s6364_s12  ;;  %v5934_v61 = vpop.f32.mrb[30].mxu0 }
 0x16f   :  { %8984 = vst [vmem:[#allocation10_spill] sm:$0xff] %v6845_v60  ;;  %v1059_v60 = vld [vmem:[#allocation2 + $0x271] sm:$0xff] }
 0x170   :  { %1569 = vrot.lane.b32.xlu0 %v978_v59, %s6366_s1  ;;  %v6849_v62 = vpop.permute.xlu1 %1611  ;;  %v1077_v59 = vld [vmem:[#allocation2 + $0x429] sm:$0xff] }
 0x171   :  { %8985 = vst [vmem:[#allocation11_spill] sm:$0xff] %v6849_v62 }
 0x172   :  { %v6851_v1 = vpop.permute.xlu0 %1801  ;;  %2075 = vrot.lane.b32.xlu1 %v1103_v2, %s6367_s20  ;;  %v522_v2 = vpop.f32.mrb[31].mxu0 }
 0x173   :  { %v523_v0 = vadd.f32 %v6653_v10, %v522_v2  ;;  %v1017_v2 = vld [vmem:[#allocation2 + $0x478] sm:$0xff] }
 0x174   :  { %1633 = vrot.lane.b32.xlu0 %v1010_v63, %s6366_s1  ;;  %v6857_v6 = vpop.permute.xlu1 %1803  ;;  %v528_v63 = vadd.f32 %v5934_v61, %v6653_v10  ;;  %v983_v10 = vld [vmem:[#allocation2 + $0x180] sm:$0xff] }
 0x175   :  { %v721_v11 = vmax.f32 %v523_v0, 0.0  ;;  %v1080_v0 = vld [vmem:[#allocation2 + $0x471] sm:$0xff] }
 0x176   :  { %v6859_v8 = vpop.permute.xlu0 %1865  ;;  %1571 = vrot.lane.b32.xlu1 %v979_v9, %s6366_s1  ;;  %v722_v5 = vmax.f32 %v528_v63, 0.0  ;;  %v1107_v9 = vld [vmem:[#allocation2 + $0x157] sm:$0xff] }
 0x177   :  { %8986 = vst [vmem:[#allocation12_spill] sm:$0xff] %v6859_v8  ;;  %866 = vst.msk [vmem:[#allocation2 + $0x290] sm:$0xff] %vm755_vm0, %v721_v11  ;;  %v1110_v11 = vld [vmem:[#allocation2 + $0x19f] sm:$0xff]  ;;  %v995_v8 = vld [vmem:[#allocation2 + $0x270] sm:$0xff] }
 0x178   :  { %1825 = vrot.lane.b32.xlu0 %v1042_v14, %s6364_s12  ;;  %v6867_v18 = vpop.permute.xlu1 %1867  ;;  %867 = vst.msk [vmem:[#allocation2 + $0x298] sm:$0xff] %vm755_vm0, %v722_v5 }
 0x179   :  { %8987 = vst [vmem:[#allocation13_spill] sm:$0xff] %v6867_v18  ;;  %v1089_v18 = vld [vmem:[#allocation2 + $0x519] sm:$0xff] }
 0x17a   :  { %v6869_v20 = vpop.permute.xlu0 %2053  ;;  %1635 = vrot.lane.b32.xlu1 %v1011_v21, %s6366_s1  ;;  %v1078_v21 = vld [vmem:[#allocation2 + $0x449] sm:$0xff] }
 0x17c   :  { %1889 = vrot.lane.b32.xlu0 %v1074_v23, %s6364_s12  ;;  %v6875_v24 = vpop.permute.xlu1 %1545 }
 0x17e   :  { %v6877_v25 = vpop.permute.xlu0 %1549  ;;  %1827 = vrot.lane.b32.xlu1 %v1043_v27, %s6364_s12  ;;  %v1047_v27 = vld [vmem:[#allocation2 + $0x181] sm:$0xff] }
 0x180   :  { %2077 = vrot.lane.b32.xlu0 %v1104_v28, %s6367_s20  ;;  %v6881_v29 = vpop.permute.xlu1 %2055  ;;  %v1108_v28 = vld [vmem:[#allocation2 + $0x177] sm:$0xff] }
 0x182   :  { %v6883_v31 = vpop.permute.xlu0 %1613  ;;  %1891 = vrot.lane.b32.xlu1 %v1075_v33, %s6364_s12  ;;  %v984_v33 = vld [vmem:[#allocation2 + $0x1a0] sm:$0xff] }
 0x183   :  { %8988 = vst [vmem:[#allocation14_spill] sm:$0xff] %v6883_v31  ;;  %v1057_v31 = vld [vmem:[#allocation2 + $0x249] sm:$0xff] }
 0x184   :  { %1573 = vrot.lane.b32.xlu0 %v980_v30, %s6366_s1  ;;  %v6887_v35 = vpop.permute.xlu1 %1551 }
 0x186   :  { %v6889_v37 = vpop.permute.xlu0 %1805  ;;  %2079 = vrot.lane.b32.xlu1 %v1105_v39, %s6367_s20  ;;  %v1079_v39 = vld [vmem:[#allocation2 + $0x451] sm:$0xff] }
 0x188   :  { %1637 = vrot.lane.b32.xlu0 %v1012_v36, %s6366_s1  ;;  %v6893_v40 = vpop.permute.xlu1 %1615 }
 0x189   :  { %8989 = vst [vmem:[#allocation15_spill] sm:$0xff] %v6893_v40 }
 0x18a   :  { %v6895_v41 = vpop.permute.xlu0 %1869  ;;  %1575 = vrot.lane.b32.xlu1 %v981_v43, %s6366_s1 }
 0x18b   :  { %8990 = vst [vmem:[#allocation16_spill] sm:$0xff] %v6895_v41  ;;  %v1025_v41 = vld [vmem:[#allocation2 + $0x518] sm:$0xff] }
 0x18c   :  { %1829 = vrot.lane.b32.xlu0 %v1044_v44, %s6364_s12  ;;  %v6899_v45 = vpop.permute.xlu1 %1807  ;;  %v1016_v44 = vld [vmem:[#allocation2 + $0x470] sm:$0xff] }
 0x18e   :  { %v6901_v46 = vpop.permute.xlu0 %2057  ;;  %1639 = vrot.lane.b32.xlu1 %v1013_v47, %s6366_s1 }
 0x190   :  { %1893 = vrot.lane.b32.xlu0 %v1076_v48, %s6364_s12  ;;  %v6905_v49 = vpop.permute.xlu1 %1871  ;;  %v1109_v48 = vld [vmem:[#allocation2 + $0x17f] sm:$0xff] }
 0x191   :  { %8991 = vst [vmem:[#allocation17_spill] sm:$0xff] %v6905_v49  ;;  %v1087_v49 = vld [vmem:[#allocation2 + $0x4f1] sm:$0xff] }
 0x192   :  { %v6907_v50 = vpop.permute.xlu0 %1553  ;;  %1831 = vrot.lane.b32.xlu1 %v1045_v52, %s6364_s12 }
 0x194   :  { %2081 = vrot.lane.b32.xlu0 %v1106_v54, %s6367_s20  ;;  %v6911_v55 = vpop.permute.xlu1 %2059 }
 0x196   :  { %v6913_v57 = vpop.permute.xlu0 %1617  ;;  %1895 = vrot.lane.b32.xlu1 %v1077_v59, %s6364_s12  ;;  %v1048_v59 = vld [vmem:[#allocation2 + $0x1a1] sm:$0xff] }
 0x197   :  { %8992 = vst [vmem:[#allocation18_spill] sm:$0xff] %v6913_v57 }
 0x198   :  { %1577 = vrot.lane.b32.xlu0 %v982_v56, %s6366_s1  ;;  %v6919_v3 = vpop.permute.xlu1 %1555  ;;  %v985_v56 = vld [vmem:[#allocation2 + $0x1a8] sm:$0xff] }
 0x19a   :  { %v6921_v7 = vpop.permute.xlu0 %1809  ;;  %2083 = vrot.lane.b32.xlu1 %v1107_v9, %s6367_s20  ;;  %v1049_v9 = vld [vmem:[#allocation2 + $0x1a9] sm:$0xff] }
 0x19c   :  { %1641 = vrot.lane.b32.xlu0 %v1014_v4, %s6366_s1  ;;  %v6927_v12 = vpop.permute.xlu1 %1619 }
 0x19d   :  { %8993 = vst [vmem:[#allocation19_spill] sm:$0xff] %v6927_v12  ;;  %v1055_v12 = vld [vmem:[#allocation2 + $0x221] sm:$0xff] }
 0x19e   :  { %v6929_v14 = vpop.permute.xlu0 %1873  ;;  %1579 = vrot.lane.b32.xlu1 %v983_v10, %s6366_s1 }
 0x19f   :  { %8994 = vst [vmem:[#allocation20_spill] sm:$0xff] %v6929_v14 }
 0x1a0   :  { %1833 = vrot.lane.b32.xlu0 %v1046_v15, %s6364_s12  ;;  %v6933_v16 = vpop.permute.xlu1 %1811  ;;  %v986_v15 = vld [vmem:[#allocation2 + $0x1c8] sm:$0xff] }
 0x1a2   :  { %v6935_v17 = vpop.permute.xlu0 %2061  ;;  %1643 = vrot.lane.b32.xlu1 %v1015_v19, %s6366_s1 }
 0x1a4   :  { %1897 = vrot.lane.b32.xlu0 %v1078_v21, %s6364_s12  ;;  %v6939_v22 = vpop.permute.xlu1 %1875  ;;  %v1081_v21 = vld [vmem:[#allocation2 + $0x479] sm:$0xff] }
 0x1a5   :  { %8995 = vst [vmem:[#allocation21_spill] sm:$0xff] %v6939_v22 }
 0x1a6   :  { %v6941_v23 = vpop.permute.xlu0 %1557  ;;  %1835 = vrot.lane.b32.xlu1 %v1047_v27, %s6364_s12 }
 0x1a8   :  { %2085 = vrot.lane.b32.xlu0 %v1108_v28, %s6367_s20  ;;  %v6945_v30 = vpop.permute.xlu1 %2063  ;;  %v1018_v28 = vld [vmem:[#allocation2 + $0x498] sm:$0xff] }
 0x1aa   :  { %v6947_v36 = vpop.permute.xlu0 %1621  ;;  %1899 = vrot.lane.b32.xlu1 %v1079_v39, %s6364_s12  ;;  %v1111_v39 = vld [vmem:[#allocation2 + $0x1a7] sm:$0xff] }
 0x1ab   :  { %8996 = vst [vmem:[#allocation22_spill] sm:$0xff] %v6947_v36 }
 0x1ac   :  { %1581 = vrot.lane.b32.xlu0 %v984_v33, %s6366_s1  ;;  %v6951_v43 = vpop.permute.xlu1 %1559 }
 0x1ae   :  { %v6953_v47 = vpop.permute.xlu0 %1813  ;;  %2087 = vrot.lane.b32.xlu1 %v1109_v48, %s6367_s20 }
 0x1b0   :  { %1645 = vrot.lane.b32.xlu0 %v1016_v44, %s6366_s1  ;;  %v6957_v52 = vpop.permute.xlu1 %1623 }
 0x1b1   :  { %8997 = vst [vmem:[#allocation23_spill] sm:$0xff] %v6957_v52 }
 0x1b2   :  { %v6959_v54 = vpop.permute.xlu0 %1877  ;;  %1583 = vrot.lane.b32.xlu1 %v985_v56, %s6366_s1  ;;  %v987_v56 = vld [vmem:[#allocation2 + $0x1d0] sm:$0xff] }
 0x1b3   :  { %8998 = vst [vmem:[#allocation24_spill] sm:$0xff] %v6959_v54 }
 0x1b4   :  { %1837 = vrot.lane.b32.xlu0 %v1048_v59, %s6364_s12  ;;  %v6963_v61 = vpop.permute.xlu1 %1815  ;;  %v1050_v59 = vld [vmem:[#allocation2 + $0x1c9] sm:$0xff] }
 0x1b6   :  { %v6965_v63 = vpop.permute.xlu0 %2065  ;;  %1647 = vrot.lane.b32.xlu1 %v1017_v2, %s6366_s1 }
 0x1b8   :  { %1901 = vrot.lane.b32.xlu0 %v1080_v0, %s6364_s12  ;;  %v6969_v4 = vpop.permute.xlu1 %1879 }
 0x1b9   :  { %8999 = vst [vmem:[#allocation25_spill] sm:$0xff] %v6969_v4 }
 0x1ba   :  { %v6971_v5 = vpop.permute.xlu0 %1561  ;;  %1839 = vrot.lane.b32.xlu1 %v1049_v9, %s6364_s12  ;;  %v1019_v9 = vld [vmem:[#allocation2 + $0x4a0] sm:$0xff] }
 0x1bc   :  { %2089 = vrot.lane.b32.xlu0 %v1110_v11, %s6367_s20  ;;  %v6975_v10 = vpop.permute.xlu1 %2067  ;;  %v1082_v11 = vld [vmem:[#allocation2 + $0x499] sm:$0xff] }
 0x1be   :  { %v6977_v19 = vpop.permute.xlu0 %1625  ;;  %1903 = vrot.lane.b32.xlu1 %v1081_v21, %s6364_s12  ;;  %v988_v21 = vld [vmem:[#allocation2 + $0x1f0] sm:$0xff] }
 0x1bf   :  { %9000 = vst [vmem:[#allocation26_spill] sm:$0xff] %v6977_v19 }
 0x1c0   :  { %1585 = vrot.lane.b32.xlu0 %v986_v15, %s6366_s1  ;;  %v6981_v27 = vpop.permute.xlu1 %1563 }
 0x1c2   :  { %v6983_v33 = vpop.permute.xlu0 %1817  ;;  %2091 = vrot.lane.b32.xlu1 %v1111_v39, %s6367_s20  ;;  %v1051_v39 = vld [vmem:[#allocation2 + $0x1d1] sm:$0xff] }
 0x1c4   :  { %1649 = vrot.lane.b32.xlu0 %v1018_v28, %s6366_s1  ;;  %v6987_v44 = vpop.permute.xlu1 %1627 }
 0x1c5   :  { %9001 = vst [vmem:[#allocation27_spill] sm:$0xff] %v6987_v44  ;;  %v1083_v44 = vld [vmem:[#allocation2 + $0x4a1] sm:$0xff] }
 0x1c6   :  { %v6989_v48 = vpop.permute.xlu0 %1881  ;;  %1587 = vrot.lane.b32.xlu1 %v987_v56, %s6366_s1 }
 0x1c7   :  { %9002 = vst [vmem:[#allocation28_spill] sm:$0xff] %v6989_v48  ;;  %v5982_v4 = vpop.f32.mrb[30].mxu1 }
 0x1c8   :  { %1841 = vrot.lane.b32.xlu0 %v1050_v59, %s6364_s12  ;;  %v6993_v2 = vpop.permute.xlu1 %1819  ;;  %v1020_v59 = vld [vmem:[#allocation2 + $0x4c0] sm:$0xff]  ;;  %v682_v52 = vpop.f32.mrb[31].mxu1 }
 0x1ca   :  { %v6995_v0 = vpop.permute.xlu0 %2069  ;;  %1651 = vrot.lane.b32.xlu1 %v1019_v9, %s6366_s1 }
 0x1cc   :  { %1905 = vrot.lane.b32.xlu0 %v1082_v11, %s6364_s12  ;;  %v6999_v15 = vpop.permute.xlu1 %1883 }
 0x1cd   :  { %9003 = vst [vmem:[#allocation29_spill] sm:$0xff] %v6999_v15  ;;  %v989_v15 = vld [vmem:[#allocation2 + $0x1f8] sm:$0xff] }
 0x1ce   :  { %v7001_v28 = vpop.permute.xlu0 %1565  ;;  %1843 = vrot.lane.b32.xlu1 %v1051_v39, %s6364_s12  ;;  %v1052_v39 = vld [vmem:[#allocation2 + $0x1f1] sm:$0xff] }
 0x1d0   :  { %1589 = vrot.lane.b32.xlu0 %v988_v21, %s6366_s1  ;;  %v7005_v56 = vpop.permute.xlu1 %2071 }
 0x1d2   :  { %v7007_v48 = vpop.permute.xlu0 %1629  ;;  %1907 = vrot.lane.b32.xlu1 %v1083_v44, %s6364_s12  ;;  %v1084_v44 = vld [vmem:[#allocation2 + $0x4c1] sm:$0xff] }
 0x1d3   :  { %9004 = vst [vmem:[#allocation30_spill] sm:$0xff] %v7007_v48  ;;  %v1021_v48 = vld [vmem:[#allocation2 + $0x4c8] sm:$0xff] }
 0x1d4   :  { %1653 = vrot.lane.b32.xlu0 %v1020_v59, %s6366_s1  ;;  %v7011_v9 = vpop.permute.xlu1 %1567  ;;  %v6212_v59 = vld [vmem:[%s8974_s2] ss:$0 sm:$0xff]  ;;  %s6368_s2 = smov 16  }
 0x1d5   :  { %v688_v54 = vadd.f32 %v6212_v59, %v5982_v4 }
 0x1d6   :  { %v7013_v11 = vpop.permute.xlu0 %1821  ;;  %1591 = vrot.lane.b32.xlu1 %v989_v15, %s6366_s1  ;;  %v683_v15 = vadd.f32 %v6212_v59, %v682_v52 }
 0x1d8   :  { %1845 = vrot.lane.b32.xlu0 %v1052_v39, %s6364_s12  ;;  %v7017_v21 = vpop.permute.xlu1 %1631  ;;  %v990_v39 = vld [vmem:[#allocation2 + $0x218] sm:$0xff]  ;;  %v753_v14 = vmax.f32 %v683_v15, 0.0 }
 0x1d9   :  { %9005 = vst [vmem:[#allocation31_spill] sm:$0xff] %v7017_v21  ;;  %v754_v21 = vmax.f32 %v688_v54, 0.0 }
 0x1da   :  { %v7019_v19 = vpop.permute.xlu0 %1885  ;;  %1655 = vrot.lane.b32.xlu1 %v1021_v48, %s6366_s1  ;;  %898 = vst.msk [vmem:[#allocation2 + $0x560] sm:$0xff] %vm755_vm0, %v753_v14  ;;  %v1022_v48 = vld [vmem:[#allocation2 + $0x4e8] sm:$0xff] }
 0x1db   :  { %9006 = vst [vmem:[#allocation32_spill] sm:$0xff] %v7019_v19  ;;  %v1053_v19 = vld [vmem:[#allocation2 + $0x1f9] sm:$0xff]  ;;  %899 = vst.msk [vmem:[#allocation2 + $0x568] sm:$0xff] %vm755_vm0, %v754_v21 }
 0x1dc   :  { %1909 = vrot.lane.b32.xlu0 %v1084_v44, %s6364_s12  ;;  %v7026_v36 = vpop.permute.xlu1 %1823  ;;  %v1085_v44 = vld [vmem:[#allocation2 + $0x4c9] sm:$0xff]  ;;  %v1054_v21 = vld [vmem:[#allocation2 + $0x219] sm:$0xff] }
 0x1de   :  { %v7028_v22 = vpop.permute.xlu0 %2073  ;;  %1847 = vrot.lane.b32.xlu1 %v1053_v19, %s6364_s12  ;;  %v991_v19 = vld [vmem:[#allocation2 + $0x220] sm:$0xff] }
 0x1e0   :  { %1593 = vrot.lane.b32.xlu0 %v990_v39, %s6366_s1  ;;  %v7034_v4 = vpop.permute.xlu1 %1887  ;;  %v1023_v39 = vld [vmem:[#allocation2 + $0x4f0] sm:$0xff] }
 0x1e1   :  { %9007 = vst [vmem:[#allocation33_spill] sm:$0xff] %v7034_v4  ;;  %v992_v4 = vld [vmem:[#allocation2 + $0x240] sm:$0xff] }
 0x1e2   :  { %v7036_v52 = vpop.permute.xlu0 %1569  ;;  %1911 = vrot.lane.b32.xlu1 %v1085_v44, %s6364_s12  ;;  %v1086_v44 = vld [vmem:[#allocation2 + $0x4e9] sm:$0xff] }
 0x1e4   :  { %1657 = vrot.lane.b32.xlu0 %v1022_v48, %s6366_s1  ;;  %v7040_v54 = vpop.permute.xlu1 %2075 }
 0x1e6   :  { %v7042_v59 = vpop.permute.xlu0 %1633  ;;  %1595 = vrot.lane.b32.xlu1 %v991_v19, %s6366_s1 }
 0x1e7   :  { %9008 = vst [vmem:[#allocation34_spill] sm:$0xff] %v7042_v59 }
 0x1e8   :  { %1849 = vrot.lane.b32.xlu0 %v1054_v21, %s6364_s12  ;;  %v7046_v14 = vpop.permute.xlu1 %1571  ;;  %v1024_v21 = vld [vmem:[#allocation2 + $0x510] sm:$0xff] }
 0x1ea   :  { %v7048_v15 = vpop.permute.xlu0 %1825  ;;  %1659 = vrot.lane.b32.xlu1 %v1023_v39, %s6366_s1 }
 0x1eb   :  { %9009 = vst [vmem:[#allocation35_spill] sm:$0xff] %v7048_v15 }
 0x1ec   :  { %1913 = vrot.lane.b32.xlu0 %v1086_v44, %s6364_s12  ;;  %v7052_v48 = vpop.permute.xlu1 %1635 }
 0x1ed   :  { %9010 = vst [vmem:[#allocation36_spill] sm:$0xff] %v7052_v48 }
 0x1ee   :  { %v7054_v59 = vpop.permute.xlu0 %1889  ;;  %1851 = vrot.lane.b32.xlu1 %v1055_v12, %s6364_s12  ;;  %v1056_v12 = vld [vmem:[#allocation2 + $0x241] sm:$0xff] }
 0x1ef   :  { %9011 = vst [vmem:[#allocation37_spill] sm:$0xff] %v7054_v59  ;;  %v993_v59 = vld [vmem:[#allocation2 + $0x248] sm:$0xff] }
 0x1f0   :  { %1597 = vrot.lane.b32.xlu0 %v992_v4, %s6366_s1  ;;  %v7058_v19 = vpop.permute.xlu1 %1827 }
 0x1f1   :  { %9012 = vst [vmem:[#allocation38_spill] sm:$0xff] %v7058_v19 }
 0x1f2   :  { %v7060_v57 = vpop.permute.xlu0 %2077  ;;  %1915 = vrot.lane.b32.xlu1 %v1087_v49, %s6364_s12  ;;  %v1088_v49 = vld [vmem:[#allocation2 + $0x511] sm:$0xff] }
 0x1f4   :  { %1661 = vrot.lane.b32.xlu0 %v1024_v21, %s6366_s1  ;;  %v7064_v39 = vpop.permute.xlu1 %1891 }
 0x1f5   :  { %9013 = vst [vmem:[#allocation39_spill] sm:$0xff] %v7064_v39  ;;  %v994_v39 = vld [vmem:[#allocation2 + $0x268] sm:$0xff] }
 0x1f6   :  { %v7066_v44 = vpop.permute.xlu0 %1573  ;;  %1599 = vrot.lane.b32.xlu1 %v993_v59, %s6366_s1 }
 0x1f7   :  { %9014 = vst [vmem:[#allocation40_spill] sm:$0xff] %v7066_v44 }
 0x1f8   :  { %1853 = vrot.lane.b32.xlu0 %v1056_v12, %s6364_s12  ;;  %v7070_v4 = vpop.permute.xlu1 %2079  ;;  %v1026_v12 = vld [vmem:[#allocation2 + $0x538] sm:$0xff] }
 0x1fa   :  { %v7072_v48 = vpop.permute.xlu0 %1637  ;;  %1663 = vrot.lane.b32.xlu1 %v1025_v41, %s6366_s1 }
 0x1fb   :  { %9015 = vst [vmem:[#allocation41_spill] sm:$0xff] %v7072_v48 }
 0x1fc   :  { %1917 = vrot.lane.b32.xlu0 %v1088_v49, %s6364_s12  ;;  %v7076_v21 = vpop.permute.xlu1 %1575 }
 0x1fd   :  { %9016 = vst [vmem:[#allocation42_spill] sm:$0xff] %v7076_v21 }
 0x1fe   :  { %v7078_v40 = vpop.permute.xlu0 %1829  ;;  %1855 = vrot.lane.b32.xlu1 %v1057_v31, %s6364_s12  ;;  %v1058_v31 = vld [vmem:[#allocation2 + $0x269] sm:$0xff] }
 0x1ff   :  { %9017 = vst [vmem:[#allocation43_spill] sm:$0xff] %v7078_v40  ;;  %v1286_v40 = vld [vmem:[#allocation2 + $0x67] sm:$0xff] }
 0x200   :  { %1601 = vrot.lane.b32.xlu0 %v994_v39, %s6366_s1  ;;  %v7082_v59 = vpop.permute.xlu1 %1639 }
 0x201   :  { %9018 = vst [vmem:[#allocation44_spill] sm:$0xff] %v7082_v59 }
 0x202   :  { %v7084_v48 = vpop.permute.xlu0 %1893  ;;  %1919 = vrot.lane.b32.xlu1 %v1089_v18, %s6364_s12  ;;  %v1090_v18 = vld [vmem:[#allocation2 + $0x539] sm:$0xff] }
 0x203   :  { %9019 = vst [vmem:[#allocation45_spill] sm:$0xff] %v7084_v48  ;;  %v1027_v48 = vld [vmem:[#allocation2 + $0x540] sm:$0xff] }
 0x204   :  { %1665 = vrot.lane.b32.xlu0 %v1026_v12, %s6366_s1  ;;  %v7088_v41 = vpop.permute.xlu1 %1831 }
 0x205   :  { %9020 = vst [vmem:[#allocation46_spill] sm:$0xff] %v7088_v41  ;;  %v4047_v41 = vld [vmem:[%s8975_s3 + $0x20] sm:$0xf] }
 0x206   :  { %v7090_v49 = vpop.permute.xlu0 %2081  ;;  %1603 = vrot.lane.b32.xlu1 %v995_v8, %s6366_s1  ;;  %v1112_v8 = vld [vmem:[#allocation2 + $0x1c7] sm:$0xff] }
 0x207   :  { %9021 = vst [vmem:[#allocation47_spill] sm:$0xff] %v7090_v49 }
 0x208   :  { %1857 = vrot.lane.b32.xlu0 %v1058_v31, %s6364_s12  ;;  %v7094_v39 = vpop.permute.xlu1 %1895 }
 0x209   :  { %9022 = vst [vmem:[#allocation48_spill] sm:$0xff] %v7094_v39 }
 0x20a   :  { %v7096_v59 = vpop.permute.xlu0 %1577  ;;  %1667 = vrot.lane.b32.xlu1 %v1027_v48, %s6366_s1  ;;  %v1114_v48 = vld [vmem:[#allocation2 + $0x1ef] sm:$0xff] }
 0x20b   :  { %9023 = vst [vmem:[#allocation49_spill] sm:$0xff] %v7096_v59  ;;  %v936_v59 = vld [vmem:[#allocation2 + $0x32f] sm:$0xff] }
 0x20c   :  { %1921 = vrot.lane.b32.xlu0 %v1090_v18, %s6364_s12  ;;  %v7100_v12 = vpop.permute.xlu1 %2083 }
 0x20d   :  { %9024 = vst [vmem:[#allocation50_spill] sm:$0xff] %v7100_v12  ;;  %v901_v12 = vld [vmem:[#allocation2 + $0x17] sm:$0xff] }
 0x20e   :  { %v7102_v62 = vpop.permute.xlu0 %1641  ;;  %1859 = vrot.lane.b32.xlu1 %v1059_v60, %s6364_s12  ;;  %v1116_v60 = vld [vmem:[#allocation2 + $0x217] sm:$0xff]  ;;  %v3526_v19 = vsel %vm755_vm0, %v901_v12, %v6807_v26 }
 0x20f   :  { %9025 = vst [vmem:[#allocation51_spill] sm:$0xff] %v7102_v62  ;;  %v1113_v62 = vld [vmem:[#allocation2 + $0x1cf] sm:$0xff] }
 0x210   :  { %2093 = vrot.lane.b32.xlu0 %v1112_v8, %s6367_s20  ;;  %v7106_v31 = vpop.permute.xlu1 %1579 }
 0x211   :  { %9026 = vst [vmem:[#allocation52_spill] sm:$0xff] %v7106_v31  ;;  %v1119_v31 = vld [vmem:[#allocation2 + $0x247] sm:$0xff] }
 0x212   :  { %v7108_v39 = vpop.permute.xlu0 %1833  ;;  %1923 = vrot.lane.b32.xlu1 %v1091_v53, %s6364_s12  ;;  %v1118_v53 = vld [vmem:[#allocation2 + $0x23f] sm:$0xff]  ;;  %s6372_s12 = smov 32  }
 0x213   :  { %9027 = vst [vmem:[#allocation53_spill] sm:$0xff] %v7108_v39 }
 0x214   :  { %2097 = vrot.lane.b32.xlu0 %v1114_v48, %s6367_s20  ;;  %v7112_v18 = vpop.permute.xlu1 %1643 }
 0x215   :  { %9028 = vst [vmem:[#allocation54_spill] sm:$0xff] %v7112_v18 }
 0x216   :  { %v7114_v51 = vpop.permute.xlu0 %1897  ;;  %2095 = vrot.lane.b32.xlu1 %v1113_v62, %s6367_s20  ;;  %v1120_v62 = vld [vmem:[#allocation2 + $0x267] sm:$0xff] }
 0x217   :  { %9029 = vst [vmem:[#allocation55_spill] sm:$0xff] %v7114_v51  ;;  %v1117_v51 = vld [vmem:[#allocation2 + $0x21f] sm:$0xff] }
 0x218   :  { %2101 = vrot.lane.b32.xlu0 %v1116_v60, %s6367_s20  ;;  %v7118_v8 = vpop.permute.xlu1 %1835 }
 0x219   :  { %9030 = vst [vmem:[#allocation56_spill] sm:$0xff] %v7118_v8  ;;  %v1122_v8 = vld [vmem:[#allocation2 + $0x28f] sm:$0xff] }
 0x21a   :  { %v7120_v32 = vpop.permute.xlu0 %2085  ;;  %2099 = vrot.lane.b32.xlu1 %v1115_v34, %s6367_s20 }
 0x21b   :  { %9031 = vst [vmem:[#allocation57_spill] sm:$0xff] %v7120_v32  ;;  %v4046_v32 = vld [vmem:[%s8975_s3 + $0x18] sm:$0xff] }
 0x21c   :  { %2105 = vrot.lane.b32.xlu0 %v1118_v53, %s6367_s20  ;;  %v7124_v48 = vpop.permute.xlu1 %1899 }
 0x21d   :  { %9032 = vst [vmem:[#allocation58_spill] sm:$0xff] %v7124_v48  ;;  %v1121_v48 = vld [vmem:[#allocation2 + $0x26f] sm:$0xff] }
 0x21e   :  { %v7126_v18 = vpop.permute.xlu0 %1581  ;;  %2103 = vrot.lane.b32.xlu1 %v1117_v51, %s6367_s20  ;;  %v1124_v51 = vld [vmem:[#allocation2 + $0x307] sm:$0xff] }
 0x21f   :  { %9033 = vst [vmem:[#allocation59_spill] sm:$0xff] %v7126_v18 }
 0x220   :  { %2109 = vrot.lane.b32.xlu0 %v1120_v62, %s6367_s20  ;;  %v7130_v60 = vpop.permute.xlu1 %2087 }
 0x221   :  { %9034 = vst [vmem:[#allocation60_spill] sm:$0xff] %v7130_v60  ;;  %v4045_v60 = vld [vmem:[%s8975_s3 + $0x10] sm:$0xff] }
 0x222   :  { %v7132_v39 = vpop.permute.xlu0 %1645  ;;  %2107 = vrot.lane.b32.xlu1 %v1119_v31, %s6367_s20 }
 0x223   :  { %9035 = vst [vmem:[#allocation61_spill] sm:$0xff] %v7132_v39  ;;  %v1123_v39 = vld [vmem:[#allocation2 + $0x297] sm:$0xff] }
 0x224   :  { %2113 = vrot.lane.b32.xlu0 %v1122_v8, %s6367_s20  ;;  %v7136_v34 = vpop.permute.xlu1 %1583 }
 0x225   :  { %9036 = vst [vmem:[#allocation62_spill] sm:$0xff] %v7136_v34  ;;  %v938_v34 = vld [vmem:[#allocation2 + $0x357] sm:$0xff] }
 0x226   :  { %v7138_v53 = vpop.permute.xlu0 %1837  ;;  %2111 = vrot.lane.b32.xlu1 %v1121_v48, %s6367_s20 }
 0x227   :  { %9037 = vst [vmem:[#allocation63_spill] sm:$0xff] %v7138_v53  ;;  %v1125_v53 = vld [vmem:[#allocation2 + $0x30f] sm:$0xff] }
 0x228   :  { %2117 = vrot.lane.b32.xlu0 %v1124_v51, %s6367_s20  ;;  %v7142_v62 = vpop.permute.xlu1 %1647  ;;  %v937_v51 = vld [vmem:[#allocation2 + $0x337] sm:$0xff] }
 0x229   :  { %9038 = vst [vmem:[#allocation64_spill] sm:$0xff] %v7142_v62  ;;  %v940_v62 = vld [vmem:[#allocation2 + $0x37f] sm:$0xff] }
 0x22a   :  { %v7144_v18 = vpop.permute.xlu0 %1901  ;;  %2115 = vrot.lane.b32.xlu1 %v1123_v39, %s6367_s20  ;;  %v939_v39 = vld [vmem:[#allocation2 + $0x35f] sm:$0xff] }
 0x22b   :  { %9039 = vst [vmem:[#allocation65_spill] sm:$0xff] %v7144_v18 }
 0x22c   :  { %2121 = vrot.lane.b32.xlu0 %v936_v59, %s6367_s20  ;;  %v7148_v31 = vpop.permute.xlu1 %1839 }
 0x22d   :  { %9040 = vst [vmem:[#allocation66_spill] sm:$0xff] %v7148_v31 }
 0x22e   :  { %v7150_v8 = vpop.permute.xlu0 %2089  ;;  %2119 = vrot.lane.b32.xlu1 %v1125_v53, %s6367_s20  ;;  %v941_v53 = vld [vmem:[#allocation2 + $0x387] sm:$0xff] }
 0x22f   :  { %9041 = vst [vmem:[#allocation67_spill] sm:$0xff] %v7150_v8  ;;  %v942_v8 = vld [vmem:[#allocation2 + $0x3a7] sm:$0xff] }
 0x230   :  { %2125 = vrot.lane.b32.xlu0 %v938_v34, %s6367_s20  ;;  %v7154_v48 = vpop.permute.xlu1 %1903 }
 0x231   :  { %9042 = vst [vmem:[#allocation68_spill] sm:$0xff] %v7154_v48 }
 0x232   :  { %v7156_v18 = vpop.permute.xlu0 %1585  ;;  %2123 = vrot.lane.b32.xlu1 %v937_v51, %s6367_s20  ;;  %v943_v51 = vld [vmem:[#allocation2 + $0x3af] sm:$0xff] }
 0x233   :  { %9043 = vst [vmem:[#allocation69_spill] sm:$0xff] %v7156_v18  ;;  %v944_v18 = vld [vmem:[#allocation2 + $0x3cf] sm:$0xff] }
 0x234   :  { %2129 = vrot.lane.b32.xlu0 %v940_v62, %s6367_s20  ;;  %v7160_v59 = vpop.permute.xlu1 %2091 }
 0x235   :  { %9044 = vst [vmem:[#allocation70_spill] sm:$0xff] %v7160_v59 }
 0x236   :  { %v7162_v31 = vpop.permute.xlu0 %1649  ;;  %2127 = vrot.lane.b32.xlu1 %v939_v39, %s6367_s20  ;;  %v945_v39 = vld [vmem:[#allocation2 + $0x3d7] sm:$0xff] }
 0x237   :  { %9045 = vst [vmem:[#allocation71_spill] sm:$0xff] %v7162_v31  ;;  %v946_v31 = vld [vmem:[#allocation2 + $0x3f7] sm:$0xff] }
 0x238   :  { %2133 = vrot.lane.b32.xlu0 %v942_v8, %s6367_s20  ;;  %v7166_v34 = vpop.permute.xlu1 %1587 }
 0x239   :  { %9046 = vst [vmem:[#allocation72_spill] sm:$0xff] %v7166_v34 }
 0x23a   :  { %v7168_v48 = vpop.permute.xlu0 %1841  ;;  %2131 = vrot.lane.b32.xlu1 %v941_v53, %s6367_s20  ;;  %v947_v53 = vld [vmem:[#allocation2 + $0x3ff] sm:$0xff] }
 0x23b   :  { %9047 = vst [vmem:[#allocation73_spill] sm:$0xff] %v7168_v48  ;;  %v948_v48 = vld [vmem:[#allocation2 + $0x41f] sm:$0xff] }
 0x23c   :  { %2137 = vrot.lane.b32.xlu0 %v944_v18, %s6367_s20  ;;  %v7172_v62 = vpop.permute.xlu1 %1651 }
 0x23d   :  { %9048 = vst [vmem:[#allocation74_spill] sm:$0xff] %v7172_v62 }
 0x23e   :  { %v7174_v59 = vpop.permute.xlu0 %1905  ;;  %2135 = vrot.lane.b32.xlu1 %v943_v51, %s6367_s20  ;;  %v949_v51 = vld [vmem:[#allocation2 + $0x427] sm:$0xff] }
 0x23f   :  { %9049 = vst [vmem:[#allocation75_spill] sm:$0xff] %v7174_v59  ;;  %v950_v59 = vld [vmem:[#allocation2 + $0x447] sm:$0xff] }
 0x240   :  { %2141 = vrot.lane.b32.xlu0 %v946_v31, %s6367_s20  ;;  %v7178_v8 = vpop.permute.xlu1 %1843 }
 0x241   :  { %9050 = vst [vmem:[#allocation76_spill] sm:$0xff] %v7178_v8 }
 0x242   :  { %v7180_v34 = vpop.permute.xlu0 %1589  ;;  %2139 = vrot.lane.b32.xlu1 %v945_v39, %s6367_s20  ;;  %v951_v39 = vld [vmem:[#allocation2 + $0x44f] sm:$0xff] }
 0x243   :  { %9051 = vst [vmem:[#allocation77_spill] sm:$0xff] %v7180_v34  ;;  %v952_v34 = vld [vmem:[#allocation2 + $0x46f] sm:$0xff] }
 0x244   :  { %2145 = vrot.lane.b32.xlu0 %v948_v48, %s6367_s20  ;;  %v7184_v18 = vpop.permute.xlu1 %1907 }
 0x245   :  { %9052 = vst [vmem:[#allocation78_spill] sm:$0xff] %v7184_v18 }
 0x246   :  { %v7186_v62 = vpop.permute.xlu0 %1653  ;;  %2143 = vrot.lane.b32.xlu1 %v947_v53, %s6367_s20  ;;  %v953_v53 = vld [vmem:[#allocation2 + $0x477] sm:$0xff] }
 0x247   :  { %9053 = vst [vmem:[#allocation79_spill] sm:$0xff] %v7186_v62  ;;  %v954_v62 = vld [vmem:[#allocation2 + $0x497] sm:$0xff] }
 0x248   :  { %2149 = vrot.lane.b32.xlu0 %v950_v59, %s6367_s20  ;;  %v7190_v31 = vpop.permute.xlu1 %1591 }
 0x249   :  { %9054 = vst [vmem:[#allocation80_spill] sm:$0xff] %v7190_v31 }
 0x24a   :  { %v7192_v8 = vpop.permute.xlu0 %1845  ;;  %2147 = vrot.lane.b32.xlu1 %v949_v51, %s6367_s20  ;;  %v955_v51 = vld [vmem:[#allocation2 + $0x49f] sm:$0xff] }
 0x24b   :  { %9055 = vst [vmem:[#allocation81_spill] sm:$0xff] %v7192_v8  ;;  %v956_v8 = vld [vmem:[#allocation2 + $0x4bf] sm:$0xff] }
 0x24c   :  { %2153 = vrot.lane.b32.xlu0 %v952_v34, %s6367_s20  ;;  %v7196_v48 = vpop.permute.xlu1 %1655 }
 0x24d   :  { %9056 = vst [vmem:[#allocation82_spill] sm:$0xff] %v7196_v48 }
 0x24e   :  { %v7198_v18 = vpop.permute.xlu0 %1909  ;;  %2151 = vrot.lane.b32.xlu1 %v951_v39, %s6367_s20  ;;  %v957_v39 = vld [vmem:[#allocation2 + $0x4c7] sm:$0xff] }
 0x24f   :  { %9057 = vst [vmem:[#allocation83_spill] sm:$0xff] %v7198_v18  ;;  %v958_v18 = vld [vmem:[#allocation2 + $0x4e7] sm:$0xff] }
 0x250   :  { %2157 = vrot.lane.b32.xlu0 %v954_v62, %s6367_s20  ;;  %v7202_v59 = vpop.permute.xlu1 %1847 }
 0x251   :  { %9058 = vst [vmem:[#allocation84_spill] sm:$0xff] %v7202_v59 }
 0x252   :  { %v7204_v31 = vpop.permute.xlu0 %1593  ;;  %2155 = vrot.lane.b32.xlu1 %v953_v53, %s6367_s20  ;;  %v1150_v53 = vld [vmem:[#allocation2 + $0x50f] sm:$0xff] }
 0x253   :  { %9059 = vst [vmem:[#allocation85_spill] sm:$0xff] %v7204_v31 }
 0x254   :  { %2161 = vrot.lane.b32.xlu0 %v956_v8, %s6367_s20  ;;  %v7208_v34 = vpop.permute.xlu1 %1911 }
 0x255   :  { %9060 = vst [vmem:[#allocation86_spill] sm:$0xff] %v7208_v34  ;;  %v959_v34 = vld [vmem:[#allocation2 + $0x4ef] sm:$0xff] }
 0x256   :  { %v7210_v48 = vpop.permute.xlu0 %1657  ;;  %2159 = vrot.lane.b32.xlu1 %v955_v51, %s6367_s20  ;;  %v1152_v51 = vld [vmem:[#allocation2 + $0x537] sm:$0xff] }
 0x257   :  { %9061 = vst [vmem:[#allocation87_spill] sm:$0xff] %v7210_v48  ;;  %v1154_v48 = vld [vmem:[#allocation2 + $0x55f] sm:$0xff] }
 0x258   :  { %2165 = vrot.lane.b32.xlu0 %v958_v18, %s6367_s20  ;;  %v7214_v62 = vpop.permute.xlu1 %1595 }
 0x259   :  { %9062 = vst [vmem:[#allocation88_spill] sm:$0xff] %v7214_v62 }
 0x25a   :  { %v7216_v59 = vpop.permute.xlu0 %1849  ;;  %2163 = vrot.lane.b32.xlu1 %v957_v39, %s6367_s20 }
 0x25b   :  { %9063 = vst [vmem:[#allocation89_spill] sm:$0xff] %v7216_v59  ;;  %v1151_v59 = vld [vmem:[#allocation2 + $0x517] sm:$0xff] }
 0x25c   :  { %2169 = vrot.lane.b32.xlu0 %v1150_v53, %s6367_s20  ;;  %v7220_v8 = vpop.permute.xlu1 %1659 }
 0x25d   :  { %9064 = vst [vmem:[#allocation90_spill] sm:$0xff] %v7220_v8 }
 0x25e   :  { %v7222_v31 = vpop.permute.xlu0 %1913  ;;  %2167 = vrot.lane.b32.xlu1 %v959_v34, %s6367_s20  ;;  %v1156_v34 = vld [vmem:[#allocation2 + $0x38] sm:$0xff] }
 0x25f   :  { %9065 = vst [vmem:[#allocation91_spill] sm:$0xff] %v7222_v31  ;;  %v1153_v31 = vld [vmem:[#allocation2 + $0x53f] sm:$0xff] }
 0x260   :  { %2173 = vrot.lane.b32.xlu0 %v1152_v51, %s6367_s20  ;;  %v7226_v18 = vpop.permute.xlu1 %1851 }
 0x261   :  { %9066 = vst [vmem:[#allocation92_spill] sm:$0xff] %v7226_v18  ;;  %v1161_v18 = vld [vmem:[#allocation2 + $0x90] sm:$0xff] }
 0x262   :  { %v7228_v62 = vpop.permute.xlu0 %1597  ;;  %2171 = vrot.lane.b32.xlu1 %v1151_v59, %s6367_s20  ;;  %v1158_v59 = vld [vmem:[#allocation2 + $0x60] sm:$0xff] }
 0x263   :  { %9067 = vst [vmem:[#allocation93_spill] sm:$0xff] %v7228_v62  ;;  %v1155_v62 = vld [vmem:[#allocation2 + $0x567] sm:$0xff] }
 0x264   :  { %2177 = vrot.lane.b32.xlu0 %v1154_v48, %s6367_s20  ;;  %v7232_v39 = vpop.permute.xlu1 %1915 }
 0x265   :  { %9068 = vst [vmem:[#allocation94_spill] sm:$0xff] %v7232_v39  ;;  %v1157_v39 = vld [vmem:[#allocation2 + $0x40] sm:$0xff] }
 0x266   :  { %v7234_v53 = vpop.permute.xlu0 %1661  ;;  %2175 = vrot.lane.b32.xlu1 %v1153_v31, %s6367_s20  ;;  %v1160_v31 = vld [vmem:[#allocation2 + $0x88] sm:$0xff] }
 0x267   :  { %9069 = vst [vmem:[#allocation95_spill] sm:$0xff] %v7234_v53 }
 0x268   :  { %2309 = vrot.lane.b32.xlu0 %v1156_v34, %s6368_s2  ;;  %v7238_v51 = vpop.permute.xlu1 %1599 }
 0x269   :  { %9070 = vst [vmem:[#allocation96_spill] sm:$0xff] %v7238_v51 }
 0x26a   :  { %v7240_v8 = vpop.permute.xlu0 %1853  ;;  %2179 = vrot.lane.b32.xlu1 %v1155_v62, %s6367_s20  ;;  %v4043_v62 = vld [vmem:[%s8975_s3] sm:$0xff] }
 0x26b   :  { %9071 = vst [vmem:[#allocation97_spill] sm:$0xff] %v7240_v8  ;;  %v1159_v8 = vld [vmem:[#allocation2 + $0x68] sm:$0xff] }
 0x26c   :  { %2313 = vrot.lane.b32.xlu0 %v1158_v59, %s6368_s2  ;;  %v7244_v48 = vpop.permute.xlu1 %1663 }
 0x26d   :  { %9072 = vst [vmem:[#allocation98_spill] sm:$0xff] %v7244_v48  ;;  %v4044_v48 = vld [vmem:[%s8975_s3 + $0x8] sm:$0xff]  ;;  %s6371_s3 = smov 28  }
 0x26e   :  { %v7246_v53 = vpop.permute.xlu0 %1917  ;;  %2311 = vrot.lane.b32.xlu1 %v1157_v39, %s6368_s2  ;;  %v6191_v39 = vpack.c.bf16 %v4044_v48, %v4043_v62  ;;  %v1220_v48 = vld [vmem:[#allocation2 + $0x39] sm:$0xff]  ;;  %v6195_v62 = vpack.c.bf16 %v4046_v32, %v4045_v60 }
 0x26f   :  { %9073 = vst [vmem:[#allocation99_spill] sm:$0xff] %v7246_v53  ;;  %v7261_v53 = vld [vmem:[#allocation2 + $0xb0] sm:$0xff]  ;;  %v1285_v32 = vld [vmem:[#allocation2 + $0x5f] sm:$0xff] }
 0x270   :  { %2317 = vrot.lane.b32.xlu0 %v1160_v31, %s6368_s2  ;;  %v7250_v34 = vpop.permute.xlu1 %1855  ;;  %6192 = vmatprep.subr.bf16.mxu1 %v6191_v39 }
 0x271   :  { %9074 = vst [vmem:[#allocation100_spill] sm:$0xff] %v7250_v34  ;;  %6194 = vmatpush3.bf16.msra.mxu1 %v6191_v39  ;;  %v7281_v39 = vld [vmem:[#allocation2 + $0xb8] sm:$0xff] }
 0x272   :  { %v7252_v51 = vpop.permute.xlu0 %1601  ;;  %2315 = vrot.lane.b32.xlu1 %v1159_v8, %s6368_s2  ;;  %6196 = vmatprep.subr.bf16.mxu1 %v6195_v62 }
 0x273   :  { %9075 = vst [vmem:[#allocation101_spill] sm:$0xff] %v7252_v51 }
 0x274   :  { %2321 = vrot.lane.b32.xlu0 %v7261_v53, %s6368_s2  ;;  %v7265_v34 = vpop.permute.xlu1 %1919 }
 0x275   :  { %9076 = vst [vmem:[#allocation102_spill] sm:$0xff] %v7265_v34  ;;  %6198 = vmatpush3.bf16.msra.mxu1 %v6195_v62 }
 0x276   :  { %v7267_v51 = vpop.permute.xlu0 %1665  ;;  %2319 = vrot.lane.b32.xlu1 %v1161_v18, %s6368_s2  ;;  %5991 = vmatprep.subr.msk.mxu1 %vm4248_vm4, %v4047_v41 }
 0x277   :  { %9077 = vst [vmem:[#allocation103_spill] sm:$0xff] %v7267_v51 }
 0x278   :  { %2565 = vrot.lane.b32.xlu0 %v1220_v48, %s6369_s8  ;;  %v7277_v34 = vpop.permute.xlu1 %1603 }
 0x279   :  { %9078 = vst [vmem:[#allocation104_spill] sm:$0xff] %v7277_v34  ;;  %5992 = vmatpush3.msk.msra.mxu1 %vm4248_vm4, %v4047_v41  ;;  %v1414_v41 = vld [vmem:[#allocation2 + $0x69] sm:$0xff] }
 0x27a   :  { %v7279_v51 = vpop.permute.xlu0 %1857  ;;  %2323 = vrot.lane.b32.xlu1 %v7281_v39, %s6368_s2 }
 0x27b   :  { %9079 = vst [vmem:[#allocation105_spill] sm:$0xff] %v7279_v51  ;;  %v1221_v51 = vld [vmem:[#allocation2 + $0x41] sm:$0xff] }
 0x27c   :  { %2821 = vrot.lane.b32.xlu0 %v1285_v32, %s6370_s11  ;;  %v7290_v60 = vpop.permute.xlu1 %1667  ;;  %v1413_v32 = vld [vmem:[#allocation2 + $0x61] sm:$0xff] }
 0x27d   :  { %9080 = vst [vmem:[#allocation106_spill] sm:$0xff] %v7290_v60 }
 0x27e   :  { %v7292_v48 = vpop.permute.xlu0 %1921  ;;  %2567 = vrot.lane.b32.xlu1 %v1221_v51, %s6369_s8 }
 0x27f   :  { %9081 = vst [vmem:[#allocation107_spill] sm:$0xff] %v7292_v48 }
 0x280   :  { %3077 = vrot.lane.b32.xlu0 %v1158_v59, %s6371_s3  ;;  %v7297_v62 = vpop.permute.xlu1 %1859 }
 0x281   :  { %9082 = vst [vmem:[#allocation108_spill] sm:$0xff] %v7297_v62 }
 0x282   :  { %v7299_v34 = vpop.permute.xlu0 %2093  ;;  %2823 = vrot.lane.b32.xlu1 %v1286_v40, %s6370_s11  ;;  %v1287_v40 = vld [vmem:[#allocation2 + $0x87] sm:$0xff] }
 0x283   :  { %9083 = vst [vmem:[#allocation109_spill] sm:$0xff] %v7299_v34 }
 0x284   :  { %3333 = vrot.lane.b32.xlu0 %v1413_v32, %s6372_s12  ;;  %v7303_v60 = vpop.permute.xlu1 %1923 }
 0x285   :  { %9084 = vst [vmem:[#allocation110_spill] sm:$0xff] %v7303_v60 }
 0x286   :  { %v7305_v48 = vpop.permute.xlu0 %2097  ;;  %3079 = vrot.lane.b32.xlu1 %v1159_v8, %s6371_s3 }
 0x287   :  { %9085 = vst [vmem:[#allocation111_spill] sm:$0xff] %v7305_v48  ;;  %v1288_v48 = vld [vmem:[#allocation2 + $0x8f] sm:$0xff] }
 0x288   :  { %3335 = vrot.lane.b32.xlu0 %v1414_v41, %s6372_s12  ;;  %v7309_v51 = vpop.permute.xlu1 %2095 }
 0x289   :  { %9086 = vst [vmem:[#allocation112_spill] sm:$0xff] %v7309_v51 }
 0x28a   :  { %v7311_v59 = vpop.permute.xlu0 %2101  ;;  %2569 = vrot.lane.b32.xlu1 %v1413_v32, %s6369_s8 }
 0x28b   :  { %9087 = vst [vmem:[#allocation113_spill] sm:$0xff] %v7311_v59  ;;  %v1415_v59 = vld [vmem:[#allocation2 + $0x89] sm:$0xff] }
 0x28c   :  { %2825 = vrot.lane.b32.xlu0 %v1287_v40, %s6370_s11  ;;  %v7315_v62 = vpop.permute.xlu1 %2099 }
 0x28d   :  { %9088 = vst [vmem:[#allocation114_spill] sm:$0xff] %v7315_v62  ;;  %v1361_v62 = vld [vmem:[#allocation2 + $0x150] sm:$0xff] }
 0x28e   :  { %v7317_v34 = vpop.permute.xlu0 %2105  ;;  %2571 = vrot.lane.b32.xlu1 %v1414_v41, %s6369_s8 }
 0x28f   :  { %9089 = vst [vmem:[#allocation115_spill] sm:$0xff] %v7317_v34  ;;  %v1416_v34 = vld [vmem:[#allocation2 + $0x91] sm:$0xff] }
 0x290   :  { %3081 = vrot.lane.b32.xlu0 %v1160_v31, %s6371_s3  ;;  %v7321_v8 = vpop.permute.xlu1 %2103 }
 0x291   :  { %9090 = vst [vmem:[#allocation116_spill] sm:$0xff] %v7321_v8 }
 0x292   :  { %v7323_v60 = vpop.permute.xlu0 %2109  ;;  %2827 = vrot.lane.b32.xlu1 %v1288_v48, %s6370_s11 }
 0x293   :  { %9091 = vst [vmem:[#allocation117_spill] sm:$0xff] %v7323_v60  ;;  %v1289_v60 = vld [vmem:[#allocation2 + $0xaf] sm:$0xff] }
 0x294   :  { %3337 = vrot.lane.b32.xlu0 %v1415_v59, %s6372_s12  ;;  %v7327_v32 = vpop.permute.xlu1 %2107 }
 0x295   :  { %9092 = vst [vmem:[#allocation118_spill] sm:$0xff] %v7327_v32  ;;  %v900_v32 = vld [vmem:[#allocation2 + $0xf] sm:$0xff] }
 0x296   :  { %v7329_v40 = vpop.permute.xlu0 %2113  ;;  %3083 = vrot.lane.b32.xlu1 %v1161_v18, %s6371_s3  ;;  %v3525_v21 = vsel %vm755_vm0, %v900_v32, %v6797_v13 }
 0x297   :  { %9093 = vst [vmem:[#allocation119_spill] sm:$0xff] %v7329_v40 }
 0x298   :  { %3339 = vrot.lane.b32.xlu0 %v1416_v34, %s6372_s12  ;;  %v7333_v31 = vpop.permute.xlu1 %2111 }
 0x299   :  { %9094 = vst [vmem:[#allocation120_spill] sm:$0xff] %v7333_v31  ;;  %v1290_v31 = vld [vmem:[#allocation2 + $0xb7] sm:$0xff] }
 0x29a   :  { %v7335_v41 = vpop.permute.xlu0 %2117  ;;  %2573 = vrot.lane.b32.xlu1 %v1415_v59, %s6369_s8  ;;  %v1417_v59 = vld [vmem:[#allocation2 + $0xb1] sm:$0xff] }
 0x29b   :  { %9095 = vst [vmem:[#allocation121_spill] sm:$0xff] %v7335_v41 }
 0x29c   :  { %2829 = vrot.lane.b32.xlu0 %v1289_v60, %s6370_s11  ;;  %v7339_v48 = vpop.permute.xlu1 %2115 }
 0x29d   :  { %9096 = vst [vmem:[#allocation122_spill] sm:$0xff] %v7339_v48 }
 0x29e   :  { %v7341_v8 = vpop.permute.xlu0 %2121  ;;  %2575 = vrot.lane.b32.xlu1 %v1416_v34, %s6369_s8  ;;  %v1418_v34 = vld [vmem:[#allocation2 + $0xb9] sm:$0xff] }
 0x29f   :  { %9097 = vst [vmem:[#allocation123_spill] sm:$0xff] %v7341_v8 }
 0x2a0   :  { %3085 = vrot.lane.b32.xlu0 %v7261_v53, %s6371_s3  ;;  %v7346_v18 = vpop.permute.xlu1 %2119 }
 0x2a1   :  { %9098 = vst [vmem:[#allocation124_spill] sm:$0xff] %v7346_v18 }
 0x2a2   :  { %v7348_v40 = vpop.permute.xlu0 %2125  ;;  %2831 = vrot.lane.b32.xlu1 %v1290_v31, %s6370_s11  ;;  %v1291_v31 = vld [vmem:[#allocation2 + $0xd7] sm:$0xff] }
 0x2a3   :  { %9099 = vst [vmem:[#allocation125_spill] sm:$0xff] %v7348_v40 }
 0x2a4   :  { %3341 = vrot.lane.b32.xlu0 %v1417_v59, %s6372_s12  ;;  %v7352_v60 = vpop.permute.xlu1 %2123 }
 0x2a5   :  { %9100 = vst [vmem:[#allocation126_spill] sm:$0xff] %v7352_v60 }
 0x2a6   :  { %v7354_v41 = vpop.permute.xlu0 %2129  ;;  %3087 = vrot.lane.b32.xlu1 %v7281_v39, %s6371_s3 }
 0x2a7   :  { %9101 = vst [vmem:[#allocation127_spill] sm:$0xff] %v7354_v41  ;;  %v1355_v41 = vld [vmem:[#allocation2 + $0xd8] sm:$0xff] }
 0x2a8   :  { %3343 = vrot.lane.b32.xlu0 %v1418_v34, %s6372_s12  ;;  %v7359_v53 = vpop.permute.xlu1 %2127 }
 0x2a9   :  { %9102 = vst [vmem:[#allocation128_spill] sm:$0xff] %v7359_v53  ;;  %v1292_v53 = vld [vmem:[#allocation2 + $0xdf] sm:$0xff] }
 0x2aa   :  { %v7361_v8 = vpop.permute.xlu0 %2133  ;;  %2577 = vrot.lane.b32.xlu1 %v1417_v59, %s6369_s8  ;;  %v1356_v59 = vld [vmem:[#allocation2 + $0xe0] sm:$0xff] }
 0x2ab   :  { %9103 = vst [vmem:[#allocation129_spill] sm:$0xff] %v7361_v8 }
 0x2ac   :  { %2833 = vrot.lane.b32.xlu0 %v1291_v31, %s6370_s11  ;;  %v7365_v40 = vpop.permute.xlu1 %2131 }
 0x2ad   :  { %9104 = vst [vmem:[#allocation130_spill] sm:$0xff] %v7365_v40 }
 0x2ae   :  { %v7367_v60 = vpop.permute.xlu0 %2137  ;;  %2579 = vrot.lane.b32.xlu1 %v1418_v34, %s6369_s8 }
 0x2af   :  { %9105 = vst [vmem:[#allocation131_spill] sm:$0xff] %v7367_v60 }
 0x2b0   :  { %3089 = vrot.lane.b32.xlu0 %v1355_v41, %s6371_s3  ;;  %v7371_v39 = vpop.permute.xlu1 %2135 }
 0x2b1   :  { %9106 = vst [vmem:[#allocation132_spill] sm:$0xff] %v7371_v39  ;;  %v1419_v39 = vld [vmem:[#allocation2 + $0xd9] sm:$0xff] }
 0x2b2   :  { %v7373_v18 = vpop.permute.xlu0 %2141  ;;  %2835 = vrot.lane.b32.xlu1 %v1292_v53, %s6370_s11 }
 0x2b3   :  { %9107 = vst [vmem:[#allocation133_spill] sm:$0xff] %v7373_v18  ;;  %v1420_v18 = vld [vmem:[#allocation2 + $0xe1] sm:$0xff] }
 0x2b4   :  { %3091 = vrot.lane.b32.xlu0 %v1356_v59, %s6371_s3  ;;  %v7377_v31 = vpop.permute.xlu1 %2139 }
 0x2b5   :  { %9108 = vst [vmem:[#allocation134_spill] sm:$0xff] %v7377_v31 }
 0x2b6   :  { %v7379_v8 = vpop.permute.xlu0 %2145  ;;  %2325 = vrot.lane.b32.xlu1 %v1355_v41, %s6368_s2 }
 0x2b7   :  { %9109 = vst [vmem:[#allocation135_spill] sm:$0xff] %v7379_v8  ;;  %v1293_v8 = vld [vmem:[#allocation2 + $0xff] sm:$0xff] }
 0x2b8   :  { %2327 = vrot.lane.b32.xlu0 %v1356_v59, %s6368_s2  ;;  %v7383_v34 = vpop.permute.xlu1 %2143 }
 0x2b9   :  { %9110 = vst [vmem:[#allocation136_spill] sm:$0xff] %v7383_v34 }
 0x2ba   :  { %v7385_v60 = vpop.permute.xlu0 %2149  ;;  %3345 = vrot.lane.b32.xlu1 %v1419_v39, %s6372_s12 }
 0x2bb   :  { %9111 = vst [vmem:[#allocation137_spill] sm:$0xff] %v7385_v60  ;;  %v1357_v60 = vld [vmem:[#allocation2 + $0x100] sm:$0xff] }
 0x2bc   :  { %3347 = vrot.lane.b32.xlu0 %v1420_v18, %s6372_s12  ;;  %v7389_v53 = vpop.permute.xlu1 %2147 }
 0x2bd   :  { %9112 = vst [vmem:[#allocation138_spill] sm:$0xff] %v7389_v53  ;;  %v1294_v53 = vld [vmem:[#allocation2 + $0x107] sm:$0xff] }
 0x2be   :  { %v7391_v40 = vpop.permute.xlu0 %2153  ;;  %2581 = vrot.lane.b32.xlu1 %v1419_v39, %s6369_s8  ;;  %v1358_v39 = vld [vmem:[#allocation2 + $0x108] sm:$0xff] }
 0x2bf   :  { %9113 = vst [vmem:[#allocation139_spill] sm:$0xff] %v7391_v40 }
 0x2c0   :  { %2837 = vrot.lane.b32.xlu0 %v1293_v8, %s6370_s11  ;;  %v7395_v41 = vpop.permute.xlu1 %2151 }
 0x2c1   :  { %9114 = vst [vmem:[#allocation140_spill] sm:$0xff] %v7395_v41 }
 0x2c2   :  { %v7397_v59 = vpop.permute.xlu0 %2157  ;;  %2583 = vrot.lane.b32.xlu1 %v1420_v18, %s6369_s8 }
 0x2c3   :  { %9115 = vst [vmem:[#allocation141_spill] sm:$0xff] %v7397_v59 }
 0x2c4   :  { %3093 = vrot.lane.b32.xlu0 %v1357_v60, %s6371_s3  ;;  %v7401_v34 = vpop.permute.xlu1 %2155 }
 0x2c5   :  { %9116 = vst [vmem:[#allocation142_spill] sm:$0xff] %v7401_v34  ;;  %v1421_v34 = vld [vmem:[#allocation2 + $0x101] sm:$0xff] }
 0x2c6   :  { %v7403_v31 = vpop.permute.xlu0 %2161  ;;  %2839 = vrot.lane.b32.xlu1 %v1294_v53, %s6370_s11 }
 0x2c7   :  { %9117 = vst [vmem:[#allocation143_spill] sm:$0xff] %v7403_v31  ;;  %v1422_v31 = vld [vmem:[#allocation2 + $0x109] sm:$0xff] }
 0x2c8   :  { %3095 = vrot.lane.b32.xlu0 %v1358_v39, %s6371_s3  ;;  %v7407_v8 = vpop.permute.xlu1 %2159 }
 0x2c9   :  { %9118 = vst [vmem:[#allocation144_spill] sm:$0xff] %v7407_v8 }
 0x2ca   :  { %v7409_v40 = vpop.permute.xlu0 %2165  ;;  %2329 = vrot.lane.b32.xlu1 %v1357_v60, %s6368_s2 }
 0x2cb   :  { %9119 = vst [vmem:[#allocation145_spill] sm:$0xff] %v7409_v40  ;;  %v1295_v40 = vld [vmem:[#allocation2 + $0x127] sm:$0xff] }
 0x2cc   :  { %2331 = vrot.lane.b32.xlu0 %v1358_v39, %s6368_s2  ;;  %v7413_v18 = vpop.permute.xlu1 %2163 }
 0x2cd   :  { %9120 = vst [vmem:[#allocation146_spill] sm:$0xff] %v7413_v18 }
 0x2ce   :  { %v7415_v59 = vpop.permute.xlu0 %2169  ;;  %3349 = vrot.lane.b32.xlu1 %v1421_v34, %s6372_s12 }
 0x2cf   :  { %9121 = vst [vmem:[#allocation147_spill] sm:$0xff] %v7415_v59  ;;  %v1359_v59 = vld [vmem:[#allocation2 + $0x128] sm:$0xff] }
 0x2d0   :  { %3351 = vrot.lane.b32.xlu0 %v1422_v31, %s6372_s12  ;;  %v7419_v53 = vpop.permute.xlu1 %2167 }
 0x2d1   :  { %9122 = vst [vmem:[#allocation148_spill] sm:$0xff] %v7419_v53  ;;  %v1296_v53 = vld [vmem:[#allocation2 + $0x12f] sm:$0xff] }
 0x2d2   :  { %v7421_v41 = vpop.permute.xlu0 %2173  ;;  %2585 = vrot.lane.b32.xlu1 %v1421_v34, %s6369_s8 }
 0x2d3   :  { %9123 = vst [vmem:[#allocation149_spill] sm:$0xff] %v7421_v41  ;;  %v1360_v41 = vld [vmem:[#allocation2 + $0x130] sm:$0xff] }
 0x2d4   :  { %2841 = vrot.lane.b32.xlu0 %v1295_v40, %s6370_s11  ;;  %v7425_v60 = vpop.permute.xlu1 %2171 }
 0x2d5   :  { %9124 = vst [vmem:[#allocation150_spill] sm:$0xff] %v7425_v60  ;;  %v1423_v60 = vld [vmem:[#allocation2 + $0x129] sm:$0xff] }
 0x2d6   :  { %v7427_v39 = vpop.permute.xlu0 %2177  ;;  %2587 = vrot.lane.b32.xlu1 %v1422_v31, %s6369_s8 }
 0x2d7   :  { %9125 = vst [vmem:[#allocation151_spill] sm:$0xff] %v7427_v39 }
 0x2d8   :  { %3097 = vrot.lane.b32.xlu0 %v1359_v59, %s6371_s3  ;;  %v7431_v18 = vpop.permute.xlu1 %2175 }
 0x2d9   :  { %9126 = vst [vmem:[#allocation152_spill] sm:$0xff] %v7431_v18  ;;  %v1424_v18 = vld [vmem:[#allocation2 + $0x131] sm:$0xff] }
 0x2da   :  { %v2310_v8 = vpop.permute.xlu0 %2309  ;;  %2843 = vrot.lane.b32.xlu1 %v1296_v53, %s6370_s11 }
 0x2dc   :  { %3099 = vrot.lane.b32.xlu0 %v1360_v41, %s6371_s3  ;;  %v7435_v34 = vpop.permute.xlu1 %2179 }
 0x2dd   :  { %9127 = vst [vmem:[#allocation153_spill] sm:$0xff] %v7435_v34  ;;  %v1297_v34 = vld [vmem:[#allocation2 + $0x14f] sm:$0xff] }
 0x2de   :  { %v7437_v40 = vpop.permute.xlu0 %2313  ;;  %2333 = vrot.lane.b32.xlu1 %v1359_v59, %s6368_s2 }
 0x2e0   :  { %2335 = vrot.lane.b32.xlu0 %v1360_v41, %s6368_s2  ;;  %v2312_v31 = vpop.permute.xlu1 %2311 }
 0x2e2   :  { %v7441_v39 = vpop.permute.xlu0 %2317  ;;  %3353 = vrot.lane.b32.xlu1 %v1423_v60, %s6372_s12 }
 0x2e4   :  { %3355 = vrot.lane.b32.xlu0 %v1424_v18, %s6372_s12  ;;  %v7445_v53 = vpop.permute.xlu1 %2315 }
 0x2e6   :  { %v7447_v48 = vpop.permute.xlu0 %2321  ;;  %2589 = vrot.lane.b32.xlu1 %v1423_v60, %s6369_s8  ;;  %v1298_v60 = vld [vmem:[#allocation2 + $0x157] sm:$0xff] }
 0x2e8   :  { %2845 = vrot.lane.b32.xlu0 %v1297_v34, %s6370_s11  ;;  %v7451_v59 = vpop.permute.xlu1 %2319  ;;  %v1362_v34 = vld [vmem:[#allocation2 + $0x158] sm:$0xff] }
 0x2ea   :  { %v2566_v41 = vpop.permute.xlu0 %2565  ;;  %2591 = vrot.lane.b32.xlu1 %v1424_v18, %s6369_s8  ;;  %v3590_v18 = vsel %vm3589_vm5, %v3525_v21, %v6825_v42  ;;  %v3591_v42 = vsel %vm3589_vm5, %v3526_v19, %v6821_v38 }
 0x2eb   :  { %v3655_v13 = vsel %vm3654_vm6, %v3590_v18, %v6869_v20  ;;  %v3656_v20 = vsel %vm3654_vm6, %v3591_v42, %v6881_v29  ;;  %v1425_v18 = vld [vmem:[#allocation2 + $0x151] sm:$0xff] }
 0x2ec   :  { %3101 = vrot.lane.b32.xlu0 %v1361_v62, %s6371_s3  ;;  %v7455_v51 = vpop.permute.xlu1 %2323  ;;  %v3719_v15 = vsel %vm113_vm2, %v3655_v13, %v2310_v8 }
 0x2ee   :  { %v2822_v44 = vpop.permute.xlu0 %2821  ;;  %2847 = vrot.lane.b32.xlu1 %v1298_v60, %s6370_s11  ;;  %v3784_v60 = vsel %vm3783_vm7, %v3719_v15, %v2566_v41  ;;  %v1426_v41 = vld [vmem:[#allocation2 + $0x159] sm:$0xff] }
 0x2ef   :  { %v3849_v26 = vsel %vm3848_vm8, %v3784_v60, %v2822_v44 }
 0x2f0   :  { %3103 = vrot.lane.b32.xlu0 %v1362_v34, %s6371_s3  ;;  %v2568_v49 = vpop.permute.xlu1 %2567 }
 0x2f2   :  { %v3078_v32 = vpop.permute.xlu0 %3077  ;;  %2337 = vrot.lane.b32.xlu1 %v1361_v62, %s6368_s2  ;;  %v3720_v62 = vsel %vm113_vm2, %v3656_v20, %v2312_v31  ;;  %v1299_v31 = vld [vmem:[#allocation2 + $0x177] sm:$0xff] }
 0x2f3   :  { %v3914_v12 = vsel %vm3913_vm9, %v3849_v26, %v3078_v32  ;;  %v3785_v38 = vsel %vm3783_vm7, %v3720_v62, %v2568_v49  ;;  %v6213_v32 = vld [vmem:[#allocation2 + $0x37] sm:$0xff]  ;;  %v1300_v62 = vld [vmem:[#allocation2 + $0x17f] sm:$0xff] }
 0x2f4   :  { %2339 = vrot.lane.b32.xlu0 %v1362_v34, %s6368_s2  ;;  %v2824_v21 = vpop.permute.xlu1 %2823  ;;  %v3527_v60 = vsel %vm755_vm0, %v6213_v32, %v6875_v24 }
 0x2f5   :  { %v3850_v19 = vsel %vm3848_vm8, %v3785_v38, %v2824_v21  ;;  %v3592_v26 = vsel %vm3589_vm5, %v3527_v60, %v6851_v1  ;;  %v1363_v21 = vld [vmem:[#allocation2 + $0x178] sm:$0xff] }
 0x2f6   :  { %v3334_v8 = vpop.permute.xlu0 %3333  ;;  %3357 = vrot.lane.b32.xlu1 %v1425_v18, %s6372_s12  ;;  %v3657_v20 = vsel %vm3654_vm6, %v3592_v26, %v6901_v46  ;;  %v6214_v1 = vld [vmem:[#allocation2 + $0x3f] sm:$0xff] }
 0x2f7   :  { %v3979_v15 = vsel %vm3978_vm10, %v3914_v12, %v3334_v8  ;;  %v3721_v24 = vsel %vm113_vm2, %v3657_v20, %v7437_v40  ;;  %v1427_v60 = vld [vmem:[#allocation2 + $0x179] sm:$0xff] }
 0x2f8   :  { %3359 = vrot.lane.b32.xlu0 %v1426_v41, %s6372_s12  ;;  %5993 = vmatprep.mubr.msk.f32.mxu1 %vm4055_vm11, %v3979_v15  ;;  %v3080_v29 = vpop.permute.xlu1 %3079  ;;  %v1364_v15 = vld [vmem:[#allocation2 + $0x180] sm:$0xff] }
 0x2f9   :  { %v3915_v44 = vsel %vm3913_vm9, %v3850_v19, %v3080_v29  ;;  %v6215_v26 = vld [vmem:[#allocation2 + $0x5f] sm:$0xff] }
 0x2fa   :  { %v3336_v34 = vpop.permute.xlu0 %3335  ;;  %2593 = vrot.lane.b32.xlu1 %v1425_v18, %s6369_s8 }
 0x2fb   :  { %v3980_v13 = vsel %vm3978_vm10, %v3915_v44, %v3336_v34 }
 0x2fc   :  { %2849 = vrot.lane.b32.xlu0 %v1299_v31, %s6370_s11  ;;  %5994 = vmatmul.mubr.msk.f32.vlgmr.msra.gmra.mrb[32].mxu1 %vm4055_vm11, %v3980_v13  ;;  %v2570_v49 = vpop.permute.xlu1 %2569 }
 0x2fd   :  { %v3786_v8 = vsel %vm3783_vm7, %v3721_v24, %v2570_v49 }
 0x2fe   :  { %v2826_v42 = vpop.permute.xlu0 %2825  ;;  %2595 = vrot.lane.b32.xlu1 %v1426_v41, %s6369_s8  ;;  %v3528_v41 = vsel %vm755_vm0, %v6214_v1, %v6843_v58 }
 0x2ff   :  { %v3593_v46 = vsel %vm3589_vm5, %v3528_v41, %v6857_v6  ;;  %v3851_v38 = vsel %vm3848_vm8, %v3786_v8, %v2826_v42  ;;  %v6216_v41 = vld [vmem:[#allocation2 + $0x67] sm:$0xff] }
 0x300   :  { %3105 = vrot.lane.b32.xlu0 %v1363_v21, %s6371_s3  ;;  %v2572_v12 = vpop.permute.xlu1 %2571  ;;  %v3658_v19 = vsel %vm3654_vm6, %v3593_v46, %v6911_v55 }
 0x301   :  { %v3722_v34 = vsel %vm113_vm2, %v3658_v19, %v7445_v53  ;;  %v1428_v53 = vld [vmem:[#allocation2 + $0x181] sm:$0xff] }
 0x302   :  { %v3082_v18 = vpop.permute.xlu0 %3081  ;;  %2851 = vrot.lane.b32.xlu1 %v1300_v62, %s6370_s11  ;;  %v3787_v58 = vsel %vm3783_vm7, %v3722_v34, %v2572_v12  ;;  %v1301_v12 = vld [vmem:[#allocation2 + $0x19f] sm:$0xff]  ;;  %v1366_v34 = vld [vmem:[#allocation2 + $0x1a8] sm:$0xff] }
 0x303   :  { %v3916_v29 = vsel %vm3913_vm9, %v3851_v38, %v3082_v18 }
 0x304   :  { %3107 = vrot.lane.b32.xlu0 %v1364_v15, %s6371_s3  ;;  %v2828_v40 = vpop.permute.xlu1 %2827 }
 0x305   :  { %v3852_v6 = vsel %vm3848_vm8, %v3787_v58, %v2828_v40 }
 0x306   :  { %v3338_v44 = vpop.permute.xlu0 %3337  ;;  %2341 = vrot.lane.b32.xlu1 %v1363_v21, %s6368_s2  ;;  %v3529_v21 = vsel %vm755_vm0, %v6215_v26, %v6877_v25  ;;  %v1365_v25 = vld [vmem:[#allocation2 + $0x1a0] sm:$0xff] }
 0x307   :  { %v3981_v13 = vsel %vm3978_vm10, %v3916_v29, %v3338_v44  ;;  %v3594_v24 = vsel %vm3589_vm5, %v3529_v21, %v6889_v37  ;;  %v3530_v37 = vsel %vm755_vm0, %v6216_v41, %v6887_v35  ;;  %v1302_v29 = vld [vmem:[#allocation2 + $0x1a7] sm:$0xff] }
 0x308   :  { %2343 = vrot.lane.b32.xlu0 %v1364_v15, %s6368_s2  ;;  %5996 = vmatprep.mubr.msk.f32.mxu1 %vm4055_vm11, %v3981_v13  ;;  %v3084_v31 = vpop.permute.xlu1 %3083  ;;  %v3659_v8 = vsel %vm3654_vm6, %v3594_v24, %v6935_v17  ;;  %v3595_v17 = vsel %vm3589_vm5, %v3530_v37, %v6899_v45  ;;  %v6217_v26 = vld [vmem:[#allocation2 + $0x87] sm:$0xff]  ;;  %v6218_v24 = vld [vmem:[#allocation2 + $0x8f] sm:$0xff] }
 0x309   :  { %v3917_v55 = vsel %vm3913_vm9, %v3852_v6, %v3084_v31  ;;  %v3723_v18 = vsel %vm113_vm2, %v3659_v8, %v7441_v39  ;;  %v3660_v39 = vsel %vm3654_vm6, %v3595_v17, %v6945_v30  ;;  %v3531_v21 = vsel %vm755_vm0, %v6217_v26, %v6907_v50  ;;  %v1304_v37 = vld [vmem:[#allocation2 + $0x1cf] sm:$0xff] }
 0x30a   :  { %v3340_v32 = vpop.permute.xlu0 %3339  ;;  %3361 = vrot.lane.b32.xlu1 %v1427_v60, %s6372_s12  ;;  %v3724_v44 = vsel %vm113_vm2, %v3660_v39, %v7451_v59  ;;  %v3596_v8 = vsel %vm3589_vm5, %v3531_v21, %v6921_v7 }
 0x30b   :  { %v3982_v49 = vsel %vm3978_vm10, %v3917_v55, %v3340_v32  ;;  %v1429_v32 = vld [vmem:[#allocation2 + $0x1a1] sm:$0xff] }
 0x30c   :  { %3363 = vrot.lane.b32.xlu0 %v1428_v53, %s6372_s12  ;;  %5997 = vmatmul.mubr.msk.f32.gmra.mrb[34].mxu1 %vm4055_vm11, %v3982_v49  ;;  %v2574_v42 = vpop.permute.xlu1 %2573 }
 0x30d   :  { %v3788_v15 = vsel %vm3783_vm7, %v3723_v18, %v2574_v42  ;;  %v1303_v42 = vld [vmem:[#allocation2 + $0x1c7] sm:$0xff] }
 0x30e   :  { %v2830_v20 = vpop.permute.xlu0 %2829  ;;  %2597 = vrot.lane.b32.xlu1 %v1427_v60, %s6369_s8  ;;  %v1430_v60 = vld [vmem:[#allocation2 + $0x1a9] sm:$0xff] }
 0x30f   :  { %v3853_v46 = vsel %vm3848_vm8, %v3788_v15, %v2830_v20  ;;  %v3661_v15 = vsel %vm3654_vm6, %v3596_v8, %v6965_v63 }
 0x310   :  { %2853 = vrot.lane.b32.xlu0 %v1301_v12, %s6370_s11  ;;  %v2576_v62 = vpop.permute.xlu1 %2575  ;;  %v3532_v12 = vsel %vm755_vm0, %v6218_v24, %v6919_v3  ;;  %v1306_v24 = vld [vmem:[#allocation2 + $0x1f7] sm:$0xff] }
 0x311   :  { %v3789_v45 = vsel %vm3783_vm7, %v3724_v44, %v2576_v62  ;;  %v3597_v62 = vsel %vm3589_vm5, %v3532_v12, %v6933_v16  ;;  %v1370_v12 = vld [vmem:[#allocation2 + $0x1f8] sm:$0xff] }
 0x312   :  { %v3086_v1 = vpop.permute.xlu0 %3085  ;;  %2599 = vrot.lane.b32.xlu1 %v1428_v53, %s6369_s8  ;;  %v3662_v50 = vsel %vm3654_vm6, %v3597_v62, %v6975_v10  ;;  %v1368_v10 = vld [vmem:[#allocation2 + $0x1d0] sm:$0xff] }
 0x313   :  { %v3918_v40 = vsel %vm3913_vm9, %v3853_v46, %v3086_v1  ;;  %v1367_v1 = vld [vmem:[#allocation2 + $0x1c8] sm:$0xff]  ;;  %v3726_v3 = vsel %vm113_vm2, %v3662_v50, %v7455_v51 }
 0x314   :  { %3109 = vrot.lane.b32.xlu0 %v1365_v25, %s6371_s3  ;;  %v2832_v38 = vpop.permute.xlu1 %2831 }
 0x315   :  { %v3854_v30 = vsel %vm3848_vm8, %v3789_v45, %v2832_v38 }
 0x316   :  { %v3342_v19 = vpop.permute.xlu0 %3341  ;;  %2855 = vrot.lane.b32.xlu1 %v1302_v29, %s6370_s11 }
 0x317   :  { %v3983_v35 = vsel %vm3978_vm10, %v3918_v40, %v3342_v19 }
 0x318   :  { %3111 = vrot.lane.b32.xlu0 %v1366_v34, %s6371_s3  ;;  %5999 = vmatprep.mubr.msk.f32.mxu1 %vm4055_vm11, %v3983_v35  ;;  %v3088_v13 = vpop.permute.xlu1 %3087  ;;  %v1431_v35 = vld [vmem:[#allocation2 + $0x1c9] sm:$0xff] }
 0x319   :  { %v3919_v58 = vsel %vm3913_vm9, %v3854_v30, %v3088_v13  ;;  %v1305_v13 = vld [vmem:[#allocation2 + $0x1ef] sm:$0xff] }
 0x31a   :  { %v3344_v6 = vpop.permute.xlu0 %3343  ;;  %2345 = vrot.lane.b32.xlu1 %v1365_v25, %s6368_s2  ;;  %v3725_v25 = vsel %vm113_vm2, %v3661_v15, %v7447_v48 }
 0x31b   :  { %v3984_v31 = vsel %vm3978_vm10, %v3919_v58, %v3344_v6  ;;  %v6219_v58 = vld [vmem:[#allocation2 + $0xaf] sm:$0xff] }
 0x31c   :  { %2347 = vrot.lane.b32.xlu0 %v1366_v34, %s6368_s2  ;;  %6000 = vmatmul.mubr.msk.f32.gmra.mrb[36].mxu1 %vm4055_vm11, %v3984_v31  ;;  %v2578_v59 = vpop.permute.xlu1 %2577  ;;  %v1432_v34 = vld [vmem:[#allocation2 + $0x1d1] sm:$0xff]  ;;  %v3533_v6 = vsel %vm755_vm0, %v6219_v58, %v6941_v23 }
 0x31d   :  { %v3790_v7 = vsel %vm3783_vm7, %v3725_v25, %v2578_v59  ;;  %v6220_v59 = vld [vmem:[#allocation2 + $0xb7] sm:$0xff] }
 0x31e   :  { %v2834_v55 = vpop.permute.xlu0 %2833  ;;  %3365 = vrot.lane.b32.xlu1 %v1429_v32, %s6372_s12 }
 0x31f   :  { %v3855_v46 = vsel %vm3848_vm8, %v3790_v7, %v2834_v55  ;;  %v3534_v55 = vsel %vm755_vm0, %v6220_v59, %v6951_v43  ;;  %v1433_v7 = vld [vmem:[#allocation2 + $0x1f1] sm:$0xff] }
 0x320   :  { %3367 = vrot.lane.b32.xlu0 %v1430_v60, %s6372_s12  ;;  %v2580_v49 = vpop.permute.xlu1 %2579 }
 0x321   :  { %v3791_v41 = vsel %vm3783_vm7, %v3726_v3, %v2580_v49  ;;  %v3599_v49 = vsel %vm3589_vm5, %v3534_v55, %v6963_v61 }
 0x322   :  { %v3090_v53 = vpop.permute.xlu0 %3089  ;;  %2601 = vrot.lane.b32.xlu1 %v1429_v32, %s6369_s8  ;;  %v3598_v32 = vsel %vm3589_vm5, %v3533_v6, %v6953_v47  ;;  %v3664_v23 = vsel %vm3654_vm6, %v3599_v49, %v7005_v56 }
 0x323   :  { %v3920_v48 = vsel %vm3913_vm9, %v3855_v46, %v3090_v53  ;;  %v3663_v53 = vsel %vm3654_vm6, %v3598_v32, %v6995_v0 }
 0x324   :  { %2857 = vrot.lane.b32.xlu0 %v1303_v42, %s6370_s11  ;;  %v2836_v20 = vpop.permute.xlu1 %2835  ;;  %v1369_v42 = vld [vmem:[#allocation2 + $0x1f0] sm:$0xff] }
 0x325   :  { %v3856_v17 = vsel %vm3848_vm8, %v3791_v41, %v2836_v20 }
 0x326   :  { %v3092_v18 = vpop.permute.xlu0 %3091  ;;  %2603 = vrot.lane.b32.xlu1 %v1430_v60, %s6369_s8 }
 0x327   :  { %v3921_v51 = vsel %vm3913_vm9, %v3856_v17, %v3092_v18  ;;  %v6221_v17 = vld [vmem:[#allocation2 + $0xd7] sm:$0xff] }
 0x328   :  { %3113 = vrot.lane.b32.xlu0 %v1367_v1, %s6371_s3  ;;  %v2326_v16 = vpop.permute.xlu1 %2325 }
 0x329   :  { %v3727_v26 = vsel %vm113_vm2, %v3663_v53, %v2326_v16  ;;  %v1434_v16 = vld [vmem:[#allocation2 + $0x1f9] sm:$0xff] }
 0x32a   :  { %v2328_v63 = vpop.permute.xlu0 %2327  ;;  %2859 = vrot.lane.b32.xlu1 %v1304_v37, %s6370_s11  ;;  %v1307_v37 = vld [vmem:[#allocation2 + $0x217] sm:$0xff] }
 0x32b   :  { %v3728_v43 = vsel %vm113_vm2, %v3664_v23, %v2328_v63  ;;  %v1435_v53 = vld [vmem:[#allocation2 + $0x219] sm:$0xff] }
 0x32c   :  { %3115 = vrot.lane.b32.xlu0 %v1368_v10, %s6371_s3  ;;  %v3346_v38 = vpop.permute.xlu1 %3345 }
 0x32d   :  { %v3985_v39 = vsel %vm3978_vm10, %v3920_v48, %v3346_v38  ;;  %v6222_v48 = vld [vmem:[#allocation2 + $0xdf] sm:$0xff] }
 0x32e   :  { %v3348_v40 = vpop.permute.xlu0 %3347  ;;  %2349 = vrot.lane.b32.xlu1 %v1367_v1, %s6368_s2  ;;  %6002 = vmatprep.mubr.msk.f32.mxu1 %vm4055_vm11, %v3985_v39  ;;  %v3536_v38 = vsel %vm755_vm0, %v6222_v48, %v6981_v27  ;;  %v1438_v48 = vld [vmem:[#allocation2 + $0x249] sm:$0xff] }
 0x32f   :  { %v3986_v19 = vsel %vm3978_vm10, %v3921_v51, %v3348_v40  ;;  %v3601_v40 = vsel %vm3589_vm5, %v3536_v38, %v6993_v2 }
 0x330   :  { %2351 = vrot.lane.b32.xlu0 %v1368_v10, %s6368_s2  ;;  %6003 = vmatmul.mubr.msk.f32.gmra.mrb[38].mxu1 %vm4055_vm11, %v3986_v19  ;;  %v2582_v29 = vpop.permute.xlu1 %2581  ;;  %v3535_v10 = vsel %vm755_vm0, %v6221_v17, %v6971_v5  ;;  %v3666_v5 = vsel %vm3654_vm6, %v3601_v40, %v7040_v54  ;;  %v4701_v54 = vld [vmem:[%s8977_s5] sm:$0xf]  ;;  %v6225_v40 = vld [vmem:[#allocation2 + $0x127] sm:$0xff] }
 0x331   :  { %v3792_v47 = vsel %vm3783_vm7, %v3727_v26, %v2582_v29  ;;  %v3600_v51 = vsel %vm3589_vm5, %v3535_v10, %v6983_v33  ;;  %v1371_v29 = vld [vmem:[#allocation2 + $0x218] sm:$0xff]  ;;  %6089 = vmatprep.subr.msk.mxu0 %vm4248_vm4, %v4701_v54 }
 0x332   :  { %v2838_v44 = vpop.permute.xlu0 %2837  ;;  %3369 = vrot.lane.b32.xlu1 %v1431_v35, %s6372_s12  ;;  %v3665_v19 = vsel %vm3654_vm6, %v3600_v51, %v7028_v22  ;;  %6090 = vmatpush3.msk.msra.mxu0 %vm4248_vm4, %v4701_v54  ;;  %v9131_v54 = vld [vmem:[#allocation50_spill] sm:$0xff] }
 0x333   :  { %v3857_v56 = vsel %vm3848_vm8, %v3792_v47, %v2838_v44  ;;  %v6223_v47 = vld [vmem:[#allocation2 + $0xff] sm:$0xff] }
 0x334   :  { %3371 = vrot.lane.b32.xlu0 %v1432_v34, %s6372_s12  ;;  %v2584_v45 = vpop.permute.xlu1 %2583 }
 0x335   :  { %v3793_v61 = vsel %vm3783_vm7, %v3728_v43, %v2584_v45  ;;  %v1308_v45 = vld [vmem:[#allocation2 + $0x21f] sm:$0xff] }
 0x336   :  { %v3094_v30 = vpop.permute.xlu0 %3093  ;;  %2605 = vrot.lane.b32.xlu1 %v1431_v35, %s6369_s8  ;;  %v1309_v43 = vld [vmem:[#allocation2 + $0x23f] sm:$0xff] }
 0x337   :  { %v3922_v8 = vsel %vm3913_vm9, %v3857_v56, %v3094_v30  ;;  %v1372_v30 = vld [vmem:[#allocation2 + $0x220] sm:$0xff] }
 0x338   :  { %2861 = vrot.lane.b32.xlu0 %v1305_v13, %s6370_s11  ;;  %v2840_v31 = vpop.permute.xlu1 %2839 }
 0x339   :  { %v3858_v0 = vsel %vm3848_vm8, %v3793_v61, %v2840_v31 }
 0x33a   :  { %v3096_v60 = vpop.permute.xlu0 %3095  ;;  %2607 = vrot.lane.b32.xlu1 %v1432_v34, %s6369_s8 }
 0x33b   :  { %v3923_v62 = vsel %vm3913_vm9, %v3858_v0, %v3096_v60 }
 0x33c   :  { %3117 = vrot.lane.b32.xlu0 %v1369_v42, %s6371_s3  ;;  %v2330_v21 = vpop.permute.xlu1 %2329 }
 0x33d   :  { %v3729_v44 = vsel %vm113_vm2, %v3665_v19, %v2330_v21  ;;  %v3537_v21 = vsel %vm755_vm0, %v6223_v47, %v7001_v28  ;;  %v3539_v19 = vsel %vm755_vm0, %v6225_v40, %v7036_v52 }
 0x33e   :  { %v2332_v20 = vpop.permute.xlu0 %2331  ;;  %2863 = vrot.lane.b32.xlu1 %v1306_v24, %s6370_s11  ;;  %v3602_v0 = vsel %vm3589_vm5, %v3537_v21, %v7013_v11 }
 0x33f   :  { %v3730_v27 = vsel %vm113_vm2, %v3666_v5, %v2332_v20  ;;  %v6224_v20 = vld [vmem:[#allocation2 + $0x107] sm:$0xff]  ;;  %v6226_v5 = vld [vmem:[#allocation2 + $0x12f] sm:$0xff] }
 0x340   :  { %3119 = vrot.lane.b32.xlu0 %v1370_v12, %s6371_s3  ;;  %v3350_v18 = vpop.permute.xlu1 %3349  ;;  %v3538_v24 = vsel %vm755_vm0, %v6224_v20, %v7011_v9  ;;  %v1439_v20 = vld [vmem:[#allocation2 + $0x269] sm:$0xff] }
 0x341   :  { %v3987_v15 = vsel %vm3978_vm10, %v3922_v8, %v3350_v18  ;;  %v3603_v56 = vsel %vm3589_vm5, %v3538_v24, %v7026_v36  ;;  %v3667_v8 = vsel %vm3654_vm6, %v3602_v0, %v7060_v57  ;;  %v1373_v18 = vld [vmem:[#allocation2 + $0x240] sm:$0xff]  ;;  %v1440_v24 = vld [vmem:[#allocation2 + $0x271] sm:$0xff] }
 0x342   :  { %v3352_v1 = vpop.permute.xlu0 %3351  ;;  %2353 = vrot.lane.b32.xlu1 %v1369_v42, %s6368_s2  ;;  %6005 = vmatprep.mubr.msk.f32.mxu1 %vm4055_vm11, %v3987_v15  ;;  %v1436_v42 = vld [vmem:[#allocation2 + $0x221] sm:$0xff]  ;;  %v3668_v28 = vsel %vm3654_vm6, %v3603_v56, %v7070_v4  ;;  %v1313_v56 = vld [vmem:[#allocation2 + $0x28f] sm:$0xff] }
 0x343   :  { %v3988_v50 = vsel %vm3978_vm10, %v3923_v62, %v3352_v1 }
 0x344   :  { %2355 = vrot.lane.b32.xlu0 %v1370_v12, %s6368_s2  ;;  %6006 = vmatmul.mubr.msk.f32.gmra.mrb[40].mxu1 %vm4055_vm11, %v3988_v50  ;;  %v2586_v25 = vpop.permute.xlu1 %2585  ;;  %v1310_v50 = vld [vmem:[#allocation2 + $0x247] sm:$0xff] }
 0x345   :  { %v3794_v33 = vsel %vm3783_vm7, %v3729_v44, %v2586_v25  ;;  %v1374_v25 = vld [vmem:[#allocation2 + $0x248] sm:$0xff]  ;;  %v3540_v44 = vsel %vm755_vm0, %v6226_v5, %v7046_v14 }
 0x346   :  { %v2842_v3 = vpop.permute.xlu0 %2841  ;;  %3373 = vrot.lane.b32.xlu1 %v1433_v7, %s6372_s12 }
 0x347   :  { %v3859_v13 = vsel %vm3848_vm8, %v3794_v33, %v2842_v3 }
 0x348   :  { %3375 = vrot.lane.b32.xlu0 %v1434_v16, %s6372_s12  ;;  %v2588_v41 = vpop.permute.xlu1 %2587 }
 0x349   :  { %v3795_v2 = vsel %vm3783_vm7, %v3730_v27, %v2588_v41  ;;  %v9128_v27 = vld [vmem:[#allocation35_spill] sm:$0xff] }
 0x34a   :  { %v3098_v63 = vpop.permute.xlu0 %3097  ;;  %2609 = vrot.lane.b32.xlu1 %v1433_v7, %s6369_s8  ;;  %v3604_v33 = vsel %vm3589_vm5, %v3539_v19, %v9128_v27 }
 0x34b   :  { %v3924_v58 = vsel %vm3913_vm9, %v3859_v13, %v3098_v63 }
 0x34c   :  { %2865 = vrot.lane.b32.xlu0 %v1307_v37, %s6370_s11  ;;  %v2844_v46 = vpop.permute.xlu1 %2843 }
 0x34d   :  { %v3860_v22 = vsel %vm3848_vm8, %v3795_v2, %v2844_v46  ;;  %v1437_v46 = vld [vmem:[#allocation2 + $0x241] sm:$0xff] }
 0x34e   :  { %v3100_v39 = vpop.permute.xlu0 %3099  ;;  %2611 = vrot.lane.b32.xlu1 %v1434_v16, %s6369_s8  ;;  %v9129_v2 = vld [vmem:[#allocation38_spill] sm:$0xff] }
 0x34f   :  { %v3925_v31 = vsel %vm3913_vm9, %v3860_v22, %v3100_v39  ;;  %v1311_v39 = vld [vmem:[#allocation2 + $0x267] sm:$0xff] }
 0x350   :  { %3121 = vrot.lane.b32.xlu0 %v1371_v29, %s6371_s3  ;;  %v2334_v35 = vpop.permute.xlu1 %2333 }
 0x351   :  { %v3731_v62 = vsel %vm113_vm2, %v3667_v8, %v2334_v35  ;;  %v6227_v8 = vld [vmem:[#allocation2 + $0x14f] sm:$0xff] }
 0x352   :  { %v2336_v34 = vpop.permute.xlu0 %2335  ;;  %2867 = vrot.lane.b32.xlu1 %v1308_v45, %s6370_s11  ;;  %v9130_v45 = vld [vmem:[#allocation47_spill] sm:$0xff] }
 0x353   :  { %v3732_v9 = vsel %vm113_vm2, %v3668_v28, %v2336_v34  ;;  %v3605_v34 = vsel %vm3589_vm5, %v3540_v44, %v9129_v2  ;;  %v3669_v22 = vsel %vm3654_vm6, %v3604_v33, %v9130_v45  ;;  %v1442_v45 = vld [vmem:[#allocation2 + $0x299] sm:$0xff] }
 0x354   :  { %3123 = vrot.lane.b32.xlu0 %v1372_v30, %s6371_s3  ;;  %v3354_v6 = vpop.permute.xlu1 %3353  ;;  %v3670_v52 = vsel %vm3654_vm6, %v3605_v34, %v9131_v54  ;;  %v1441_v34 = vld [vmem:[#allocation2 + $0x291] sm:$0xff] }
 0x355   :  { %v3989_v59 = vsel %vm3978_vm10, %v3924_v58, %v3354_v6 }
 0x356   :  { %v3356_v55 = vpop.permute.xlu0 %3355  ;;  %2357 = vrot.lane.b32.xlu1 %v1371_v29, %s6368_s2  ;;  %6008 = vmatprep.mubr.msk.f32.mxu1 %vm4055_vm11, %v3989_v59 }
 0x357   :  { %v3990_v32 = vsel %vm3978_vm10, %v3925_v31, %v3356_v55  ;;  %v1312_v55 = vld [vmem:[#allocation2 + $0x26f] sm:$0xff] }
 0x358   :  { %2359 = vrot.lane.b32.xlu0 %v1372_v30, %s6368_s2  ;;  %6009 = vmatmul.mubr.msk.f32.gmra.mrb[42].mxu1 %vm4055_vm11, %v3990_v32  ;;  %v2590_v60 = vpop.permute.xlu1 %2589  ;;  %v1375_v30 = vld [vmem:[#allocation2 + $0x268] sm:$0xff] }
 0x359   :  { %v3796_v11 = vsel %vm3783_vm7, %v3731_v62, %v2590_v60  ;;  %v1376_v60 = vld [vmem:[#allocation2 + $0x270] sm:$0xff] }
 0x35a   :  { %v2846_v49 = vpop.permute.xlu0 %2845  ;;  %3377 = vrot.lane.b32.xlu1 %v1435_v53, %s6372_s12 }
 0x35b   :  { %v3861_v4 = vsel %vm3848_vm8, %v3796_v11, %v2846_v49  ;;  %v9133_v11 = vld [vmem:[#allocation42_spill] sm:$0xff] }
 0x35c   :  { %3379 = vrot.lane.b32.xlu0 %v1436_v42, %s6372_s12  ;;  %v2592_v23 = vpop.permute.xlu1 %2591 }
 0x35d   :  { %v3797_v36 = vsel %vm3783_vm7, %v3732_v9, %v2592_v23  ;;  %v6228_v9 = vld [vmem:[#allocation2 + $0x157] sm:$0xff] }
 0x35e   :  { %v3102_v26 = vpop.permute.xlu0 %3101  ;;  %2613 = vrot.lane.b32.xlu1 %v1435_v53, %s6369_s8 }
 0x35f   :  { %v3926_v3 = vsel %vm3913_vm9, %v3861_v4, %v3102_v26  ;;  %v9136_v4 = vld [vmem:[#allocation57_spill] sm:$0xff] }
 0x360   :  { %2869 = vrot.lane.b32.xlu0 %v1309_v43, %s6370_s11  ;;  %v2848_v61 = vpop.permute.xlu1 %2847 }
 0x361   :  { %v3862_v57 = vsel %vm3848_vm8, %v3797_v36, %v2848_v61  ;;  %v9134_v36 = vld [vmem:[#allocation43_spill] sm:$0xff] }
 0x362   :  { %v3104_v12 = vpop.permute.xlu0 %3103  ;;  %2615 = vrot.lane.b32.xlu1 %v1436_v42, %s6369_s8 }
 0x363   :  { %v3927_v16 = vsel %vm3913_vm9, %v3862_v57, %v3104_v12  ;;  %v9135_v57 = vld [vmem:[#allocation46_spill] sm:$0xff] }
 0x364   :  { %3125 = vrot.lane.b32.xlu0 %v1373_v18, %s6371_s3  ;;  %v2338_v15 = vpop.permute.xlu1 %2337 }
 0x365   :  { %v3733_v13 = vsel %vm113_vm2, %v3669_v22, %v2338_v15  ;;  %v3542_v15 = vsel %vm755_vm0, %v6228_v9, %v9133_v11 }
 0x366   :  { %v2340_v1 = vpop.permute.xlu0 %2339  ;;  %2871 = vrot.lane.b32.xlu1 %v1310_v50, %s6370_s11 }
 0x367   :  { %v3734_v14 = vsel %vm113_vm2, %v3670_v52, %v2340_v1  ;;  %v6229_v52 = vld [vmem:[#allocation2 + $0x177] sm:$0xff] }
 0x368   :  { %3127 = vrot.lane.b32.xlu0 %v1374_v25, %s6371_s3  ;;  %v3358_v7 = vpop.permute.xlu1 %3357 }
 0x369   :  { %v3991_v41 = vsel %vm3978_vm10, %v3926_v3, %v3358_v7  ;;  %v1377_v7 = vld [vmem:[#allocation2 + $0x290] sm:$0xff] }
 0x36a   :  { %v3360_v63 = vpop.permute.xlu0 %3359  ;;  %2361 = vrot.lane.b32.xlu1 %v1373_v18, %s6368_s2  ;;  %6011 = vmatprep.mubr.msk.f32.mxu1 %vm4055_vm11, %v3991_v41  ;;  %v9132_v18 = vld [vmem:[#allocation40_spill] sm:$0xff] }
 0x36b   :  { %v3992_v37 = vsel %vm3978_vm10, %v3927_v16, %v3360_v63  ;;  %v3541_v28 = vsel %vm755_vm0, %v6227_v8, %v9132_v18  ;;  %v9137_v16 = vld [vmem:[#allocation60_spill] sm:$0xff] }
 0x36c   :  { %2363 = vrot.lane.b32.xlu0 %v1374_v25, %s6368_s2  ;;  %6012 = vmatmul.mubr.msk.f32.gmra.mrb[44].mxu1 %vm4055_vm11, %v3992_v37  ;;  %v2594_v17 = vpop.permute.xlu1 %2593  ;;  %v3606_v1 = vsel %vm3589_vm5, %v3541_v28, %v9134_v36  ;;  %v3607_v25 = vsel %vm3589_vm5, %v3542_v15, %v9135_v57  ;;  %v1189_v57 = vld [vmem:[#allocation2 + $0x310] sm:$0xff] }
 0x36d   :  { %v3798_v58 = vsel %vm3783_vm7, %v3733_v13, %v2594_v17  ;;  %v3671_v3 = vsel %vm3654_vm6, %v3606_v1, %v9136_v4  ;;  %v3672_v41 = vsel %vm3654_vm6, %v3607_v25, %v9137_v16  ;;  %v9138_v13 = vld [vmem:[#allocation49_spill] sm:$0xff]  ;;  %v1188_v1 = vld [vmem:[#allocation2 + $0x308] sm:$0xff] }
 0x36e   :  { %v2850_v10 = vpop.permute.xlu0 %2849  ;;  %3381 = vrot.lane.b32.xlu1 %v1437_v46, %s6372_s12  ;;  %v1443_v25 = vld [vmem:[#allocation2 + $0x2b9] sm:$0xff] }
 0x36f   :  { %v3863_v49 = vsel %vm3848_vm8, %v3798_v58, %v2850_v10 }
 0x370   :  { %3383 = vrot.lane.b32.xlu0 %v1438_v48, %s6372_s12  ;;  %v2596_v38 = vpop.permute.xlu1 %2595 }
 0x371   :  { %v3799_v31 = vsel %vm3783_vm7, %v3734_v14, %v2596_v38  ;;  %v1314_v38 = vld [vmem:[#allocation2 + $0x297] sm:$0xff]  ;;  %v3543_v14 = vsel %vm755_vm0, %v6229_v52, %v9138_v13 }
 0x372   :  { %v3106_v51 = vpop.permute.xlu0 %3105  ;;  %2617 = vrot.lane.b32.xlu1 %v1437_v46, %s6369_s8 }
 0x373   :  { %v3928_v53 = vsel %vm3913_vm9, %v3863_v49, %v3106_v51 }
 0x374   :  { %2873 = vrot.lane.b32.xlu0 %v1311_v39, %s6370_s11  ;;  %v2852_v29 = vpop.permute.xlu1 %2851  ;;  %v1378_v39 = vld [vmem:[#allocation2 + $0x298] sm:$0xff] }
 0x375   :  { %v3864_v32 = vsel %vm3848_vm8, %v3799_v31, %v2852_v29  ;;  %v6230_v31 = vld [vmem:[#allocation2 + $0x17f] sm:$0xff] }
 0x376   :  { %v3108_v35 = vpop.permute.xlu0 %3107  ;;  %2619 = vrot.lane.b32.xlu1 %v1438_v48, %s6369_s8 }
 0x377   :  { %v3929_v23 = vsel %vm3913_vm9, %v3864_v32, %v3108_v35  ;;  %v9140_v32 = vld [vmem:[#allocation53_spill] sm:$0xff] }
 0x378   :  { %3129 = vrot.lane.b32.xlu0 %v1375_v30, %s6371_s3  ;;  %v2342_v6 = vpop.permute.xlu1 %2341 }
 0x379   :  { %v3735_v63 = vsel %vm113_vm2, %v3671_v3, %v2342_v6  ;;  %v1379_v6 = vld [vmem:[#allocation2 + $0x2b8] sm:$0xff]  ;;  %v1444_v3 = vld [vmem:[#allocation2 + $0x2c1] sm:$0xff] }
 0x37a   :  { %v2344_v59 = vpop.permute.xlu0 %2343  ;;  %2875 = vrot.lane.b32.xlu1 %v1312_v55, %s6370_s11 }
 0x37b   :  { %v3736_v37 = vsel %vm113_vm2, %v3672_v41, %v2344_v59  ;;  %v9139_v59 = vld [vmem:[#allocation52_spill] sm:$0xff] }
 0x37c   :  { %3131 = vrot.lane.b32.xlu0 %v1376_v60, %s6371_s3  ;;  %v3362_v42 = vpop.permute.xlu1 %3361  ;;  %v3544_v55 = vsel %vm755_vm0, %v6230_v31, %v9139_v59  ;;  %v1382_v31 = vld [vmem:[#allocation2 + $0x338] sm:$0xff] }
 0x37d   :  { %v3993_v26 = vsel %vm3978_vm10, %v3928_v53, %v3362_v42  ;;  %v9141_v53 = vld [vmem:[#allocation56_spill] sm:$0xff] }
 0x37e   :  { %v3364_v43 = vpop.permute.xlu0 %3363  ;;  %2365 = vrot.lane.b32.xlu1 %v1375_v30, %s6368_s2  ;;  %6014 = vmatprep.mubr.msk.f32.mxu1 %vm4055_vm11, %v3993_v26  ;;  %v1315_v30 = vld [vmem:[#allocation2 + $0x2b7] sm:$0xff]  ;;  %v3609_v42 = vsel %vm3589_vm5, %v3544_v55, %v9141_v53 }
 0x37f   :  { %v3994_v47 = vsel %vm3978_vm10, %v3929_v23, %v3364_v43  ;;  %v9142_v23 = vld [vmem:[#allocation67_spill] sm:$0xff]  ;;  %v9143_v43 = vld [vmem:[#allocation70_spill] sm:$0xff] }
 0x380   :  { %2367 = vrot.lane.b32.xlu0 %v1376_v60, %s6368_s2  ;;  %6015 = vmatmul.mubr.msk.f32.gmra.mrb[46].mxu1 %vm4055_vm11, %v3994_v47  ;;  %v2598_v21 = vpop.permute.xlu1 %2597  ;;  %v3608_v60 = vsel %vm3589_vm5, %v3543_v14, %v9140_v32  ;;  %v3674_v47 = vsel %vm3654_vm6, %v3609_v42, %v9143_v43  ;;  %v1445_v43 = vld [vmem:[#allocation2 + $0x331] sm:$0xff] }
 0x381   :  { %v3800_v17 = vsel %vm3783_vm7, %v3735_v63, %v2598_v21  ;;  %v3673_v26 = vsel %vm3654_vm6, %v3608_v60, %v9142_v23  ;;  %v1252_v63 = vld [vmem:[#allocation2 + $0x309] sm:$0xff] }
 0x382   :  { %v2854_v61 = vpop.permute.xlu0 %2853  ;;  %3385 = vrot.lane.b32.xlu1 %v1439_v20, %s6372_s12 }
 0x383   :  { %v3865_v40 = vsel %vm3848_vm8, %v3800_v17, %v2854_v61  ;;  %v1316_v61 = vld [vmem:[#allocation2 + $0x2bf] sm:$0xff] }
 0x384   :  { %3387 = vrot.lane.b32.xlu0 %v1440_v24, %s6372_s12  ;;  %v2600_v0 = vpop.permute.xlu1 %2599  ;;  %v6231_v17 = vld [vmem:[#allocation2 + $0x19f] sm:$0xff] }
 0x385   :  { %v3801_v46 = vsel %vm3783_vm7, %v3736_v37, %v2600_v0  ;;  %v1317_v37 = vld [vmem:[#allocation2 + $0x32f] sm:$0xff] }
 0x386   :  { %v3110_v12 = vpop.permute.xlu0 %3109  ;;  %2621 = vrot.lane.b32.xlu1 %v1439_v20, %s6369_s8 }
 0x387   :  { %v3930_v19 = vsel %vm3913_vm9, %v3865_v40, %v3110_v12  ;;  %v1380_v12 = vld [vmem:[#allocation2 + $0x2c0] sm:$0xff]  ;;  %v9146_v40 = vld [vmem:[#allocation63_spill] sm:$0xff] }
 0x388   :  { %2877 = vrot.lane.b32.xlu0 %v1313_v56, %s6370_s11  ;;  %v2856_v62 = vpop.permute.xlu1 %2855 }
 0x389   :  { %v3866_v51 = vsel %vm3848_vm8, %v3801_v46, %v2856_v62 }
 0x38a   :  { %v3112_v50 = vpop.permute.xlu0 %3111  ;;  %2623 = vrot.lane.b32.xlu1 %v1440_v24, %s6369_s8 }
 0x38b   :  { %v3931_v5 = vsel %vm3913_vm9, %v3866_v51, %v3112_v50  ;;  %v9145_v51 = vld [vmem:[#allocation62_spill] sm:$0xff] }
 0x38c   :  { %3133 = vrot.lane.b32.xlu0 %v1377_v7, %s6371_s3  ;;  %v2346_v10 = vpop.permute.xlu1 %2345 }
 0x38d   :  { %v3737_v21 = vsel %vm113_vm2, %v3673_v26, %v2346_v10  ;;  %v9144_v10 = vld [vmem:[#allocation59_spill] sm:$0xff] }
 0x38e   :  { %v2348_v48 = vpop.permute.xlu0 %2347  ;;  %2879 = vrot.lane.b32.xlu1 %v1314_v38, %s6370_s11  ;;  %v3545_v46 = vsel %vm755_vm0, %v6231_v17, %v9144_v10  ;;  %v6232_v38 = vld [vmem:[#allocation2 + $0x1a7] sm:$0xff]  ;;  %v1320_v17 = vld [vmem:[#allocation2 + $0x35f] sm:$0xff] }
 0x38f   :  { %v3738_v20 = vsel %vm113_vm2, %v3674_v47, %v2348_v48  ;;  %v1446_v47 = vld [vmem:[#allocation2 + $0x339] sm:$0xff] }
 0x390   :  { %3135 = vrot.lane.b32.xlu0 %v1378_v39, %s6371_s3  ;;  %v3366_v29 = vpop.permute.xlu1 %3365 }
 0x391   :  { %v3995_v44 = vsel %vm3978_vm10, %v3930_v19, %v3366_v29  ;;  %v3610_v19 = vsel %vm3589_vm5, %v3545_v46, %v9146_v40  ;;  %v1384_v46 = vld [vmem:[#allocation2 + $0x360] sm:$0xff] }
 0x392   :  { %v3368_v27 = vpop.permute.xlu0 %3367  ;;  %2369 = vrot.lane.b32.xlu1 %v1377_v7, %s6368_s2  ;;  %6017 = vmatprep.mubr.msk.f32.mxu1 %vm4055_vm11, %v3995_v44  ;;  %v9147_v44 = vld [vmem:[#allocation66_spill] sm:$0xff] }
 0x393   :  { %v3996_v33 = vsel %vm3978_vm10, %v3931_v5, %v3368_v27  ;;  %v1253_v5 = vld [vmem:[#allocation2 + $0x311] sm:$0xff] }
 0x394   :  { %2371 = vrot.lane.b32.xlu0 %v1378_v39, %s6368_s2  ;;  %6018 = vmatmul.mubr.msk.f32.gmra.mrb[48].mxu1 %vm4055_vm11, %v3996_v33  ;;  %v2602_v35 = vpop.permute.xlu1 %2601  ;;  %v3546_v39 = vsel %vm755_vm0, %v6232_v38, %v9145_v51  ;;  %v9148_v33 = vld [vmem:[#allocation109_spill] sm:$0xff] }
 0x395   :  { %v3802_v24 = vsel %vm3783_vm7, %v3737_v21, %v2602_v35  ;;  %v3611_v27 = vsel %vm3589_vm5, %v3546_v39, %v9147_v44  ;;  %v3675_v35 = vsel %vm3654_vm6, %v3610_v19, %v9148_v33  ;;  %v7866_v39 = vld [vmem:[%s8976_s4] ss:$0 sm:$0xff] }
 0x396   :  { %v2858_v2 = vpop.permute.xlu0 %2857  ;;  %3389 = vrot.lane.b32.xlu1 %v1441_v34, %s6372_s12 }
 0x397   :  { %v3867_v28 = vsel %vm3848_vm8, %v3802_v24, %v2858_v2  ;;  %v1381_v2 = vld [vmem:[#allocation2 + $0x330] sm:$0xff]  ;;  %v6233_v24 = vld [vmem:[#allocation2 + $0x1c7] sm:$0xff] }
 0x398   :  { %3391 = vrot.lane.b32.xlu0 %v1442_v45, %s6372_s12  ;;  %v2604_v22 = vpop.permute.xlu1 %2603 }
 0x399   :  { %v3803_v56 = vsel %vm3783_vm7, %v3738_v20, %v2604_v22  ;;  %v1319_v20 = vld [vmem:[#allocation2 + $0x357] sm:$0xff] }
 0x39a   :  { %v3114_v54 = vpop.permute.xlu0 %3113  ;;  %2625 = vrot.lane.b32.xlu1 %v1441_v34, %s6369_s8  ;;  %v9149_v34 = vld [vmem:[#allocation112_spill] sm:$0xff] }
 0x39b   :  { %v3932_v62 = vsel %vm3913_vm9, %v3867_v28, %v3114_v54 }
 0x39c   :  { %2881 = vrot.lane.b32.xlu0 %v1315_v30, %s6370_s11  ;;  %v2860_v58 = vpop.permute.xlu1 %2859 }
 0x39d   :  { %v3868_v18 = vsel %vm3848_vm8, %v3803_v56, %v2860_v58  ;;  %v1318_v58 = vld [vmem:[#allocation2 + $0x337] sm:$0xff] }
 0x39e   :  { %v3116_v49 = vpop.permute.xlu0 %3115  ;;  %2627 = vrot.lane.b32.xlu1 %v1442_v45, %s6369_s8  ;;  %v3676_v45 = vsel %vm3654_vm6, %v3611_v27, %v9149_v34 }
 0x39f   :  { %v3933_v11 = vsel %vm3913_vm9, %v3868_v18, %v3116_v49  ;;  %v9151_v18 = vld [vmem:[#allocation72_spill] sm:$0xff] }
 0x3a0   :  { %3137 = vrot.lane.b32.xlu0 %v1379_v6, %s6371_s3  ;;  %v2350_v0 = vpop.permute.xlu1 %2349 }
 0x3a1   :  { %v3739_v22 = vsel %vm113_vm2, %v3675_v35, %v2350_v0  ;;  %v9150_v0 = vld [vmem:[#allocation69_spill] sm:$0xff] }
 0x3a2   :  { %v2352_v8 = vpop.permute.xlu0 %2351  ;;  %2883 = vrot.lane.b32.xlu1 %v1316_v61, %s6370_s11 }
 0x3a3   :  { %v3740_v30 = vsel %vm113_vm2, %v3676_v45, %v2352_v8  ;;  %v6234_v8 = vld [vmem:[#allocation2 + $0x1cf] sm:$0xff]  ;;  %v1447_v45 = vld [vmem:[#allocation2 + $0x359] sm:$0xff] }
 0x3a4   :  { %3139 = vrot.lane.b32.xlu0 %v1380_v12, %s6371_s3  ;;  %v3370_v9 = vpop.permute.xlu1 %3369  ;;  %v3547_v12 = vsel %vm755_vm0, %v6233_v24, %v9150_v0  ;;  %v3548_v28 = vsel %vm755_vm0, %v6234_v8, %v9151_v18 }
 0x3a5   :  { %v3997_v15 = vsel %vm3978_vm10, %v3932_v62, %v3370_v9  ;;  %v9152_v62 = vld [vmem:[#allocation73_spill] sm:$0xff] }
 0x3a6   :  { %v3372_v36 = vpop.permute.xlu0 %3371  ;;  %2373 = vrot.lane.b32.xlu1 %v1188_v1, %s6368_s2  ;;  %6020 = vmatprep.mubr.msk.f32.mxu1 %vm4055_vm11, %v3997_v15  ;;  %v3612_v9 = vsel %vm3589_vm5, %v3547_v12, %v9152_v62  ;;  %v9153_v15 = vld [vmem:[#allocation76_spill] sm:$0xff]  ;;  %v9154_v1 = vld [vmem:[#allocation111_spill] sm:$0xff] }
 0x3a7   :  { %v3998_v50 = vsel %vm3978_vm10, %v3933_v11, %v3372_v36  ;;  %v3613_v36 = vsel %vm3589_vm5, %v3548_v28, %v9153_v15  ;;  %v1322_v28 = vld [vmem:[#allocation2 + $0x387] sm:$0xff] }
 0x3a8   :  { %2375 = vrot.lane.b32.xlu0 %v1189_v57, %s6368_s2  ;;  %6021 = vmatmul.mubr.msk.f32.gmra.mrb[50].mxu1 %vm4055_vm11, %v3998_v50  ;;  %v2606_v4 = vpop.permute.xlu1 %2605  ;;  %v3677_v50 = vsel %vm3654_vm6, %v3612_v9, %v9154_v1  ;;  %v1383_v57 = vld [vmem:[#allocation2 + $0x358] sm:$0xff] }
 0x3a9   :  { %v3804_v54 = vsel %vm3783_vm7, %v3739_v22, %v2606_v4 }
 0x3aa   :  { %v2862_v7 = vpop.permute.xlu0 %2861  ;;  %3393 = vrot.lane.b32.xlu1 %v1443_v25, %s6372_s12  ;;  %v9155_v25 = vld [vmem:[#allocation114_spill] sm:$0xff] }
 0x3ab   :  { %v3869_v59 = vsel %vm3848_vm8, %v3804_v54, %v2862_v7  ;;  %v3678_v4 = vsel %vm3654_vm6, %v3613_v36, %v9155_v25 }
 0x3ac   :  { %3395 = vrot.lane.b32.xlu0 %v1444_v3, %s6372_s12  ;;  %v2608_v16 = vpop.permute.xlu1 %2607 }
 0x3ad   :  { %v3805_v13 = vsel %vm3783_vm7, %v3740_v30, %v2608_v16  ;;  %v1448_v30 = vld [vmem:[#allocation2 + $0x361] sm:$0xff] }
 0x3ae   :  { %v3118_v41 = vpop.permute.xlu0 %3117  ;;  %2629 = vrot.lane.b32.xlu1 %v1252_v63, %s6369_s8 }
 0x3af   :  { %v3934_v55 = vsel %vm3913_vm9, %v3869_v59, %v3118_v41 }
 0x3b0   :  { %2885 = vrot.lane.b32.xlu0 %v1317_v37, %s6370_s11  ;;  %v2864_v48 = vpop.permute.xlu1 %2863 }
 0x3b1   :  { %v3870_v6 = vsel %vm3848_vm8, %v3805_v13, %v2864_v48 }
 0x3b2   :  { %v3120_v29 = vpop.permute.xlu0 %3119  ;;  %2631 = vrot.lane.b32.xlu1 %v1253_v5, %s6369_s8 }
 0x3b3   :  { %v3935_v60 = vsel %vm3913_vm9, %v3870_v6, %v3120_v29  ;;  %v9156_v6 = vld [vmem:[#allocation77_spill] sm:$0xff] }
 0x3b4   :  { %3141 = vrot.lane.b32.xlu0 %v1381_v2, %s6371_s3  ;;  %v2354_v52 = vpop.permute.xlu1 %2353 }
 0x3b5   :  { %v3741_v3 = vsel %vm113_vm2, %v3677_v50, %v2354_v52 }
 0x3b6   :  { %v2356_v14 = vpop.permute.xlu0 %2355  ;;  %2887 = vrot.lane.b32.xlu1 %v1318_v58, %s6370_s11  ;;  %v6235_v58 = vld [vmem:[#allocation2 + $0x1ef] sm:$0xff] }
 0x3b7   :  { %v3742_v7 = vsel %vm113_vm2, %v3678_v4, %v2356_v14  ;;  %v1321_v14 = vld [vmem:[#allocation2 + $0x37f] sm:$0xff] }
 0x3b8   :  { %3143 = vrot.lane.b32.xlu0 %v1382_v31, %s6371_s3  ;;  %v3374_v32 = vpop.permute.xlu1 %3373 }
 0x3b9   :  { %v3999_v49 = vsel %vm3978_vm10, %v3934_v55, %v3374_v32  ;;  %v6236_v55 = vld [vmem:[#allocation2 + $0x1f7] sm:$0xff] }
 0x3ba   :  { %v3376_v53 = vpop.permute.xlu0 %3375  ;;  %2377 = vrot.lane.b32.xlu1 %v1381_v2, %s6368_s2  ;;  %6023 = vmatprep.mubr.msk.f32.mxu1 %vm4055_vm11, %v3999_v49  ;;  %v9157_v32 = vld [vmem:[#allocation80_spill] sm:$0xff]  ;;  %v9158_v49 = vld [vmem:[#allocation81_spill] sm:$0xff] }
 0x3bb   :  { %v4000_v42 = vsel %vm3978_vm10, %v3935_v60, %v3376_v53  ;;  %v3550_v60 = vsel %vm755_vm0, %v6236_v55, %v9157_v32 }
 0x3bc   :  { %2379 = vrot.lane.b32.xlu0 %v1382_v31, %s6368_s2  ;;  %6024 = vmatmul.mubr.msk.f32.gmra.mrb[52].mxu1 %vm4055_vm11, %v4000_v42  ;;  %v2610_v23 = vpop.permute.xlu1 %2609  ;;  %v3549_v31 = vsel %vm755_vm0, %v6235_v58, %v9156_v6 }
 0x3bd   :  { %v3806_v16 = vsel %vm3783_vm7, %v3741_v3, %v2610_v23  ;;  %v3614_v53 = vsel %vm3589_vm5, %v3549_v31, %v9158_v49  ;;  %v9159_v23 = vld [vmem:[#allocation84_spill] sm:$0xff] }
 0x3be   :  { %v2866_v26 = vpop.permute.xlu0 %2865  ;;  %3397 = vrot.lane.b32.xlu1 %v1445_v43, %s6372_s12 }
 0x3bf   :  { %v3871_v48 = vsel %vm3848_vm8, %v3806_v16, %v2866_v26  ;;  %v3615_v26 = vsel %vm3589_vm5, %v3550_v60, %v9159_v23  ;;  %v1324_v23 = vld [vmem:[#allocation2 + $0x3af] sm:$0xff] }
 0x3c0   :  { %3399 = vrot.lane.b32.xlu0 %v1446_v47, %s6372_s12  ;;  %v2612_v21 = vpop.permute.xlu1 %2611 }
 0x3c1   :  { %v3807_v63 = vsel %vm3783_vm7, %v3742_v7, %v2612_v21  ;;  %v1385_v21 = vld [vmem:[#allocation2 + $0x380] sm:$0xff] }
 0x3c2   :  { %v3122_v61 = vpop.permute.xlu0 %3121  ;;  %2633 = vrot.lane.b32.xlu1 %v1445_v43, %s6369_s8  ;;  %v9160_v43 = vld [vmem:[#allocation113_spill] sm:$0xff] }
 0x3c3   :  { %v3936_v38 = vsel %vm3913_vm9, %v3871_v48, %v3122_v61  ;;  %v9161_v61 = vld [vmem:[#allocation116_spill] sm:$0xff] }
 0x3c4   :  { %2889 = vrot.lane.b32.xlu0 %v1319_v20, %s6370_s11  ;;  %v2868_v56 = vpop.permute.xlu1 %2867  ;;  %v3680_v20 = vsel %vm3654_vm6, %v3615_v26, %v9161_v61 }
 0x3c5   :  { %v3872_v10 = vsel %vm3848_vm8, %v3807_v63, %v2868_v56 }
 0x3c6   :  { %v3124_v11 = vpop.permute.xlu0 %3123  ;;  %2635 = vrot.lane.b32.xlu1 %v1446_v47, %s6369_s8  ;;  %v3679_v47 = vsel %vm3654_vm6, %v3614_v53, %v9160_v43 }
 0x3c7   :  { %v3937_v40 = vsel %vm3913_vm9, %v3872_v10, %v3124_v11  ;;  %v1386_v11 = vld [vmem:[#allocation2 + $0x388] sm:$0xff] }
 0x3c8   :  { %3145 = vrot.lane.b32.xlu0 %v1383_v57, %s6371_s3  ;;  %v2358_v41 = vpop.permute.xlu1 %2357  ;;  %v1449_v10 = vld [vmem:[#allocation2 + $0x381] sm:$0xff] }
 0x3c9   :  { %v3743_v24 = vsel %vm113_vm2, %v3679_v47, %v2358_v41  ;;  %v1388_v47 = vld [vmem:[#allocation2 + $0x3b0] sm:$0xff] }
 0x3ca   :  { %v2360_v37 = vpop.permute.xlu0 %2359  ;;  %2891 = vrot.lane.b32.xlu1 %v1320_v17, %s6370_s11 }
 0x3cb   :  { %v3744_v0 = vsel %vm113_vm2, %v3680_v20, %v2360_v37 }
 0x3cc   :  { %3147 = vrot.lane.b32.xlu0 %v1384_v46, %s6371_s3  ;;  %v3378_v51 = vpop.permute.xlu1 %3377 }
 0x3cd   :  { %v4001_v19 = vsel %vm3978_vm10, %v3936_v38, %v3378_v51  ;;  %v1323_v51 = vld [vmem:[#allocation2 + $0x3a7] sm:$0xff] }
 0x3ce   :  { %v3380_v29 = vpop.permute.xlu0 %3379  ;;  %2381 = vrot.lane.b32.xlu1 %v1383_v57, %s6368_s2  ;;  %6026 = vmatprep.mubr.msk.f32.mxu1 %vm4055_vm11, %v4001_v19  ;;  %v9162_v19 = vld [vmem:[#allocation85_spill] sm:$0xff] }
 0x3cf   :  { %v4002_v5 = vsel %vm3978_vm10, %v3937_v40, %v3380_v29  ;;  %v5995_v44 = vpop.f32.mrb[32].mxu1  ;;  %v6237_v40 = vld [vmem:[#allocation2 + $0x217] sm:$0xff] }
 0x3d0   :  { %v4324_v27 = vadd.f32 %v5995_v44, %v7866_v39  ;;  %2383 = vrot.lane.b32.xlu0 %v1384_v46, %s6368_s2  ;;  %v4318_v33 = vpop.f32.mrb[33].mxu1  ;;  %6027 = vmatmul.mubr.msk.f32.gmra.mrb[54].mxu1 %vm4055_vm11, %v4002_v5  ;;  %v2614_v2 = vpop.permute.xlu1 %2613  ;;  %v1450_v46 = vld [vmem:[#allocation2 + $0x389] sm:$0xff]  ;;  %v3551_v29 = vsel %vm755_vm0, %v6237_v40, %v9162_v19  ;;  %v6238_v44 = vld [vmem:[#allocation2 + $0x21f] sm:$0xff] }
 0x3d1   :  { %v4319_v35 = vadd.f32 %v7866_v39, %v4318_v33  ;;  %v3808_v12 = vsel %vm3783_vm7, %v3743_v24, %v2614_v2 }
 0x3d2   :  { %v2870_v34 = vpop.permute.xlu0 %2869  ;;  %3401 = vrot.lane.b32.xlu1 %v1447_v45, %s6372_s12  ;;  %v4638_v54 = vmax.f32 %v4324_v27, 0.0  ;;  %v9163_v27 = vld [vmem:[#allocation88_spill] sm:$0xff] }
 0x3d3   :  { %v4637_v22 = vmax.f32 %v4319_v35, 0.0  ;;  %v3873_v15 = vsel %vm3848_vm8, %v3808_v12, %v2870_v34  ;;  %v3552_v33 = vsel %vm755_vm0, %v6238_v44, %v9163_v27  ;;  %v9164_v35 = vld [vmem:[#allocation89_spill] sm:$0xff] }
 0x3d4   :  { %3403 = vrot.lane.b32.xlu0 %v1448_v30, %s6372_s12  ;;  %v2616_v52 = vpop.permute.xlu1 %2615  ;;  %v3616_v2 = vsel %vm3589_vm5, %v3551_v29, %v9164_v35 }
 0x3d5   :  { %6091 = vmatprep.mubr.msk.f32.mxu0 %vm755_vm0, %v4637_v22  ;;  %v3809_v8 = vsel %vm3783_vm7, %v3744_v0, %v2616_v52 }
 0x3d6   :  { %v3126_v13 = vpop.permute.xlu0 %3125  ;;  %6092 = vmatmul.mubr.msk.f32.vlgmr.msra.gmra.mrb[32].mxu0 %vm755_vm0, %v4638_v54  ;;  %2637 = vrot.lane.b32.xlu1 %v1447_v45, %s6369_s8  ;;  %v9165_v45 = vld [vmem:[#allocation92_spill] sm:$0xff] }
 0x3d7   :  { %v3938_v50 = vsel %vm3913_vm9, %v3873_v15, %v3126_v13  ;;  %v3617_v22 = vsel %vm3589_vm5, %v3552_v33, %v9165_v45  ;;  %v1387_v13 = vld [vmem:[#allocation2 + $0x3a8] sm:$0xff]  ;;  %v1326_v45 = vld [vmem:[#allocation2 + $0x3d7] sm:$0xff] }
 0x3d8   :  { %2893 = vrot.lane.b32.xlu0 %v1321_v14, %s6370_s11  ;;  %v2872_v59 = vpop.permute.xlu1 %2871  ;;  %v9167_v14 = vld [vmem:[#allocation118_spill] sm:$0xff] }
 0x3d9   :  { %v3874_v62 = vsel %vm3848_vm8, %v3809_v8, %v2872_v59  ;;  %v3682_v58 = vsel %vm3654_vm6, %v3617_v22, %v9167_v14 }
 0x3da   :  { %v3128_v42 = vpop.permute.xlu0 %3127  ;;  %2639 = vrot.lane.b32.xlu1 %v1448_v30, %s6369_s8  ;;  %v9166_v30 = vld [vmem:[#allocation115_spill] sm:$0xff] }
 0x3db   :  { %v3939_v4 = vsel %vm3913_vm9, %v3874_v62, %v3128_v42  ;;  %v3681_v54 = vsel %vm3654_vm6, %v3616_v2, %v9166_v30  ;;  %v1451_v62 = vld [vmem:[#allocation2 + $0x3a9] sm:$0xff] }
 0x3dc   :  { %3149 = vrot.lane.b32.xlu0 %v1385_v21, %s6371_s3  ;;  %v2362_v56 = vpop.permute.xlu1 %2361 }
 0x3dd   :  { %v3745_v6 = vsel %vm113_vm2, %v3681_v54, %v2362_v56  ;;  %v1390_v54 = vld [vmem:[#allocation2 + $0x3d8] sm:$0xff] }
 0x3de   :  { %v2364_v18 = vpop.permute.xlu0 %2363  ;;  %2895 = vrot.lane.b32.xlu1 %v1322_v28, %s6370_s11 }
 0x3df   :  { %v5998_v9 = vpop.f32.mrb[34].mxu1  ;;  %v3746_v55 = vsel %vm113_vm2, %v3682_v58, %v2364_v18 }
 0x3e0   :  { %v4334_v36 = vadd.f32 %v5998_v9, %v7866_v39  ;;  %3151 = vrot.lane.b32.xlu0 %v1386_v11, %s6371_s3  ;;  %v4328_v1 = vpop.f32.mrb[35].mxu1  ;;  %v3382_v25 = vpop.permute.xlu1 %3381  ;;  %v1452_v9 = vld [vmem:[#allocation2 + $0x3b1] sm:$0xff] }
 0x3e1   :  { %v4329_v57 = vadd.f32 %v7866_v39, %v4328_v1  ;;  %v4003_v3 = vsel %vm3978_vm10, %v3938_v50, %v3382_v25  ;;  %v6239_v1 = vld [vmem:[#allocation2 + $0x23f] sm:$0xff] }
 0x3e2   :  { %v3384_v7 = vpop.permute.xlu0 %3383  ;;  %2385 = vrot.lane.b32.xlu1 %v1385_v21, %s6368_s2  ;;  %6029 = vmatprep.mubr.msk.f32.mxu1 %vm4055_vm11, %v4003_v3  ;;  %v4640_v63 = vmax.f32 %v4334_v36, 0.0  ;;  %v1325_v36 = vld [vmem:[#allocation2 + $0x3cf] sm:$0xff]  ;;  %v9168_v50 = vld [vmem:[#allocation93_spill] sm:$0xff] }
 0x3e3   :  { %v4639_v16 = vmax.f32 %v4329_v57, 0.0  ;;  %v4004_v41 = vsel %vm3978_vm10, %v3939_v4, %v3384_v7  ;;  %v3553_v57 = vsel %vm755_vm0, %v6239_v1, %v9168_v50  ;;  %v6240_v4 = vld [vmem:[#allocation2 + $0x247] sm:$0xff]  ;;  %v9169_v3 = vld [vmem:[#allocation96_spill] sm:$0xff] }
 0x3e4   :  { %2387 = vrot.lane.b32.xlu0 %v1386_v11, %s6368_s2  ;;  %6030 = vmatmul.mubr.msk.f32.gmra.mrb[56].mxu1 %vm4055_vm11, %v4004_v41  ;;  %v2618_v37 = vpop.permute.xlu1 %2617  ;;  %v3554_v7 = vsel %vm755_vm0, %v6240_v4, %v9169_v3 }
 0x3e5   :  { %6094 = vmatprep.mubr.msk.f32.mxu0 %vm755_vm0, %v4639_v16  ;;  %v3810_v32 = vsel %vm3783_vm7, %v3745_v6, %v2618_v37  ;;  %v9170_v16 = vld [vmem:[#allocation97_spill] sm:$0xff]  ;;  %v9171_v37 = vld [vmem:[#allocation100_spill] sm:$0xff] }
 0x3e6   :  { %v2874_v17 = vpop.permute.xlu0 %2873  ;;  %6095 = vmatmul.mubr.msk.f32.gmra.mrb[34].mxu0 %vm755_vm0, %v4640_v63  ;;  %3405 = vrot.lane.b32.xlu1 %v1449_v10, %s6372_s12  ;;  %v3618_v41 = vsel %vm3589_vm5, %v3553_v57, %v9170_v16 }
 0x3e7   :  { %v3875_v21 = vsel %vm3848_vm8, %v3810_v32, %v2874_v17  ;;  %v3619_v17 = vsel %vm3589_vm5, %v3554_v7, %v9171_v37  ;;  %v1328_v37 = vld [vmem:[#allocation2 + $0x3ff] sm:$0xff] }
 0x3e8   :  { %3407 = vrot.lane.b32.xlu0 %v1450_v46, %s6372_s12  ;;  %v2620_v48 = vpop.permute.xlu1 %2619 }
 0x3e9   :  { %v3811_v53 = vsel %vm3783_vm7, %v3746_v55, %v2620_v48 }
 0x3ea   :  { %v3130_v38 = vpop.permute.xlu0 %3129  ;;  %2641 = vrot.lane.b32.xlu1 %v1449_v10, %s6369_s8  ;;  %v9172_v10 = vld [vmem:[#allocation117_spill] sm:$0xff] }
 0x3eb   :  { %v3940_v20 = vsel %vm3913_vm9, %v3875_v21, %v3130_v38  ;;  %v1389_v38 = vld [vmem:[#allocation2 + $0x3d0] sm:$0xff] }
 0x3ec   :  { %2897 = vrot.lane.b32.xlu0 %v1323_v51, %s6370_s11  ;;  %v2876_v5 = vpop.permute.xlu1 %2875  ;;  %v9173_v51 = vld [vmem:[#allocation120_spill] sm:$0xff] }
 0x3ed   :  { %v3876_v26 = vsel %vm3848_vm8, %v3811_v53, %v2876_v5  ;;  %v3684_v40 = vsel %vm3654_vm6, %v3619_v17, %v9173_v51  ;;  %v1454_v53 = vld [vmem:[#allocation2 + $0x3d9] sm:$0xff] }
 0x3ee   :  { %v3132_v34 = vpop.permute.xlu0 %3131  ;;  %2643 = vrot.lane.b32.xlu1 %v1450_v46, %s6369_s8  ;;  %v3683_v46 = vsel %vm3654_vm6, %v3618_v41, %v9172_v10 }
 0x3ef   :  { %v6001_v52 = vpop.f32.mrb[36].mxu1  ;;  %v3941_v0 = vsel %vm3913_vm9, %v3876_v26, %v3132_v34  ;;  %v1327_v26 = vld [vmem:[#allocation2 + $0x3f7] sm:$0xff] }
 0x3f0   :  { %v4344_v31 = vadd.f32 %v6001_v52, %v7866_v39  ;;  %3153 = vrot.lane.b32.xlu0 %v1387_v13, %s6371_s3  ;;  %v4338_v59 = vpop.f32.mrb[37].mxu1  ;;  %v2366_v49 = vpop.permute.xlu1 %2365 }
 0x3f1   :  { %v4339_v60 = vadd.f32 %v7866_v39, %v4338_v59  ;;  %v3747_v19 = vsel %vm113_vm2, %v3683_v46, %v2366_v49  ;;  %v1453_v49 = vld [vmem:[#allocation2 + $0x3d1] sm:$0xff]  ;;  %v1392_v46 = vld [vmem:[#allocation2 + $0x400] sm:$0xff] }
 0x3f2   :  { %v2368_v42 = vpop.permute.xlu0 %2367  ;;  %2899 = vrot.lane.b32.xlu1 %v1324_v23, %s6370_s11  ;;  %v4642_v61 = vmax.f32 %v4344_v31, 0.0 }
 0x3f3   :  { %v4641_v43 = vmax.f32 %v4339_v60, 0.0  ;;  %v3748_v44 = vsel %vm113_vm2, %v3684_v40, %v2368_v42 }
 0x3f4   :  { %3155 = vrot.lane.b32.xlu0 %v1388_v47, %s6371_s3  ;;  %v3386_v24 = vpop.permute.xlu1 %3385 }
 0x3f5   :  { %6097 = vmatprep.mubr.msk.f32.mxu0 %vm755_vm0, %v4641_v43  ;;  %v4005_v12 = vsel %vm3978_vm10, %v3940_v20, %v3386_v24  ;;  %v6241_v43 = vld [vmem:[#allocation2 + $0x267] sm:$0xff]  ;;  %v6242_v20 = vld [vmem:[#allocation2 + $0x26f] sm:$0xff] }
 0x3f6   :  { %v3388_v56 = vpop.permute.xlu0 %3387  ;;  %6098 = vmatmul.mubr.msk.f32.gmra.mrb[36].mxu0 %vm755_vm0, %v4642_v61  ;;  %2389 = vrot.lane.b32.xlu1 %v1387_v13, %s6368_s2  ;;  %v9175_v24 = vld [vmem:[#allocation104_spill] sm:$0xff] }
 0x3f7   :  { %v4006_v8 = vsel %vm3978_vm10, %v3941_v0, %v3388_v56  ;;  %6032 = vmatprep.mubr.msk.f32.mxu1 %vm4055_vm11, %v4005_v12  ;;  %v3556_v0 = vsel %vm755_vm0, %v6242_v20, %v9175_v24  ;;  %v9176_v12 = vld [vmem:[#allocation105_spill] sm:$0xff] }
 0x3f8   :  { %2391 = vrot.lane.b32.xlu0 %v1388_v47, %s6368_s2  ;;  %6033 = vmatmul.mubr.msk.f32.gmra.mrb[58].mxu1 %vm4055_vm11, %v4006_v8  ;;  %v2622_v18 = vpop.permute.xlu1 %2621  ;;  %v9174_v47 = vld [vmem:[#allocation101_spill] sm:$0xff] }
 0x3f9   :  { %v3812_v27 = vsel %vm3783_vm7, %v3747_v19, %v2622_v18  ;;  %v3555_v21 = vsel %vm755_vm0, %v6241_v43, %v9174_v47  ;;  %v9177_v18 = vld [vmem:[#allocation108_spill] sm:$0xff] }
 0x3fa   :  { %v2878_v28 = vpop.permute.xlu0 %2877  ;;  %3409 = vrot.lane.b32.xlu1 %v1451_v62, %s6372_s12  ;;  %v3620_v56 = vsel %vm3589_vm5, %v3555_v21, %v9176_v12 }
 0x3fb   :  { %v3877_v52 = vsel %vm3848_vm8, %v3812_v27, %v2878_v28  ;;  %v3621_v28 = vsel %vm3589_vm5, %v3556_v0, %v9177_v18  ;;  %v1330_v18 = vld [vmem:[#allocation2 + $0x427] sm:$0xff] }
 0x3fc   :  { %3411 = vrot.lane.b32.xlu0 %v1452_v9, %s6372_s12  ;;  %v2624_v11 = vpop.permute.xlu1 %2623 }
 0x3fd   :  { %v3813_v2 = vsel %vm3783_vm7, %v3748_v44, %v2624_v11 }
 0x3fe   :  { %v3134_v15 = vpop.permute.xlu0 %3133  ;;  %2645 = vrot.lane.b32.xlu1 %v1451_v62, %s6369_s8  ;;  %v9178_v62 = vld [vmem:[#allocation119_spill] sm:$0xff] }
 0x3ff   :  { %v3942_v14 = vsel %vm3913_vm9, %v3877_v52, %v3134_v15  ;;  %v1391_v15 = vld [vmem:[#allocation2 + $0x3f8] sm:$0xff] }
 0x400   :  { %2901 = vrot.lane.b32.xlu0 %v1325_v36, %s6370_s11  ;;  %v2880_v25 = vpop.permute.xlu1 %2879  ;;  %v9179_v36 = vld [vmem:[#allocation122_spill] sm:$0xff] }
 0x401   :  { %v3878_v22 = vsel %vm3848_vm8, %v3813_v2, %v2880_v25  ;;  %v3686_v1 = vsel %vm3654_vm6, %v3621_v28, %v9179_v36  ;;  %v1456_v2 = vld [vmem:[#allocation2 + $0x401] sm:$0xff] }
 0x402   :  { %v3136_v63 = vpop.permute.xlu0 %3135  ;;  %2647 = vrot.lane.b32.xlu1 %v1452_v9, %s6369_s8  ;;  %v3685_v9 = vsel %vm3654_vm6, %v3620_v56, %v9178_v62 }
 0x403   :  { %v6004_v48 = vpop.f32.mrb[38].mxu1  ;;  %v3943_v6 = vsel %vm3913_vm9, %v3878_v22, %v3136_v63 }
 0x404   :  { %v4354_v29 = vadd.f32 %v6004_v48, %v7866_v39  ;;  %3157 = vrot.lane.b32.xlu0 %v1389_v38, %s6371_s3  ;;  %v4348_v5 = vpop.f32.mrb[39].mxu1  ;;  %v2370_v35 = vpop.permute.xlu1 %2369 }
 0x405   :  { %v4349_v33 = vadd.f32 %v7866_v39, %v4348_v5  ;;  %v3749_v50 = vsel %vm113_vm2, %v3685_v9, %v2370_v35  ;;  %v1455_v35 = vld [vmem:[#allocation2 + $0x3f9] sm:$0xff]  ;;  %v1394_v9 = vld [vmem:[#allocation2 + $0x428] sm:$0xff] }
 0x406   :  { %v2372_v34 = vpop.permute.xlu0 %2371  ;;  %2903 = vrot.lane.b32.xlu1 %v1326_v45, %s6370_s11  ;;  %v4644_v13 = vmax.f32 %v4354_v29, 0.0  ;;  %v933_v45 = vld [vmem:[#allocation2 + $0x2e7] sm:$0xff] }
 0x407   :  { %v4643_v30 = vmax.f32 %v4349_v33, 0.0  ;;  %v3750_v4 = vsel %vm113_vm2, %v3686_v1, %v2372_v34  ;;  %v932_v34 = vld [vmem:[#allocation2 + $0x2df] sm:$0xff] }
 0x408   :  { %3159 = vrot.lane.b32.xlu0 %v1390_v54, %s6371_s3  ;;  %v3390_v58 = vpop.permute.xlu1 %3389 }
 0x409   :  { %6100 = vmatprep.mubr.msk.f32.mxu0 %vm755_vm0, %v4643_v30  ;;  %v4007_v31 = vsel %vm3978_vm10, %v3942_v14, %v3390_v58  ;;  %v9181_v14 = vld [vmem:[#allocation6_spill] sm:$0xff] }
 0x40a   :  { %v3392_v59 = vpop.permute.xlu0 %3391  ;;  %6101 = vmatmul.mubr.msk.f32.gmra.mrb[38].mxu0 %vm755_vm0, %v4644_v13  ;;  %2393 = vrot.lane.b32.xlu1 %v1389_v38, %s6368_s2  ;;  %v1329_v13 = vld [vmem:[#allocation2 + $0x41f] sm:$0xff]  ;;  %v3558_v58 = vsel %vm755_vm0, %v933_v45, %v9181_v14  ;;  %v1395_v45 = vld [vmem:[#allocation2 + $0x448] sm:$0xff] }
 0x40b   :  { %v4008_v55 = vsel %vm3978_vm10, %v3943_v6, %v3392_v59  ;;  %6035 = vmatprep.mubr.msk.f32.mxu1 %vm4055_vm11, %v4007_v31  ;;  %v9182_v31 = vld [vmem:[#allocation8_spill] sm:$0xff] }
 0x40c   :  { %2395 = vrot.lane.b32.xlu0 %v1390_v54, %s6368_s2  ;;  %6036 = vmatmul.mubr.msk.f32.gmra.mrb[60].mxu1 %vm4055_vm11, %v4008_v55  ;;  %v2626_v32 = vpop.permute.xlu1 %2625  ;;  %v9180_v54 = vld [vmem:[#allocation7_spill] sm:$0xff] }
 0x40d   :  { %v3814_v3 = vsel %vm3783_vm7, %v3749_v50, %v2626_v32  ;;  %v3557_v52 = vsel %vm755_vm0, %v932_v34, %v9180_v54  ;;  %v9183_v32 = vld [vmem:[#allocation9_spill] sm:$0xff] }
 0x40e   :  { %v2882_v60 = vpop.permute.xlu0 %2881  ;;  %3413 = vrot.lane.b32.xlu1 %v1453_v49, %s6372_s12  ;;  %v3622_v59 = vsel %vm3589_vm5, %v3557_v52, %v9182_v31 }
 0x40f   :  { %v3879_v48 = vsel %vm3848_vm8, %v3814_v3, %v2882_v60  ;;  %v3623_v60 = vsel %vm3589_vm5, %v3558_v58, %v9183_v32  ;;  %v1332_v32 = vld [vmem:[#allocation2 + $0x44f] sm:$0xff] }
 0x410   :  { %3415 = vrot.lane.b32.xlu0 %v1454_v53, %s6372_s12  ;;  %v2628_v42 = vpop.permute.xlu1 %2627 }
 0x411   :  { %v3815_v41 = vsel %vm3783_vm7, %v3750_v4, %v2628_v42 }
 0x412   :  { %v3138_v23 = vpop.permute.xlu0 %3137  ;;  %2649 = vrot.lane.b32.xlu1 %v1453_v49, %s6369_s8  ;;  %v9184_v49 = vld [vmem:[#allocation121_spill] sm:$0xff] }
 0x413   :  { %v3944_v51 = vsel %vm3913_vm9, %v3879_v48, %v3138_v23  ;;  %v1393_v23 = vld [vmem:[#allocation2 + $0x420] sm:$0xff] }
 0x414   :  { %2905 = vrot.lane.b32.xlu0 %v1327_v26, %s6370_s11  ;;  %v2884_v61 = vpop.permute.xlu1 %2883  ;;  %v9185_v26 = vld [vmem:[#allocation124_spill] sm:$0xff] }
 0x415   :  { %v3880_v17 = vsel %vm3848_vm8, %v3815_v41, %v2884_v61  ;;  %v3688_v43 = vsel %vm3654_vm6, %v3623_v60, %v9185_v26  ;;  %v1458_v41 = vld [vmem:[#allocation2 + $0x429] sm:$0xff] }
 0x416   :  { %v3140_v8 = vpop.permute.xlu0 %3139  ;;  %2651 = vrot.lane.b32.xlu1 %v1454_v53, %s6369_s8  ;;  %v3687_v53 = vsel %vm3654_vm6, %v3622_v59, %v9184_v49 }
 0x417   :  { %v6007_v11 = vpop.f32.mrb[40].mxu1  ;;  %v3945_v19 = vsel %vm3913_vm9, %v3880_v17, %v3140_v8  ;;  %v1331_v17 = vld [vmem:[#allocation2 + $0x447] sm:$0xff] }
 0x418   :  { %v4364_v57 = vadd.f32 %v6007_v11, %v7866_v39  ;;  %3161 = vrot.lane.b32.xlu0 %v1391_v15, %s6371_s3  ;;  %v4358_v25 = vpop.f32.mrb[41].mxu1  ;;  %v2374_v16 = vpop.permute.xlu1 %2373 }
 0x419   :  { %v4359_v7 = vadd.f32 %v7866_v39, %v4358_v25  ;;  %v3751_v47 = vsel %vm113_vm2, %v3687_v53, %v2374_v16  ;;  %v1457_v16 = vld [vmem:[#allocation2 + $0x421] sm:$0xff]  ;;  %v1396_v53 = vld [vmem:[#allocation2 + $0x450] sm:$0xff] }
 0x41a   :  { %v2376_v63 = vpop.permute.xlu0 %2375  ;;  %2907 = vrot.lane.b32.xlu1 %v1328_v37, %s6370_s11  ;;  %v4646_v38 = vmax.f32 %v4364_v57, 0.0 }
 0x41b   :  { %v4645_v10 = vmax.f32 %v4359_v7, 0.0  ;;  %v3752_v20 = vsel %vm113_vm2, %v3688_v43, %v2376_v63 }
 0x41c   :  { %3163 = vrot.lane.b32.xlu0 %v1392_v46, %s6371_s3  ;;  %v3394_v40 = vpop.permute.xlu1 %3393 }
 0x41d   :  { %6103 = vmatprep.mubr.msk.f32.mxu0 %vm755_vm0, %v4645_v10  ;;  %v4009_v29 = vsel %vm3978_vm10, %v3944_v51, %v3394_v40  ;;  %v934_v10 = vld [vmem:[#allocation2 + $0x307] sm:$0xff] }
 0x41e   :  { %v3396_v5 = vpop.permute.xlu0 %3395  ;;  %6104 = vmatmul.mubr.msk.f32.gmra.mrb[40].mxu0 %vm755_vm0, %v4646_v38  ;;  %2397 = vrot.lane.b32.xlu1 %v1391_v15, %s6368_s2  ;;  %v935_v38 = vld [vmem:[#allocation2 + $0x30f] sm:$0xff] }
 0x41f   :  { %v4010_v44 = vsel %vm3978_vm10, %v3945_v19, %v3396_v5  ;;  %6038 = vmatprep.mubr.msk.f32.mxu1 %vm4055_vm11, %v4009_v29  ;;  %v9187_v40 = vld [vmem:[#allocation11_spill] sm:$0xff]  ;;  %v9188_v29 = vld [vmem:[#allocation12_spill] sm:$0xff] }
 0x420   :  { %2399 = vrot.lane.b32.xlu0 %v1392_v46, %s6368_s2  ;;  %6039 = vmatmul.mubr.msk.f32.gmra.mrb[62].mxu1 %vm4055_vm11, %v4010_v44  ;;  %v2630_v27 = vpop.permute.xlu1 %2629  ;;  %v9186_v46 = vld [vmem:[#allocation10_spill] sm:$0xff]  ;;  %v3560_v19 = vsel %vm755_vm0, %v935_v38, %v9187_v40 }
 0x421   :  { %v3816_v24 = vsel %vm3783_vm7, %v3751_v47, %v2630_v27  ;;  %v3559_v48 = vsel %vm755_vm0, %v934_v10, %v9186_v46  ;;  %v9189_v27 = vld [vmem:[#allocation13_spill] sm:$0xff] }
 0x422   :  { %v2886_v33 = vpop.permute.xlu0 %2885  ;;  %3417 = vrot.lane.b32.xlu1 %v1455_v35, %s6372_s12  ;;  %v3624_v5 = vsel %vm3589_vm5, %v3559_v48, %v9188_v29 }
 0x423   :  { %v3881_v11 = vsel %vm3848_vm8, %v3816_v24, %v2886_v33  ;;  %v3625_v33 = vsel %vm3589_vm5, %v3560_v19, %v9189_v27  ;;  %v1334_v27 = vld [vmem:[#allocation2 + $0x477] sm:$0xff] }
 0x424   :  { %3419 = vrot.lane.b32.xlu0 %v1456_v2, %s6372_s12  ;;  %v2632_v22 = vpop.permute.xlu1 %2631 }
 0x425   :  { %v3817_v56 = vsel %vm3783_vm7, %v3752_v20, %v2632_v22  ;;  %v9191_v22 = vld [vmem:[#allocation126_spill] sm:$0xff] }
 0x426   :  { %v3142_v30 = vpop.permute.xlu0 %3141  ;;  %2653 = vrot.lane.b32.xlu1 %v1455_v35, %s6369_s8  ;;  %v9190_v35 = vld [vmem:[#allocation123_spill] sm:$0xff] }
 0x427   :  { %v3946_v36 = vsel %vm3913_vm9, %v3881_v11, %v3142_v30  ;;  %v3690_v30 = vsel %vm3654_vm6, %v3625_v33, %v9191_v22 }
 0x428   :  { %2909 = vrot.lane.b32.xlu0 %v1329_v13, %s6370_s11  ;;  %v2888_v6 = vpop.permute.xlu1 %2887 }
 0x429   :  { %v3882_v28 = vsel %vm3848_vm8, %v3817_v56, %v2888_v6  ;;  %v1460_v56 = vld [vmem:[#allocation2 + $0x451] sm:$0xff] }
 0x42a   :  { %v3144_v55 = vpop.permute.xlu0 %3143  ;;  %2655 = vrot.lane.b32.xlu1 %v1456_v2, %s6369_s8  ;;  %v3689_v2 = vsel %vm3654_vm6, %v3624_v5, %v9190_v35 }
 0x42b   :  { %v6010_v42 = vpop.f32.mrb[42].mxu1  ;;  %v3947_v50 = vsel %vm3913_vm9, %v3882_v28, %v3144_v55  ;;  %v1333_v28 = vld [vmem:[#allocation2 + $0x46f] sm:$0xff] }
 0x42c   :  { %v4374_v21 = vadd.f32 %v6010_v42, %v7866_v39  ;;  %3165 = vrot.lane.b32.xlu0 %v1393_v23, %s6371_s3  ;;  %v4368_v61 = vpop.f32.mrb[43].mxu1  ;;  %v2378_v12 = vpop.permute.xlu1 %2377 }
 0x42d   :  { %v4369_v0 = vadd.f32 %v7866_v39, %v4368_v61  ;;  %v3753_v54 = vsel %vm113_vm2, %v3689_v2, %v2378_v12  ;;  %v1459_v12 = vld [vmem:[#allocation2 + $0x449] sm:$0xff]  ;;  %v1398_v2 = vld [vmem:[#allocation2 + $0x478] sm:$0xff] }
 0x42e   :  { %v2380_v8 = vpop.permute.xlu0 %2379  ;;  %2911 = vrot.lane.b32.xlu1 %v1330_v18, %s6370_s11  ;;  %v4648_v15 = vmax.f32 %v4374_v21, 0.0 }
 0x42f   :  { %v4647_v62 = vmax.f32 %v4369_v0, 0.0  ;;  %v3754_v14 = vsel %vm113_vm2, %v3690_v30, %v2380_v8 }
 0x430   :  { %3167 = vrot.lane.b32.xlu0 %v1394_v9, %s6371_s3  ;;  %v3398_v1 = vpop.permute.xlu1 %3397 }
 0x431   :  { %6106 = vmatprep.mubr.msk.f32.mxu0 %vm755_vm0, %v4647_v62  ;;  %v4011_v57 = vsel %vm3978_vm10, %v3946_v36, %v3398_v1  ;;  %v6243_v62 = vld [vmem:[#allocation2 + $0x32f] sm:$0xff]  ;;  %v6244_v36 = vld [vmem:[#allocation2 + $0x337] sm:$0xff] }
 0x432   :  { %v3400_v25 = vpop.permute.xlu0 %3399  ;;  %6107 = vmatmul.mubr.msk.f32.gmra.mrb[42].mxu0 %vm755_vm0, %v4648_v15  ;;  %2401 = vrot.lane.b32.xlu1 %v1393_v23, %s6368_s2  ;;  %v9193_v1 = vld [vmem:[#allocation15_spill] sm:$0xff] }
 0x433   :  { %v4012_v4 = vsel %vm3978_vm10, %v3947_v50, %v3400_v25  ;;  %6041 = vmatprep.mubr.msk.f32.mxu1 %vm4055_vm11, %v4011_v57  ;;  %v3562_v50 = vsel %vm755_vm0, %v6244_v36, %v9193_v1  ;;  %v9194_v57 = vld [vmem:[#allocation16_spill] sm:$0xff] }
 0x434   :  { %2403 = vrot.lane.b32.xlu0 %v1394_v9, %s6368_s2  ;;  %6042 = vmatmul.mubr.msk.f32.gmra.mrb[64].mxu1 %vm4055_vm11, %v4012_v4  ;;  %v2634_v3 = vpop.permute.xlu1 %2633  ;;  %v9192_v9 = vld [vmem:[#allocation14_spill] sm:$0xff] }
 0x435   :  { %v3818_v58 = vsel %vm3783_vm7, %v3753_v54, %v2634_v3  ;;  %v3561_v11 = vsel %vm755_vm0, %v6243_v62, %v9192_v9  ;;  %v9195_v3 = vld [vmem:[#allocation17_spill] sm:$0xff] }
 0x436   :  { %v2890_v7 = vpop.permute.xlu0 %2889  ;;  %3421 = vrot.lane.b32.xlu1 %v1457_v16, %s6372_s12  ;;  %v3626_v25 = vsel %vm3589_vm5, %v3561_v11, %v9194_v57 }
 0x437   :  { %v3883_v42 = vsel %vm3848_vm8, %v3818_v58, %v2890_v7  ;;  %v3627_v7 = vsel %vm3589_vm5, %v3562_v50, %v9195_v3  ;;  %v1336_v3 = vld [vmem:[#allocation2 + $0x49f] sm:$0xff] }
 0x438   :  { %3423 = vrot.lane.b32.xlu0 %v1458_v41, %s6372_s12  ;;  %v2636_v63 = vpop.permute.xlu1 %2635 }
 0x439   :  { %v3819_v59 = vsel %vm3783_vm7, %v3754_v14, %v2636_v63 }
 0x43a   :  { %v3146_v37 = vpop.permute.xlu0 %3145  ;;  %2657 = vrot.lane.b32.xlu1 %v1457_v16, %s6369_s8  ;;  %v9196_v16 = vld [vmem:[#allocation125_spill] sm:$0xff] }
 0x43b   :  { %v3948_v26 = vsel %vm3913_vm9, %v3883_v42, %v3146_v37  ;;  %v1397_v37 = vld [vmem:[#allocation2 + $0x470] sm:$0xff] }
 0x43c   :  { %2913 = vrot.lane.b32.xlu0 %v1331_v17, %s6370_s11  ;;  %v2892_v51 = vpop.permute.xlu1 %2891  ;;  %v9197_v17 = vld [vmem:[#allocation128_spill] sm:$0xff] }
 0x43d   :  { %v3884_v60 = vsel %vm3848_vm8, %v3819_v59, %v2892_v51  ;;  %v3692_v10 = vsel %vm3654_vm6, %v3627_v7, %v9197_v17  ;;  %v1462_v59 = vld [vmem:[#allocation2 + $0x479] sm:$0xff] }
 0x43e   :  { %v3148_v44 = vpop.permute.xlu0 %3147  ;;  %2659 = vrot.lane.b32.xlu1 %v1458_v41, %s6369_s8  ;;  %v3691_v41 = vsel %vm3654_vm6, %v3626_v25, %v9196_v16 }
 0x43f   :  { %v6013_v34 = vpop.f32.mrb[44].mxu1  ;;  %v3949_v47 = vsel %vm3913_vm9, %v3884_v60, %v3148_v44  ;;  %v1335_v60 = vld [vmem:[#allocation2 + $0x497] sm:$0xff] }
 0x440   :  { %v4384_v52 = vadd.f32 %v6013_v34, %v7866_v39  ;;  %3169 = vrot.lane.b32.xlu0 %v1395_v45, %s6371_s3  ;;  %v4378_v13 = vpop.f32.mrb[45].mxu1  ;;  %v2382_v31 = vpop.permute.xlu1 %2381 }
 0x441   :  { %v4379_v6 = vadd.f32 %v7866_v39, %v4378_v13  ;;  %v3755_v46 = vsel %vm113_vm2, %v3691_v41, %v2382_v31  ;;  %v1461_v31 = vld [vmem:[#allocation2 + $0x471] sm:$0xff]  ;;  %v1400_v41 = vld [vmem:[#allocation2 + $0x4a0] sm:$0xff] }
 0x442   :  { %v2384_v55 = vpop.permute.xlu0 %2383  ;;  %2915 = vrot.lane.b32.xlu1 %v1332_v32, %s6370_s11  ;;  %v4650_v23 = vmax.f32 %v4384_v52, 0.0 }
 0x443   :  { %v4649_v49 = vmax.f32 %v4379_v6, 0.0  ;;  %v3756_v51 = vsel %vm113_vm2, %v3692_v10, %v2384_v55 }
 0x444   :  { %3171 = vrot.lane.b32.xlu0 %v1396_v53, %s6371_s3  ;;  %v3402_v43 = vpop.permute.xlu1 %3401 }
 0x445   :  { %6109 = vmatprep.mubr.msk.f32.mxu0 %vm755_vm0, %v4649_v49  ;;  %v4013_v21 = vsel %vm3978_vm10, %v3948_v26, %v3402_v43  ;;  %v6245_v49 = vld [vmem:[#allocation2 + $0x357] sm:$0xff]  ;;  %v6246_v26 = vld [vmem:[#allocation2 + $0x35f] sm:$0xff]  ;;  %v9199_v43 = vld [vmem:[#allocation19_spill] sm:$0xff] }
 0x446   :  { %v3404_v61 = vpop.permute.xlu0 %3403  ;;  %6110 = vmatmul.mubr.msk.f32.gmra.mrb[44].mxu0 %vm755_vm0, %v4650_v23  ;;  %2405 = vrot.lane.b32.xlu1 %v1395_v45, %s6368_s2 }
 0x447   :  { %v4014_v20 = vsel %vm3978_vm10, %v3949_v47, %v3404_v61  ;;  %6044 = vmatprep.mubr.msk.f32.mxu1 %vm4055_vm11, %v4013_v21  ;;  %v3564_v47 = vsel %vm755_vm0, %v6246_v26, %v9199_v43  ;;  %v9200_v21 = vld [vmem:[#allocation20_spill] sm:$0xff] }
 0x448   :  { %2407 = vrot.lane.b32.xlu0 %v1396_v53, %s6368_s2  ;;  %6045 = vmatmul.mubr.msk.f32.gmra.mrb[66].mxu1 %vm4055_vm11, %v4014_v20  ;;  %v2638_v24 = vpop.permute.xlu1 %2637  ;;  %v9198_v53 = vld [vmem:[#allocation18_spill] sm:$0xff] }
 0x449   :  { %v3820_v40 = vsel %vm3783_vm7, %v3755_v46, %v2638_v24  ;;  %v3563_v42 = vsel %vm755_vm0, %v6245_v49, %v9198_v53  ;;  %v9201_v24 = vld [vmem:[#allocation21_spill] sm:$0xff] }
 0x44a   :  { %v2894_v0 = vpop.permute.xlu0 %2893  ;;  %3425 = vrot.lane.b32.xlu1 %v1459_v12, %s6372_s12  ;;  %v3628_v61 = vsel %vm3589_vm5, %v3563_v42, %v9200_v21 }
 0x44b   :  { %v3885_v34 = vsel %vm3848_vm8, %v3820_v40, %v2894_v0  ;;  %v3629_v0 = vsel %vm3589_vm5, %v3564_v47, %v9201_v24  ;;  %v1338_v24 = vld [vmem:[#allocation2 + $0x4c7] sm:$0xff] }
 0x44c   :  { %3427 = vrot.lane.b32.xlu0 %v1460_v56, %s6372_s12  ;;  %v2640_v8 = vpop.permute.xlu1 %2639 }
 0x44d   :  { %v3821_v5 = vsel %vm3783_vm7, %v3756_v51, %v2640_v8 }
 0x44e   :  { %v3150_v18 = vpop.permute.xlu0 %3149  ;;  %2661 = vrot.lane.b32.xlu1 %v1459_v12, %s6369_s8  ;;  %v9202_v12 = vld [vmem:[#allocation127_spill] sm:$0xff] }
 0x44f   :  { %v3950_v22 = vsel %vm3913_vm9, %v3885_v34, %v3150_v18  ;;  %v1399_v18 = vld [vmem:[#allocation2 + $0x498] sm:$0xff] }
 0x450   :  { %2917 = vrot.lane.b32.xlu0 %v1333_v28, %s6370_s11  ;;  %v2896_v15 = vpop.permute.xlu1 %2895  ;;  %v9203_v28 = vld [vmem:[#allocation130_spill] sm:$0xff] }
 0x451   :  { %v3886_v33 = vsel %vm3848_vm8, %v3821_v5, %v2896_v15  ;;  %v3694_v62 = vsel %vm3654_vm6, %v3629_v0, %v9203_v28  ;;  %v1464_v5 = vld [vmem:[#allocation2 + $0x4a1] sm:$0xff] }
 0x452   :  { %v3152_v4 = vpop.permute.xlu0 %3151  ;;  %2663 = vrot.lane.b32.xlu1 %v1460_v56, %s6369_s8  ;;  %v3693_v56 = vsel %vm3654_vm6, %v3628_v61, %v9202_v12 }
 0x453   :  { %v6016_v63 = vpop.f32.mrb[46].mxu1  ;;  %v3951_v54 = vsel %vm3913_vm9, %v3886_v33, %v3152_v4  ;;  %v1337_v33 = vld [vmem:[#allocation2 + $0x4bf] sm:$0xff] }
 0x454   :  { %v4394_v48 = vadd.f32 %v6016_v63, %v7866_v39  ;;  %3173 = vrot.lane.b32.xlu0 %v1397_v37, %s6371_s3  ;;  %v4388_v38 = vpop.f32.mrb[47].mxu1  ;;  %v2386_v29 = vpop.permute.xlu1 %2385 }
 0x455   :  { %v4389_v19 = vadd.f32 %v7866_v39, %v4388_v38  ;;  %v3757_v9 = vsel %vm113_vm2, %v3693_v56, %v2386_v29  ;;  %v1463_v29 = vld [vmem:[#allocation2 + $0x499] sm:$0xff]  ;;  %v1402_v56 = vld [vmem:[#allocation2 + $0x4c8] sm:$0xff] }
 0x456   :  { %v2388_v44 = vpop.permute.xlu0 %2387  ;;  %2919 = vrot.lane.b32.xlu1 %v1334_v27, %s6370_s11  ;;  %v4652_v45 = vmax.f32 %v4394_v48, 0.0 }
 0x457   :  { %v4651_v35 = vmax.f32 %v4389_v19, 0.0  ;;  %v3758_v36 = vsel %vm113_vm2, %v3694_v62, %v2388_v44 }
 0x458   :  { %3175 = vrot.lane.b32.xlu0 %v1398_v2, %s6371_s3  ;;  %v3406_v30 = vpop.permute.xlu1 %3405 }
 0x459   :  { %6112 = vmatprep.mubr.msk.f32.mxu0 %vm755_vm0, %v4651_v35  ;;  %v4015_v52 = vsel %vm3978_vm10, %v3950_v22, %v3406_v30  ;;  %v6247_v35 = vld [vmem:[#allocation2 + $0x37f] sm:$0xff]  ;;  %v6248_v22 = vld [vmem:[#allocation2 + $0x387] sm:$0xff] }
 0x45a   :  { %v3408_v13 = vpop.permute.xlu0 %3407  ;;  %6113 = vmatmul.mubr.msk.f32.gmra.mrb[46].mxu0 %vm755_vm0, %v4652_v45  ;;  %2409 = vrot.lane.b32.xlu1 %v1397_v37, %s6368_s2  ;;  %v9205_v30 = vld [vmem:[#allocation23_spill] sm:$0xff] }
 0x45b   :  { %v4016_v14 = vsel %vm3978_vm10, %v3951_v54, %v3408_v13  ;;  %6047 = vmatprep.mubr.msk.f32.mxu1 %vm4055_vm11, %v4015_v52  ;;  %v3566_v54 = vsel %vm755_vm0, %v6248_v22, %v9205_v30  ;;  %v9206_v52 = vld [vmem:[#allocation24_spill] sm:$0xff] }
 0x45c   :  { %2411 = vrot.lane.b32.xlu0 %v1398_v2, %s6368_s2  ;;  %6048 = vmatmul.mubr.msk.f32.gmra.mrb[68].mxu1 %vm4055_vm11, %v4016_v14  ;;  %v2642_v58 = vpop.permute.xlu1 %2641  ;;  %v9204_v2 = vld [vmem:[#allocation22_spill] sm:$0xff] }
 0x45d   :  { %v3822_v1 = vsel %vm3783_vm7, %v3757_v9, %v2642_v58  ;;  %v3565_v34 = vsel %vm755_vm0, %v6247_v35, %v9204_v2  ;;  %v9207_v58 = vld [vmem:[#allocation25_spill] sm:$0xff]  ;;  %v8242_v2 = vld [vmem:[%s8976_s4] ss:$0 sm:$0xff] }
 0x45e   :  { %v2898_v6 = vpop.permute.xlu0 %2897  ;;  %3429 = vrot.lane.b32.xlu1 %v1461_v31, %s6372_s12  ;;  %v3630_v13 = vsel %vm3589_vm5, %v3565_v34, %v9206_v52 }
 0x45f   :  { %v3887_v63 = vsel %vm3848_vm8, %v3822_v1, %v2898_v6  ;;  %v3631_v6 = vsel %vm3589_vm5, %v3566_v54, %v9207_v58  ;;  %v1340_v58 = vld [vmem:[#allocation2 + $0x4ef] sm:$0xff] }
 0x460   :  { %3431 = vrot.lane.b32.xlu0 %v1462_v59, %s6372_s12  ;;  %v2644_v55 = vpop.permute.xlu1 %2643 }
 0x461   :  { %v3823_v25 = vsel %vm3783_vm7, %v3758_v36, %v2644_v55 }
 0x462   :  { %v3154_v32 = vpop.permute.xlu0 %3153  ;;  %2665 = vrot.lane.b32.xlu1 %v1461_v31, %s6369_s8  ;;  %v9208_v31 = vld [vmem:[#allocation129_spill] sm:$0xff] }
 0x463   :  { %v3952_v17 = vsel %vm3913_vm9, %v3887_v63, %v3154_v32  ;;  %v1401_v32 = vld [vmem:[#allocation2 + $0x4c0] sm:$0xff] }
 0x464   :  { %2921 = vrot.lane.b32.xlu0 %v1335_v60, %s6370_s11  ;;  %v2900_v23 = vpop.permute.xlu1 %2899  ;;  %v9209_v60 = vld [vmem:[#allocation132_spill] sm:$0xff] }
 0x465   :  { %v3888_v7 = vsel %vm3848_vm8, %v3823_v25, %v2900_v23  ;;  %v3696_v49 = vsel %vm3654_vm6, %v3631_v6, %v9209_v60 }
 0x466   :  { %v3156_v20 = vpop.permute.xlu0 %3155  ;;  %2667 = vrot.lane.b32.xlu1 %v1462_v59, %s6369_s8  ;;  %v3695_v59 = vsel %vm3654_vm6, %v3630_v13, %v9208_v31 }
 0x467   :  { %v6019_v8 = vpop.f32.mrb[48].mxu1  ;;  %v3953_v46 = vsel %vm3913_vm9, %v3888_v7, %v3156_v20  ;;  %v6249_v7 = vld [vmem:[#allocation2 + $0x3a7] sm:$0xff] }
 0x468   :  { %v4404_v11 = vadd.f32 %v6019_v8, %v7866_v39  ;;  %3177 = vrot.lane.b32.xlu0 %v1399_v18, %s6371_s3  ;;  %v4398_v15 = vpop.f32.mrb[49].mxu1  ;;  %v2390_v57 = vpop.permute.xlu1 %2389 }
 0x469   :  { %v4399_v50 = vadd.f32 %v7866_v39, %v4398_v15  ;;  %v3759_v53 = vsel %vm113_vm2, %v3695_v59, %v2390_v57  ;;  %v1466_v57 = vld [vmem:[#allocation2 + $0x4c9] sm:$0xff] }
 0x46a   :  { %v2392_v4 = vpop.permute.xlu0 %2391  ;;  %2923 = vrot.lane.b32.xlu1 %v1336_v3, %s6370_s11  ;;  %v4654_v37 = vmax.f32 %v4404_v11, 0.0  ;;  %v1339_v3 = vld [vmem:[#allocation2 + $0x4e7] sm:$0xff]  ;;  %v1404_v59 = vld [vmem:[#allocation2 + $0x4f0] sm:$0xff] }
 0x46b   :  { %v4653_v16 = vmax.f32 %v4399_v50, 0.0  ;;  %v3760_v26 = vsel %vm113_vm2, %v3696_v49, %v2392_v4  ;;  %v1465_v50 = vld [vmem:[#allocation2 + $0x4c1] sm:$0xff] }
 0x46c   :  { %3179 = vrot.lane.b32.xlu0 %v1400_v41, %s6371_s3  ;;  %v3410_v10 = vpop.permute.xlu1 %3409 }
 0x46d   :  { %6115 = vmatprep.mubr.msk.f32.mxu0 %vm755_vm0, %v4653_v16  ;;  %v4017_v48 = vsel %vm3978_vm10, %v3952_v17, %v3410_v10  ;;  %v9210_v16 = vld [vmem:[#allocation26_spill] sm:$0xff]  ;;  %v9211_v17 = vld [vmem:[#allocation27_spill] sm:$0xff] }
 0x46e   :  { %v3412_v38 = vpop.permute.xlu0 %3411  ;;  %6116 = vmatmul.mubr.msk.f32.gmra.mrb[48].mxu0 %vm755_vm0, %v4654_v37  ;;  %2413 = vrot.lane.b32.xlu1 %v1399_v18, %s6368_s2  ;;  %v6250_v37 = vld [vmem:[#allocation2 + $0x3af] sm:$0xff] }
 0x46f   :  { %v4018_v51 = vsel %vm3978_vm10, %v3953_v46, %v3412_v38  ;;  %6050 = vmatprep.mubr.msk.f32.mxu1 %vm4055_vm11, %v4017_v48  ;;  %v3568_v10 = vsel %vm755_vm0, %v6250_v37, %v9211_v17  ;;  %v9212_v46 = vld [vmem:[#allocation28_spill] sm:$0xff] }
 0x470   :  { %2415 = vrot.lane.b32.xlu0 %v1400_v41, %s6368_s2  ;;  %6051 = vmatmul.mubr.msk.f32.gmra.mrb[70].mxu1 %vm4055_vm11, %v4018_v51  ;;  %v2646_v40 = vpop.permute.xlu1 %2645  ;;  %v3567_v41 = vsel %vm755_vm0, %v6249_v7, %v9210_v16  ;;  %v9213_v51 = vld [vmem:[#allocation29_spill] sm:$0xff] }
 0x471   :  { %v3824_v43 = vsel %vm3783_vm7, %v3759_v53, %v2646_v40  ;;  %v3632_v48 = vsel %vm3589_vm5, %v3567_v41, %v9212_v46  ;;  %v3633_v40 = vsel %vm3589_vm5, %v3568_v10, %v9213_v51  ;;  %v1342_v51 = vld [vmem:[#allocation2 + $0x517] sm:$0xff] }
 0x472   :  { %v2902_v19 = vpop.permute.xlu0 %2901  ;;  %3433 = vrot.lane.b32.xlu1 %v1463_v29, %s6372_s12 }
 0x473   :  { %v3889_v8 = vsel %vm3848_vm8, %v3824_v43, %v2902_v19  ;;  %v9214_v19 = vld [vmem:[#allocation131_spill] sm:$0xff] }
 0x474   :  { %3435 = vrot.lane.b32.xlu0 %v1464_v5, %s6372_s12  ;;  %v2648_v44 = vpop.permute.xlu1 %2647 }
 0x475   :  { %v3825_v61 = vsel %vm3783_vm7, %v3760_v26, %v2648_v44  ;;  %v1403_v44 = vld [vmem:[#allocation2 + $0x4e8] sm:$0xff] }
 0x476   :  { %v3158_v27 = vpop.permute.xlu0 %3157  ;;  %2669 = vrot.lane.b32.xlu1 %v1463_v29, %s6369_s8  ;;  %v3697_v29 = vsel %vm3654_vm6, %v3632_v48, %v9214_v19 }
 0x477   :  { %v3954_v28 = vsel %vm3913_vm9, %v3889_v8, %v3158_v27  ;;  %v9215_v27 = vld [vmem:[#allocation134_spill] sm:$0xff] }
 0x478   :  { %2925 = vrot.lane.b32.xlu0 %v1337_v33, %s6370_s11  ;;  %v2904_v45 = vpop.permute.xlu1 %2903  ;;  %v3698_v33 = vsel %vm3654_vm6, %v3633_v40, %v9215_v27 }
 0x479   :  { %v3890_v0 = vsel %vm3848_vm8, %v3825_v61, %v2904_v45  ;;  %v1468_v61 = vld [vmem:[#allocation2 + $0x4f1] sm:$0xff] }
 0x47a   :  { %v3160_v14 = vpop.permute.xlu0 %3159  ;;  %2671 = vrot.lane.b32.xlu1 %v1464_v5, %s6369_s8 }
 0x47b   :  { %v6022_v55 = vpop.f32.mrb[50].mxu1 }
 0x47c   :  { %v4414_v42 = vadd.f32 %v6022_v55, %v7866_v39  ;;  %3181 = vrot.lane.b32.xlu0 %v1401_v32, %s6371_s3  ;;  %v4408_v23 = vpop.f32.mrb[51].mxu1  ;;  %v2394_v21 = vpop.permute.xlu1 %2393 }
 0x47d   :  { %v4409_v47 = vadd.f32 %v7866_v39, %v4408_v23  ;;  %v3955_v39 = vsel %vm3913_vm9, %v3890_v0, %v3160_v14  ;;  %v3761_v35 = vsel %vm113_vm2, %v3697_v29, %v2394_v21  ;;  %v1467_v21 = vld [vmem:[#allocation2 + $0x4e9] sm:$0xff]  ;;  %v1406_v29 = vld [vmem:[#allocation2 + $0x518] sm:$0xff] }
 0x47e   :  { %v2396_v20 = vpop.permute.xlu0 %2395  ;;  %2927 = vrot.lane.b32.xlu1 %v1338_v24, %s6370_s11  ;;  %v4656_v18 = vmax.f32 %v4414_v42, 0.0  ;;  %v1341_v0 = vld [vmem:[#allocation2 + $0x50f] sm:$0xff] }
 0x47f   :  { %v4655_v12 = vmax.f32 %v4409_v47, 0.0  ;;  %v3762_v22 = vsel %vm113_vm2, %v3698_v33, %v2396_v20 }
 0x480   :  { %3183 = vrot.lane.b32.xlu0 %v1402_v56, %s6371_s3  ;;  %v3414_v62 = vpop.permute.xlu1 %3413 }
 0x481   :  { %6118 = vmatprep.mubr.msk.f32.mxu0 %vm755_vm0, %v4655_v12  ;;  %v4019_v9 = vsel %vm3978_vm10, %v3954_v28, %v3414_v62  ;;  %v6252_v12 = vld [vmem:[#allocation2 + $0x3cf] sm:$0xff]  ;;  %v6253_v28 = vld [vmem:[#allocation2 + $0x3d7] sm:$0xff] }
 0x482   :  { %v3416_v11 = vpop.permute.xlu0 %3415  ;;  %6119 = vmatmul.mubr.msk.f32.gmra.mrb[50].mxu0 %vm755_vm0, %v4656_v18  ;;  %2417 = vrot.lane.b32.xlu1 %v1401_v32, %s6368_s2  ;;  %v9217_v62 = vld [vmem:[#allocation31_spill] sm:$0xff] }
 0x483   :  { %v4020_v15 = vsel %vm3978_vm10, %v3955_v39, %v3416_v11  ;;  %6053 = vmatprep.mubr.msk.f32.mxu1 %vm4055_vm11, %v4019_v9  ;;  %v3570_v39 = vsel %vm755_vm0, %v6253_v28, %v9217_v62  ;;  %v9218_v9 = vld [vmem:[#allocation32_spill] sm:$0xff]  ;;  %v9225_v28 = vld [vmem:[#allocation39_spill] sm:$0xff] }
 0x484   :  { %2419 = vrot.lane.b32.xlu0 %v1402_v56, %s6368_s2  ;;  %6054 = vmatmul.mubr.msk.f32.gmra.mrb[72].mxu1 %vm4055_vm11, %v4020_v15  ;;  %v2650_v36 = vpop.permute.xlu1 %2649  ;;  %v9216_v56 = vld [vmem:[#allocation30_spill] sm:$0xff] }
 0x485   :  { %v3826_v30 = vsel %vm3783_vm7, %v3761_v35, %v2650_v36  ;;  %v3569_v8 = vsel %vm755_vm0, %v6252_v12, %v9216_v56  ;;  %v9219_v36 = vld [vmem:[#allocation33_spill] sm:$0xff] }
 0x486   :  { %v2906_v1 = vpop.permute.xlu0 %2905  ;;  %3437 = vrot.lane.b32.xlu1 %v1465_v50, %s6372_s12  ;;  %v3634_v11 = vsel %vm3589_vm5, %v3569_v8, %v9218_v9  ;;  %v9224_v56 = vld [vmem:[#allocation37_spill] sm:$0xff] }
 0x487   :  { %v3891_v55 = vsel %vm3848_vm8, %v3826_v30, %v2906_v1  ;;  %v3635_v1 = vsel %vm3589_vm5, %v3570_v39, %v9219_v36  ;;  %v9226_v39 = vld [vmem:[#allocation135_spill] sm:$0xff]  ;;  %v9227_v36 = vld [vmem:[#allocation138_spill] sm:$0xff] }
 0x488   :  { %3439 = vrot.lane.b32.xlu0 %v1466_v57, %s6372_s12  ;;  %v2652_v25 = vpop.permute.xlu1 %2651 }
 0x489   :  { %v3827_v13 = vsel %vm3783_vm7, %v3762_v22, %v2652_v25 }
 0x48a   :  { %v3162_v4 = vpop.permute.xlu0 %3161  ;;  %2673 = vrot.lane.b32.xlu1 %v1465_v50, %s6369_s8  ;;  %v9220_v50 = vld [vmem:[#allocation133_spill] sm:$0xff] }
 0x48b   :  { %v3956_v60 = vsel %vm3913_vm9, %v3891_v55, %v3162_v4  ;;  %v1405_v4 = vld [vmem:[#allocation2 + $0x510] sm:$0xff] }
 0x48c   :  { %2929 = vrot.lane.b32.xlu0 %v1339_v3, %s6370_s11  ;;  %v2908_v63 = vpop.permute.xlu1 %2907  ;;  %v9221_v3 = vld [vmem:[#allocation136_spill] sm:$0xff] }
 0x48d   :  { %v3892_v6 = vsel %vm3848_vm8, %v3827_v13, %v2908_v63  ;;  %v3700_v7 = vsel %vm3654_vm6, %v3635_v1, %v9221_v3 }
 0x48e   :  { %v3164_v38 = vpop.permute.xlu0 %3163  ;;  %2675 = vrot.lane.b32.xlu1 %v1466_v57, %s6369_s8  ;;  %v3699_v57 = vsel %vm3654_vm6, %v3634_v11, %v9220_v50 }
 0x48f   :  { %v6025_v5 = vpop.f32.mrb[52].mxu1  ;;  %v3957_v53 = vsel %vm3913_vm9, %v3892_v6, %v3164_v38 }
 0x490   :  { %v4424_v34 = vadd.f32 %v8242_v2, %v6025_v5  ;;  %3185 = vrot.lane.b32.xlu0 %v1403_v44, %s6371_s3  ;;  %v4418_v45 = vpop.f32.mrb[53].mxu1  ;;  %v2398_v52 = vpop.permute.xlu1 %2397  ;;  %v8295_v5 = vld [vmem:[%s8978_s6] ss:$0 sm:$0xff] }
 0x491   :  { %v4419_v54 = vadd.f32 %v8242_v2, %v4418_v45  ;;  %v3763_v16 = vsel %vm113_vm2, %v3699_v57, %v2398_v52 }
 0x492   :  { %v2400_v14 = vpop.permute.xlu0 %2399  ;;  %2931 = vrot.lane.b32.xlu1 %v1340_v58, %s6370_s11  ;;  %v4658_v32 = vmax.f32 %v4424_v34, 0.0  ;;  %v6254_v58 = vld [vmem:[#allocation3 + $0x8] sm:$0xff] }
 0x493   :  { %v4657_v31 = vmax.f32 %v4419_v54, 0.0  ;;  %v3764_v37 = vsel %vm113_vm2, %v3700_v7, %v2400_v14 }
 0x494   :  { %3187 = vrot.lane.b32.xlu0 %v1404_v59, %s6371_s3  ;;  %v3418_v49 = vpop.permute.xlu1 %3417 }
 0x495   :  { %6121 = vmatprep.mubr.msk.f32.mxu0 %vm755_vm0, %v4657_v31  ;;  %v4021_v42 = vsel %vm3978_vm10, %v3956_v60, %v3418_v49  ;;  %v6255_v31 = vld [vmem:[#allocation3] sm:$0xff]  ;;  %v1469_v49 = vld [vmem:[#allocation2 + $0x511] sm:$0xff] }
 0x496   :  { %v3420_v23 = vpop.permute.xlu0 %3419  ;;  %6122 = vmatmul.mubr.msk.f32.gmra.mrb[52].mxu0 %vm755_vm0, %v4658_v32  ;;  %2421 = vrot.lane.b32.xlu1 %v1403_v44, %s6368_s2 }
 0x497   :  { %v4022_v26 = vsel %vm3978_vm10, %v3957_v53, %v3420_v23  ;;  %6056 = vmatprep.mubr.msk.f32.mxu1 %vm4055_vm11, %v4021_v42  ;;  %v1470_v42 = vld [vmem:[#allocation2 + $0x519] sm:$0xff] }
 0x498   :  { %2423 = vrot.lane.b32.xlu0 %v1404_v59, %s6368_s2  ;;  %6057 = vmatmul.mubr.msk.f32.gmra.mrb[74].mxu1 %vm4055_vm11, %v4022_v26  ;;  %v2654_v43 = vpop.permute.xlu1 %2653 }
 0x499   :  { %v3828_v17 = vsel %vm3783_vm7, %v3763_v16, %v2654_v43  ;;  %v1343_v43 = vld [vmem:[#allocation2 + $0x537] sm:$0xff] }
 0x49a   :  { %v2910_v47 = vpop.permute.xlu0 %2909  ;;  %3441 = vrot.lane.b32.xlu1 %v1467_v21, %s6372_s12 }
 0x49b   :  { %v3893_v44 = vsel %vm3848_vm8, %v3828_v17, %v2910_v47  ;;  %v6256_v47 = vld [vmem:[#allocation2 + $0x3f7] sm:$0xff] }
 0x49c   :  { %3443 = vrot.lane.b32.xlu0 %v1468_v61, %s6372_s12  ;;  %v2656_v20 = vpop.permute.xlu1 %2655 }
 0x49d   :  { %v3829_v48 = vsel %vm3783_vm7, %v3764_v37, %v2656_v20 }
 0x49e   :  { %v3166_v24 = vpop.permute.xlu0 %3165  ;;  %2677 = vrot.lane.b32.xlu1 %v1467_v21, %s6369_s8  ;;  %v9222_v21 = vld [vmem:[#allocation34_spill] sm:$0xff] }
 0x49f   :  { %v3958_v33 = vsel %vm3913_vm9, %v3893_v44, %v3166_v24  ;;  %v6257_v24 = vld [vmem:[#allocation2 + $0x3ff] sm:$0xff] }
 0x4a0   :  { %2933 = vrot.lane.b32.xlu0 %v1341_v0, %s6370_s11  ;;  %v2912_v18 = vpop.permute.xlu1 %2911  ;;  %v9223_v0 = vld [vmem:[#allocation36_spill] sm:$0xff]  ;;  %v6258_v44 = vld [vmem:[#allocation3 + $0x18] sm:$0xff] }
 0x4a1   :  { %v3894_v40 = vsel %vm3848_vm8, %v3829_v48, %v2912_v18  ;;  %v3572_v12 = vsel %vm755_vm0, %v6257_v24, %v9223_v0 }
 0x4a2   :  { %v3168_v15 = vpop.permute.xlu0 %3167  ;;  %2679 = vrot.lane.b32.xlu1 %v1468_v61, %s6369_s8  ;;  %v3571_v61 = vsel %vm755_vm0, %v6256_v47, %v9222_v21  ;;  %v3637_v62 = vsel %vm3589_vm5, %v3572_v12, %v9225_v28  ;;  %v9229_v47 = vld [vmem:[#allocation44_spill] sm:$0xff] }
 0x4a3   :  { %v6028_v25 = vpop.f32.mrb[54].mxu1  ;;  %v3959_v45 = vsel %vm3913_vm9, %v3894_v40, %v3168_v15  ;;  %v3636_v8 = vsel %vm3589_vm5, %v3571_v61, %v9224_v56  ;;  %v1407_v15 = vld [vmem:[#allocation2 + $0x538] sm:$0xff]  ;;  %v3702_v1 = vsel %vm3654_vm6, %v3637_v62, %v9227_v36  ;;  %v1408_v40 = vld [vmem:[#allocation2 + $0x540] sm:$0xff]  ;;  %v9231_v56 = vld [vmem:[#allocation48_spill] sm:$0xff] }
 0x4a4   :  { %v4434_v41 = vadd.f32 %v8242_v2, %v6028_v25  ;;  %3189 = vrot.lane.b32.xlu0 %v1405_v4, %s6371_s3  ;;  %v4428_v63 = vpop.f32.mrb[55].mxu1  ;;  %v2402_v46 = vpop.permute.xlu1 %2401  ;;  %v3701_v9 = vsel %vm3654_vm6, %v3636_v8, %v9226_v39  ;;  %v9230_v61 = vld [vmem:[#allocation45_spill] sm:$0xff] }
 0x4a5   :  { %v4429_v10 = vadd.f32 %v8242_v2, %v4428_v63  ;;  %v3765_v50 = vsel %vm113_vm2, %v3701_v9, %v2402_v46  ;;  %v1344_v46 = vld [vmem:[#allocation2 + $0x53f] sm:$0xff] }
 0x4a6   :  { %v8288_v38 = vpop.permute.xlu0 %2403  ;;  %2935 = vrot.lane.b32.xlu1 %v1342_v51, %s6370_s11  ;;  %v4660_v27 = vmax.f32 %v4434_v41, 0.0  ;;  %v1409_v9 = vld [vmem:[#allocation2 + $0x560] sm:$0xff] }
 0x4a7   :  { %v4659_v19 = vmax.f32 %v4429_v10, 0.0 }
 0x4a8   :  { %3191 = vrot.lane.b32.xlu0 %v1406_v29, %s6371_s3  ;;  %v3422_v34 = vpop.permute.xlu1 %3421 }
 0x4a9   :  { %v6093_v35 = vpop.f32.mrb[32].mxu0  ;;  %6124 = vmatprep.mubr.msk.f32.mxu0 %vm755_vm0, %v4659_v19  ;;  %v4023_v30 = vsel %vm3978_vm10, %v3958_v33, %v3422_v34 }
 0x4aa   :  { %v4976_v22 = vadd.f32 %v6093_v35, %v8295_v5  ;;  %v3424_v54 = vpop.permute.xlu0 %3423  ;;  %v4970_v52 = vpop.f32.mrb[33].mxu0  ;;  %6125 = vmatmul.mubr.msk.f32.gmra.mrb[54].mxu0 %vm755_vm0, %v4660_v27  ;;  %2425 = vrot.lane.b32.xlu1 %v1405_v4, %s6368_s2  ;;  %v3766_v4 = vsel %vm113_vm2, %v3702_v1, %v8288_v38  ;;  %v6259_v35 = vld [vmem:[#allocation3 + $0x10] sm:$0xff]  ;;  %v6262_v1 = vld [vmem:[#allocation3 + $0x28] sm:$0xff] }
 0x4ab   :  { %v4024_v13 = vsel %vm3978_vm10, %v3959_v45, %v3424_v54  ;;  %v4971_v14 = vadd.f32 %v8295_v5, %v4970_v52  ;;  %6059 = vmatprep.mubr.msk.f32.mxu1 %vm4055_vm11, %v4023_v30 }
 0x4ac   :  { %v5290_v6 = vadd.f32 %v6254_v58, %v4976_v22  ;;  %2427 = vrot.lane.b32.xlu0 %v1406_v29, %s6368_s2  ;;  %6060 = vmatmul.mubr.msk.f32.gmra.mrb[76].mxu1 %vm4055_vm11, %v4024_v13  ;;  %v2658_v55 = vpop.permute.xlu1 %2657 }
 0x4ad   :  { %v5289_v59 = vadd.f32 %v6255_v31, %v4971_v14  ;;  %v3830_v3 = vsel %vm3783_vm7, %v3765_v50, %v2658_v55  ;;  %v1471_v31 = vld [vmem:[#allocation2 + $0x539] sm:$0xff] }
 0x4ae   :  { %v5354_v32 = vmax.f32 %v5290_v6, 0.0  ;;  %v2914_v60 = vpop.permute.xlu0 %2913  ;;  %3445 = vrot.lane.b32.xlu1 %v1469_v49, %s6372_s12 }
 0x4af   :  { %v5353_v53 = vmax.f32 %v5289_v59, 0.0  ;;  %v3895_v19 = vsel %vm3848_vm8, %v3830_v3, %v2914_v60  ;;  %v1472_v59 = vld [vmem:[#allocation2 + $0x541] sm:$0xff] }
 0x4b0   :  { %5418 = vst.msk [vmem:[%s8979_s7 + $0x8] sm:$0xff] %vm113_vm2, %v5354_v32  ;;  %3447 = vrot.lane.b32.xlu0 %v1470_v42, %s6372_s12  ;;  %v2660_v23 = vpop.permute.xlu1 %2659  ;;  %v1345_v60 = vld [vmem:[#allocation2 + $0x55f] sm:$0xff] }
 0x4b1   :  { %5417 = vst.msk [vmem:[%s8979_s7] sm:$0xff] %vm113_vm2, %v5353_v53  ;;  %v3831_v63 = vsel %vm3783_vm7, %v3766_v4, %v2660_v23  ;;  %v9228_v53 = vld [vmem:[#allocation41_spill] sm:$0xff] }
 0x4b2   :  { %v3170_v26 = vpop.permute.xlu0 %3169  ;;  %2681 = vrot.lane.b32.xlu1 %v1469_v49, %s6369_s8  ;;  %v6260_v49 = vld [vmem:[#allocation2 + $0x41f] sm:$0xff] }
 0x4b3   :  { %v3960_v33 = vsel %vm3913_vm9, %v3895_v19, %v3170_v26  ;;  %v1410_v19 = vld [vmem:[#allocation2 + $0x568] sm:$0xff] }
 0x4b4   :  { %2937 = vrot.lane.b32.xlu0 %v1343_v43, %s6370_s11  ;;  %v2916_v20 = vpop.permute.xlu1 %2915  ;;  %v6261_v43 = vld [vmem:[#allocation2 + $0x427] sm:$0xff] }
 0x4b5   :  { %v3896_v48 = vsel %vm3848_vm8, %v3831_v63, %v2916_v20  ;;  %v3574_v21 = vsel %vm755_vm0, %v6261_v43, %v9229_v47 }
 0x4b6   :  { %v3172_v18 = vpop.permute.xlu0 %3171  ;;  %2683 = vrot.lane.b32.xlu1 %v1470_v42, %s6369_s8  ;;  %v3573_v42 = vsel %vm755_vm0, %v6260_v49, %v9228_v53  ;;  %v3639_v8 = vsel %vm3589_vm5, %v3574_v21, %v9231_v56  ;;  %v6265_v49 = vld [vmem:[#allocation2 + $0x44f] sm:$0xff]  ;;  %v9235_v53 = vld [vmem:[#allocation54_spill] sm:$0xff] }
 0x4b7   :  { %v6031_v11 = vpop.f32.mrb[56].mxu1  ;;  %v3961_v22 = vsel %vm3913_vm9, %v3896_v48, %v3172_v18  ;;  %v3638_v20 = vsel %vm3589_vm5, %v3573_v42, %v9230_v61  ;;  %v9232_v18 = vld [vmem:[#allocation137_spill] sm:$0xff]  ;;  %v1346_v48 = vld [vmem:[#allocation2 + $0x567] sm:$0xff]  ;;  %v3576_v42 = vsel %vm755_vm0, %v6265_v49, %v9235_v53  ;;  %v9243_v49 = vld [vmem:[#allocation68_spill] sm:$0xff] }
 0x4b8   :  { %v4444_v57 = vadd.f32 %v8242_v2, %v6031_v11  ;;  %3193 = vrot.lane.b32.xlu0 %v1407_v15, %s6371_s3  ;;  %v4438_v25 = vpop.f32.mrb[57].mxu1  ;;  %v8343_v16 = vpop.permute.xlu1 %2405  ;;  %v3703_v28 = vsel %vm3654_vm6, %v3638_v20, %v9232_v18  ;;  %v9233_v11 = vld [vmem:[#allocation140_spill] sm:$0xff]  ;;  %v9237_v61 = vld [vmem:[#allocation58_spill] sm:$0xff] }
 0x4b9   :  { %v4439_v7 = vadd.f32 %v8242_v2, %v4438_v25  ;;  %v6096_v41 = vpop.f32.mrb[34].mxu0  ;;  %v3767_v36 = vsel %vm113_vm2, %v3703_v28, %v8343_v16  ;;  %v3641_v20 = vsel %vm3589_vm5, %v3576_v42, %v9237_v61  ;;  %v9244_v42 = vld [vmem:[#allocation141_spill] sm:$0xff] }
 0x4ba   :  { %v4986_v37 = vadd.f32 %v6096_v41, %v8295_v5  ;;  %v8347_v17 = vpop.permute.xlu0 %2407  ;;  %v4980_v10 = vpop.f32.mrb[35].mxu0  ;;  %2939 = vrot.lane.b32.xlu1 %v1344_v46, %s6370_s11  ;;  %v4662_v29 = vmax.f32 %v4444_v57, 0.0 }
 0x4bb   :  { %v4661_v51 = vmax.f32 %v4439_v7, 0.0  ;;  %v4981_v38 = vadd.f32 %v8295_v5, %v4980_v10  ;;  %v6263_v7 = vld [vmem:[#allocation3 + $0x20] sm:$0xff] }
 0x4bc   :  { %v5292_v27 = vadd.f32 %v6258_v44, %v4986_v37  ;;  %3195 = vrot.lane.b32.xlu0 %v1408_v40, %s6371_s3  ;;  %v3426_v45 = vpop.permute.xlu1 %3425 }
 0x4bd   :  { %v5291_v34 = vadd.f32 %v6259_v35, %v4981_v38  ;;  %6127 = vmatprep.mubr.msk.f32.mxu0 %vm755_vm0, %v4661_v51  ;;  %v4025_v54 = vsel %vm3978_vm10, %v3960_v33, %v3426_v45 }
 0x4be   :  { %v5356_v30 = vmax.f32 %v5292_v27, 0.0  ;;  %v3428_v52 = vpop.permute.xlu0 %3427  ;;  %6128 = vmatmul.mubr.msk.f32.gmra.mrb[56].mxu0 %vm755_vm0, %v4662_v29  ;;  %2429 = vrot.lane.b32.xlu1 %v1407_v15, %s6368_s2  ;;  %v3704_v15 = vsel %vm3654_vm6, %v3639_v8, %v9233_v11  ;;  %v9239_v8 = vld [vmem:[#allocation142_spill] sm:$0xff] }
 0x4bf   :  { %v5355_v13 = vmax.f32 %v5291_v34, 0.0  ;;  %v4026_v14 = vsel %vm3978_vm10, %v3961_v22, %v3428_v52  ;;  %6062 = vmatprep.mubr.msk.f32.mxu1 %vm4055_vm11, %v4025_v54  ;;  %v3768_v4 = vsel %vm113_vm2, %v3704_v15, %v8347_v17  ;;  %v1473_v54 = vld [vmem:[#allocation2 + $0x561] sm:$0xff]  ;;  %v1474_v52 = vld [vmem:[#allocation2 + $0x569] sm:$0xff]  ;;  %v3706_v18 = vsel %vm3654_vm6, %v3641_v20, %v9239_v8 }
 0x4c0   :  { %5420 = vst.msk [vmem:[%s8979_s7 + $0x18] sm:$0xff] %vm113_vm2, %v5356_v30  ;;  %2431 = vrot.lane.b32.xlu0 %v1408_v40, %s6368_s2  ;;  %6063 = vmatmul.mubr.msk.f32.gmra.mrb[78].mxu1 %vm4055_vm11, %v4026_v14  ;;  %v2662_v58 = vpop.permute.xlu1 %2661  ;;  %v1347_v14 = vld [vmem:[#allocation2 + $0x587] sm:$0xff]  ;;  %v1348_v15 = vld [vmem:[#allocation2 + $0x58f] sm:$0xff] }
 0x4c1   :  { %5419 = vst.msk [vmem:[%s8979_s7 + $0x10] sm:$0xff] %vm113_vm2, %v5355_v13  ;;  %v3832_v3 = vsel %vm3783_vm7, %v3767_v36, %v2662_v58  ;;  %v6270_v20 = vld [vmem:[#allocation3 + $0x48] sm:$0xff] }
 0x4c2   :  { %v2918_v6 = vpop.permute.xlu0 %2917  ;;  %3449 = vrot.lane.b32.xlu1 %v1471_v31, %s6372_s12 }
 0x4c3   :  { %v3897_v17 = vsel %vm3848_vm8, %v3832_v3, %v2918_v6  ;;  %v6264_v6 = vld [vmem:[#allocation2 + $0x447] sm:$0xff] }
 0x4c4   :  { %3451 = vrot.lane.b32.xlu0 %v1472_v59, %s6372_s12  ;;  %v2664_v55 = vpop.permute.xlu1 %2663  ;;  %v1475_v3 = vld [vmem:[#allocation2 + $0x589] sm:$0xff] }
 0x4c5   :  { %v3833_v10 = vsel %vm3783_vm7, %v3768_v4, %v2664_v55 }
 0x4c6   :  { %v3174_v32 = vpop.permute.xlu0 %3173  ;;  %2685 = vrot.lane.b32.xlu1 %v1471_v31, %s6369_s8  ;;  %v9234_v31 = vld [vmem:[#allocation51_spill] sm:$0xff] }
 0x4c7   :  { %v3962_v44 = vsel %vm3913_vm9, %v3897_v17, %v3174_v32 }
 0x4c8   :  { %2941 = vrot.lane.b32.xlu0 %v1345_v60, %s6370_s11  ;;  %v2920_v23 = vpop.permute.xlu1 %2919  ;;  %v1411_v60 = vld [vmem:[#allocation2 + $0x588] sm:$0xff] }
 0x4c9   :  { %v6099_v26 = vpop.f32.mrb[36].mxu0  ;;  %v3898_v51 = vsel %vm3848_vm8, %v3833_v10, %v2920_v23  ;;  %v9236_v23 = vld [vmem:[#allocation55_spill] sm:$0xff] }
 0x4ca   :  { %v4996_v24 = vadd.f32 %v6099_v26, %v8295_v5  ;;  %v3176_v0 = vpop.permute.xlu0 %3175  ;;  %v4990_v12 = vpop.f32.mrb[37].mxu0  ;;  %2687 = vrot.lane.b32.xlu1 %v1472_v59, %s6369_s8  ;;  %v3575_v59 = vsel %vm755_vm0, %v6264_v6, %v9234_v31  ;;  %v9242_v31 = vld [vmem:[#allocation65_spill] sm:$0xff] }
 0x4cb   :  { %v4991_v62 = vadd.f32 %v8295_v5, %v4990_v12  ;;  %v6034_v39 = vpop.f32.mrb[58].mxu1  ;;  %v3963_v33 = vsel %vm3913_vm9, %v3898_v51, %v3176_v0  ;;  %v3640_v26 = vsel %vm3589_vm5, %v3575_v59, %v9236_v23  ;;  %v1412_v51 = vld [vmem:[#allocation2 + $0x590] sm:$0xff] }
 0x4cc   :  { %v5294_v50 = vadd.f32 %v6262_v1, %v4996_v24  ;;  %v4454_v57 = vadd.f32 %v8242_v2, %v6034_v39  ;;  %3197 = vrot.lane.b32.xlu0 %v1409_v9, %s6371_s3  ;;  %v4448_v25 = vpop.f32.mrb[59].mxu1  ;;  %v2410_v37 = vpop.permute.xlu1 %2409  ;;  %v9238_v24 = vld [vmem:[#allocation139_spill] sm:$0xff] }
 0x4cd   :  { %v5293_v41 = vadd.f32 %v6263_v7, %v4991_v62  ;;  %v4449_v63 = vadd.f32 %v8242_v2, %v4448_v25  ;;  %v3705_v0 = vsel %vm3654_vm6, %v3640_v26, %v9238_v24  ;;  %v6266_v62 = vld [vmem:[#allocation3 + $0x38] sm:$0xff] }
 0x4ce   :  { %v5358_v16 = vmax.f32 %v5294_v50, 0.0  ;;  %v2412_v46 = vpop.permute.xlu0 %2411  ;;  %2943 = vrot.lane.b32.xlu1 %v1346_v48, %s6370_s11  ;;  %v4664_v29 = vmax.f32 %v4454_v57, 0.0  ;;  %v3769_v28 = vsel %vm113_vm2, %v3705_v0, %v2410_v37  ;;  %v6267_v50 = vld [vmem:[#allocation3 + $0x30] sm:$0xff] }
 0x4cf   :  { %v5357_v38 = vmax.f32 %v5293_v41, 0.0  ;;  %v4663_v40 = vmax.f32 %v4449_v63, 0.0  ;;  %v3770_v36 = vsel %vm113_vm2, %v3706_v18, %v2412_v46  ;;  %v6271_v18 = vld [vmem:[#allocation3 + $0x40] sm:$0xff] }
 0x4d0   :  { %5422 = vst.msk [vmem:[%s8979_s7 + $0x28] sm:$0xff] %vm113_vm2, %v5358_v16  ;;  %3199 = vrot.lane.b32.xlu0 %v1410_v19, %s6371_s3  ;;  %v3430_v27 = vpop.permute.xlu1 %3429 }
 0x4d1   :  { %5421 = vst.msk [vmem:[%s8979_s7 + $0x20] sm:$0xff] %vm113_vm2, %v5357_v38  ;;  %6130 = vmatprep.mubr.msk.f32.mxu0 %vm755_vm0, %v4663_v40  ;;  %v4027_v35 = vsel %vm3978_vm10, %v3962_v44, %v3430_v27  ;;  %v1476_v27 = vld [vmem:[#allocation2 + $0x591] sm:$0xff] }
 0x4d2   :  { %v3432_v34 = vpop.permute.xlu0 %3431  ;;  %6131 = vmatmul.mubr.msk.f32.gmra.mrb[58].mxu0 %vm755_vm0, %v4664_v29  ;;  %2433 = vrot.lane.b32.xlu1 %v1409_v9, %s6368_s2 }
 0x4d3   :  { %v4028_v45 = vsel %vm3978_vm10, %v3963_v33, %v3432_v34  ;;  %6065 = vmatprep.mubr.msk.f32.mxu1 %vm4055_vm11, %v4027_v35 }
 0x4d4   :  { %2435 = vrot.lane.b32.xlu0 %v1410_v19, %s6368_s2  ;;  %6066 = vmatmul.mubr.msk.f32.gmra.mrb[80].mxu1 %vm4055_vm11, %v4028_v45  ;;  %v2666_v22 = vpop.permute.xlu1 %2665 }
 0x4d5   :  { %v3834_v1 = vsel %vm3783_vm7, %v3769_v28, %v2666_v22  ;;  %v6268_v22 = vld [vmem:[#allocation2 + $0x46f] sm:$0xff] }
 0x4d6   :  { %v2922_v30 = vpop.permute.xlu0 %2921  ;;  %3453 = vrot.lane.b32.xlu1 %v1473_v54, %s6372_s12 }
 0x4d7   :  { %v3899_v46 = vsel %vm3848_vm8, %v3834_v1, %v2922_v30  ;;  %v9240_v30 = vld [vmem:[#allocation61_spill] sm:$0xff] }
 0x4d8   :  { %3455 = vrot.lane.b32.xlu0 %v1474_v52, %s6372_s12  ;;  %v2668_v13 = vpop.permute.xlu1 %2667 }
 0x4d9   :  { %v3835_v7 = vsel %vm3783_vm7, %v3770_v36, %v2668_v13 }
 0x4da   :  { %v3178_v58 = vpop.permute.xlu0 %3177  ;;  %2689 = vrot.lane.b32.xlu1 %v1473_v54, %s6369_s8  ;;  %v3577_v54 = vsel %vm755_vm0, %v6268_v22, %v9240_v30  ;;  %v9249_v30 = vld [vmem:[#allocation78_spill] sm:$0xff] }
 0x4db   :  { %v3964_v38 = vsel %vm3913_vm9, %v3899_v46, %v3178_v58  ;;  %v9241_v58 = vld [vmem:[#allocation64_spill] sm:$0xff]  ;;  %v3642_v59 = vsel %vm3589_vm5, %v3577_v54, %v9242_v31 }
 0x4dc   :  { %2945 = vrot.lane.b32.xlu0 %v1347_v14, %s6370_s11  ;;  %v2924_v55 = vpop.permute.xlu1 %2923  ;;  %v6269_v14 = vld [vmem:[#allocation2 + $0x477] sm:$0xff]  ;;  %v3707_v23 = vsel %vm3654_vm6, %v3642_v59, %v9244_v42 }
 0x4dd   :  { %v6102_v32 = vpop.f32.mrb[38].mxu0  ;;  %v3900_v37 = vsel %vm3848_vm8, %v3835_v7, %v2924_v55  ;;  %v3578_v6 = vsel %vm755_vm0, %v6269_v14, %v9241_v58 }
 0x4de   :  { %v5006_v43 = vadd.f32 %v6102_v32, %v8295_v5  ;;  %v3180_v47 = vpop.permute.xlu0 %3179  ;;  %v5000_v21 = vpop.f32.mrb[39].mxu0  ;;  %2691 = vrot.lane.b32.xlu1 %v1474_v52, %s6369_s8  ;;  %v3643_v53 = vsel %vm3589_vm5, %v3578_v6, %v9243_v49  ;;  %v9251_v6 = vld [vmem:[#allocation146_spill] sm:$0xff] }
 0x4df   :  { %v5001_v12 = vadd.f32 %v8295_v5, %v5000_v21  ;;  %v6037_v56 = vpop.f32.mrb[60].mxu1  ;;  %v3965_v19 = vsel %vm3913_vm9, %v3900_v37, %v3180_v47  ;;  %v9245_v47 = vld [vmem:[#allocation144_spill] sm:$0xff] }
 0x4e0   :  { %v5296_v39 = vadd.f32 %v6266_v62, %v5006_v43  ;;  %v4464_v9 = vadd.f32 %v8242_v2, %v6037_v56  ;;  %3201 = vrot.lane.b32.xlu0 %v1411_v60, %s6371_s3  ;;  %v4458_v11 = vpop.f32.mrb[61].mxu1  ;;  %v2414_v4 = vpop.permute.xlu1 %2413  ;;  %v3708_v21 = vsel %vm3654_vm6, %v3643_v53, %v9245_v47 }
 0x4e1   :  { %v5295_v57 = vadd.f32 %v6267_v50, %v5001_v12  ;;  %v4459_v25 = vadd.f32 %v8242_v2, %v4458_v11  ;;  %v3771_v61 = vsel %vm113_vm2, %v3707_v23, %v2414_v4  ;;  %v6275_v23 = vld [vmem:[#allocation3 + $0x50] sm:$0xff] }
 0x4e2   :  { %v5360_v41 = vmax.f32 %v5296_v39, 0.0  ;;  %v2416_v63 = vpop.permute.xlu0 %2415  ;;  %2947 = vrot.lane.b32.xlu1 %v1348_v15, %s6370_s11  ;;  %v4666_v48 = vmax.f32 %v4464_v9, 0.0 }
 0x4e3   :  { %v5359_v10 = vmax.f32 %v5295_v57, 0.0  ;;  %v4665_v16 = vmax.f32 %v4459_v25, 0.0  ;;  %v3772_v56 = vsel %vm113_vm2, %v3708_v21, %v2416_v63 }
 0x4e4   :  { %5424 = vst.msk [vmem:[%s8979_s7 + $0x38] sm:$0xff] %vm113_vm2, %v5360_v41  ;;  %3457 = vrot.lane.b32.xlu0 %v1475_v3, %s6372_s12  ;;  %v3434_v40 = vpop.permute.xlu1 %3433 }
 0x4e5   :  { %5423 = vst.msk [vmem:[%s8979_s7 + $0x30] sm:$0xff] %vm113_vm2, %v5359_v10  ;;  %6133 = vmatprep.mubr.msk.f32.mxu0 %vm755_vm0, %v4665_v16  ;;  %v4029_v17 = vsel %vm3978_vm10, %v3964_v38, %v3434_v40  ;;  %v9246_v38 = vld [vmem:[#allocation71_spill] sm:$0xff] }
 0x4e6   :  { %v3436_v29 = vpop.permute.xlu0 %3435  ;;  %6134 = vmatmul.mubr.msk.f32.gmra.mrb[60].mxu0 %vm755_vm0, %v4666_v48  ;;  %3203 = vrot.lane.b32.xlu1 %v1412_v51, %s6371_s3  ;;  %v6272_v51 = vld [vmem:[#allocation2 + $0x497] sm:$0xff] }
 0x4e7   :  { %v4030_v44 = vsel %vm3978_vm10, %v3965_v19, %v3436_v29  ;;  %6068 = vmatprep.mubr.msk.f32.mxu1 %vm4055_vm11, %v4029_v17  ;;  %v3579_v40 = vsel %vm755_vm0, %v6272_v51, %v9246_v38  ;;  %v6273_v29 = vld [vmem:[#allocation2 + $0x49f] sm:$0xff] }
 0x4e8   :  { %6069 = vmatmul.mubr.msk.f32.gmra.mrb[82].mxu1 %vm4055_vm11, %v4030_v44  ;;  %v2670_v33 = vpop.permute.xlu1 %2669  ;;  %v9247_v44 = vld [vmem:[#allocation74_spill] sm:$0xff] }
 0x4e9   :  { %v3836_v8 = vsel %vm3783_vm7, %v3771_v61, %v2670_v33  ;;  %v9248_v33 = vld [vmem:[#allocation75_spill] sm:$0xff]  ;;  %v9255_v38 = vld [vmem:[#allocation86_spill] sm:$0xff] }
 0x4ea   :  { %v2926_v35 = vpop.permute.xlu0 %2925  ;;  %3459 = vrot.lane.b32.xlu1 %v1476_v27, %s6372_s12  ;;  %v3580_v27 = vsel %vm755_vm0, %v6273_v29, %v9247_v44 }
 0x4eb   :  { %v3901_v57 = vsel %vm3848_vm8, %v3836_v8, %v2926_v35  ;;  %v3644_v35 = vsel %vm3589_vm5, %v3579_v40, %v9248_v33  ;;  %v3645_v54 = vsel %vm3589_vm5, %v3580_v27, %v9249_v30  ;;  %v9257_v27 = vld [vmem:[#allocation148_spill] sm:$0xff] }
 0x4ec   :  { %v2672_v34 = vpop.permute.xlu1 %2671  ;;  %v3710_v31 = vsel %vm3654_vm6, %v3645_v54, %v9251_v6 }
 0x4ed   :  { %v3837_v9 = vsel %vm3783_vm7, %v3772_v56, %v2672_v34 }
 0x4ee   :  { %v3182_v45 = vpop.permute.xlu0 %3181 }
 0x4ef   :  { %v3966_v4 = vsel %vm3913_vm9, %v3901_v57, %v3182_v45  ;;  %v6276_v57 = vld [vmem:[#allocation2 + $0x4bf] sm:$0xff] }
 0x4f0   :  { %v2928_v52 = vpop.permute.xlu1 %2927 }
 0x4f1   :  { %v6105_v13 = vpop.f32.mrb[40].mxu0  ;;  %v3902_v36 = vsel %vm3848_vm8, %v3837_v9, %v2928_v52  ;;  %v9250_v52 = vld [vmem:[#allocation143_spill] sm:$0xff] }
 0x4f2   :  { %v5016_v55 = vadd.f32 %v6105_v13, %v8295_v5  ;;  %v3184_v32 = vpop.permute.xlu0 %3183  ;;  %v5010_v60 = vpop.f32.mrb[41].mxu0  ;;  %v3709_v13 = vsel %vm3654_vm6, %v3644_v35, %v9250_v52 }
 0x4f3   :  { %v5011_v26 = vadd.f32 %v8295_v5, %v5010_v60  ;;  %v6040_v43 = vpop.f32.mrb[62].mxu1  ;;  %v3967_v7 = vsel %vm3913_vm9, %v3902_v36, %v3184_v32 }
 0x4f4   :  { %v5298_v24 = vadd.f32 %v6270_v20, %v5016_v55  ;;  %v4474_v0 = vadd.f32 %v8242_v2, %v6040_v43  ;;  %v4468_v12 = vpop.f32.mrb[63].mxu1  ;;  %v2418_v39 = vpop.permute.xlu1 %2417  ;;  %v6274_v55 = vld [vmem:[#allocation3 + $0x58] sm:$0xff] }
 0x4f5   :  { %v5297_v28 = vadd.f32 %v6271_v18, %v5011_v26  ;;  %v4469_v62 = vadd.f32 %v8242_v2, %v4468_v12  ;;  %v3773_v59 = vsel %vm113_vm2, %v3709_v13, %v2418_v39  ;;  %v6279_v13 = vld [vmem:[#allocation3 + $0x60] sm:$0xff] }
 0x4f6   :  { %v5362_v11 = vmax.f32 %v5298_v24, 0.0  ;;  %v2420_v15 = vpop.permute.xlu0 %2419  ;;  %v4668_v25 = vmax.f32 %v4474_v0, 0.0 }
 0x4f7   :  { %v5361_v1 = vmax.f32 %v5297_v28, 0.0  ;;  %v4667_v50 = vmax.f32 %v4469_v62, 0.0  ;;  %v3774_v53 = vsel %vm113_vm2, %v3710_v31, %v2420_v15 }
 0x4f8   :  { %5426 = vst.msk [vmem:[%s8979_s7 + $0x48] sm:$0xff] %vm113_vm2, %v5362_v11  ;;  %v3438_v3 = vpop.permute.xlu1 %3437 }
 0x4f9   :  { %5425 = vst.msk [vmem:[%s8979_s7 + $0x40] sm:$0xff] %vm113_vm2, %v5361_v1  ;;  %6136 = vmatprep.mubr.msk.f32.mxu0 %vm755_vm0, %v4667_v50  ;;  %v4031_v41 = vsel %vm3978_vm10, %v3966_v4, %v3438_v3 }
 0x4fa   :  { %v3440_v63 = vpop.permute.xlu0 %3439  ;;  %6137 = vmatmul.mubr.msk.f32.gmra.mrb[62].mxu0 %vm755_vm0, %v4668_v25  ;;  %6071 = vmatprep.mubr.msk.f32.mxu1 %vm4055_vm11, %v4031_v41  ;;  %v9252_v25 = vld [vmem:[#allocation79_spill] sm:$0xff] }
 0x4fb   :  { %v4032_v37 = vsel %vm3978_vm10, %v3967_v7, %v3440_v63  ;;  %v3581_v4 = vsel %vm755_vm0, %v6276_v57, %v9252_v25  ;;  %v6277_v41 = vld [vmem:[#allocation2 + $0x4c7] sm:$0xff] }
 0x4fc   :  { %6072 = vmatmul.mubr.msk.f32.gmra.mrb[84].mxu1 %vm4055_vm11, %v4032_v37  ;;  %v2674_v10 = vpop.permute.xlu1 %2673  ;;  %v9253_v63 = vld [vmem:[#allocation82_spill] sm:$0xff] }
 0x4fd   :  { %v3838_v42 = vsel %vm3783_vm7, %v3773_v59, %v2674_v10  ;;  %v3582_v37 = vsel %vm755_vm0, %v6277_v41, %v9253_v63  ;;  %v9254_v10 = vld [vmem:[#allocation83_spill] sm:$0xff]  ;;  %v9261_v25 = vld [vmem:[#allocation94_spill] sm:$0xff] }
 0x4fe   :  { %v2930_v16 = vpop.permute.xlu0 %2929  ;;  %v3647_v40 = vsel %vm3589_vm5, %v3582_v37, %v9255_v38  ;;  %v9263_v37 = vld [vmem:[#allocation150_spill] sm:$0xff] }
 0x4ff   :  { %v3903_v56 = vsel %vm3848_vm8, %v3838_v42, %v2930_v16  ;;  %v3646_v16 = vsel %vm3589_vm5, %v3581_v4, %v9254_v10  ;;  %v3712_v33 = vsel %vm3654_vm6, %v3647_v40, %v9257_v27 }
 0x500   :  { %v2676_v46 = vpop.permute.xlu1 %2675 }
 0x501   :  { %v3839_v21 = vsel %vm3783_vm7, %v3774_v53, %v2676_v46 }
 0x502   :  { %v3186_v48 = vpop.permute.xlu0 %3185 }
 0x503   :  { %v3968_v18 = vsel %vm3913_vm9, %v3903_v56, %v3186_v48  ;;  %v6280_v56 = vld [vmem:[#allocation2 + $0x4e7] sm:$0xff] }
 0x504   :  { %v2932_v19 = vpop.permute.xlu1 %2931 }
 0x505   :  { %v6108_v17 = vpop.f32.mrb[42].mxu0  ;;  %v3904_v24 = vsel %vm3848_vm8, %v3839_v21, %v2932_v19  ;;  %v9256_v19 = vld [vmem:[#allocation145_spill] sm:$0xff] }
 0x506   :  { %v5026_v34 = vadd.f32 %v6108_v17, %v8295_v5  ;;  %v3188_v45 = vpop.permute.xlu0 %3187  ;;  %v5020_v22 = vpop.f32.mrb[43].mxu0  ;;  %v3711_v17 = vsel %vm3654_vm6, %v3646_v16, %v9256_v19 }
 0x507   :  { %v5021_v14 = vadd.f32 %v8295_v5, %v5020_v22  ;;  %v6043_v58 = vpop.f32.mrb[64].mxu1  ;;  %v3969_v62 = vsel %vm3913_vm9, %v3904_v24, %v3188_v45 }
 0x508   :  { %v5300_v32 = vadd.f32 %v6274_v55, %v5026_v34  ;;  %v4484_v60 = vadd.f32 %v8242_v2, %v6043_v58  ;;  %v4478_v49 = vpop.f32.mrb[65].mxu1  ;;  %v2422_v47 = vpop.permute.xlu1 %2421  ;;  %v6278_v34 = vld [vmem:[#allocation3 + $0x68] sm:$0xff] }
 0x509   :  { %v5299_v26 = vadd.f32 %v6275_v23, %v5021_v14  ;;  %v4479_v43 = vadd.f32 %v8242_v2, %v4478_v49  ;;  %v3775_v35 = vsel %vm113_vm2, %v3711_v17, %v2422_v47  ;;  %v6283_v17 = vld [vmem:[#allocation3 + $0x70] sm:$0xff] }
 0x50a   :  { %v5364_v61 = vmax.f32 %v5300_v32, 0.0  ;;  %v2424_v20 = vpop.permute.xlu0 %2423  ;;  %v4670_v8 = vmax.f32 %v4484_v60, 0.0 }
 0x50b   :  { %v5363_v0 = vmax.f32 %v5299_v26, 0.0  ;;  %v4669_v12 = vmax.f32 %v4479_v43, 0.0  ;;  %v3776_v54 = vsel %vm113_vm2, %v3712_v33, %v2424_v20 }
 0x50c   :  { %5428 = vst.msk [vmem:[%s8979_s7 + $0x58] sm:$0xff] %vm113_vm2, %v5364_v61  ;;  %v3442_v28 = vpop.permute.xlu1 %3441 }
 0x50d   :  { %5427 = vst.msk [vmem:[%s8979_s7 + $0x50] sm:$0xff] %vm113_vm2, %v5363_v0  ;;  %6139 = vmatprep.mubr.msk.f32.mxu0 %vm755_vm0, %v4669_v12  ;;  %v4033_v39 = vsel %vm3978_vm10, %v3968_v18, %v3442_v28 }
 0x50e   :  { %v3444_v9 = vpop.permute.xlu0 %3443  ;;  %6140 = vmatmul.mubr.msk.f32.gmra.mrb[64].mxu0 %vm755_vm0, %v4670_v8  ;;  %6074 = vmatprep.mubr.msk.f32.mxu1 %vm4055_vm11, %v4033_v39  ;;  %v9258_v8 = vld [vmem:[#allocation87_spill] sm:$0xff] }
 0x50f   :  { %v4034_v11 = vsel %vm3978_vm10, %v3969_v62, %v3444_v9  ;;  %v3583_v18 = vsel %vm755_vm0, %v6280_v56, %v9258_v8  ;;  %v6281_v39 = vld [vmem:[#allocation2 + $0x4ef] sm:$0xff]  ;;  %v9259_v9 = vld [vmem:[#allocation90_spill] sm:$0xff] }
 0x510   :  { %6075 = vmatmul.mubr.msk.f32.gmra.mrb[86].mxu1 %vm4055_vm11, %v4034_v11  ;;  %v2678_v15 = vpop.permute.xlu1 %2677  ;;  %v3584_v11 = vsel %vm755_vm0, %v6281_v39, %v9259_v9  ;;  %v9267_v8 = vld [vmem:[#allocation102_spill] sm:$0xff] }
 0x511   :  { %v3840_v52 = vsel %vm3783_vm7, %v3775_v35, %v2678_v15  ;;  %v9260_v15 = vld [vmem:[#allocation91_spill] sm:$0xff]  ;;  %v3649_v4 = vsel %vm3589_vm5, %v3584_v11, %v9261_v25  ;;  %v9269_v11 = vld [vmem:[#allocation152_spill] sm:$0xff] }
 0x512   :  { %v2934_v36 = vpop.permute.xlu0 %2933  ;;  %v3714_v10 = vsel %vm3654_vm6, %v3649_v4, %v9263_v37 }
 0x513   :  { %v3905_v53 = vsel %vm3848_vm8, %v3840_v52, %v2934_v36  ;;  %v3648_v36 = vsel %vm3589_vm5, %v3583_v18, %v9260_v15 }
 0x514   :  { %v2680_v1 = vpop.permute.xlu1 %2679 }
 0x515   :  { %v3841_v31 = vsel %vm3783_vm7, %v3776_v54, %v2680_v1 }
 0x516   :  { %v3190_v50 = vpop.permute.xlu0 %3189 }
 0x517   :  { %v3970_v23 = vsel %vm3913_vm9, %v3905_v53, %v3190_v50  ;;  %v6284_v53 = vld [vmem:[#allocation2 + $0x50f] sm:$0xff] }
 0x518   :  { %v2936_v3 = vpop.permute.xlu1 %2935 }
 0x519   :  { %v6111_v7 = vpop.f32.mrb[44].mxu0  ;;  %v3906_v32 = vsel %vm3848_vm8, %v3841_v31, %v2936_v3  ;;  %v9262_v3 = vld [vmem:[#allocation147_spill] sm:$0xff] }
 0x51a   :  { %v5036_v46 = vadd.f32 %v6111_v7, %v8295_v5  ;;  %v3192_v48 = vpop.permute.xlu0 %3191  ;;  %v5030_v51 = vpop.f32.mrb[45].mxu0  ;;  %v3713_v7 = vsel %vm3654_vm6, %v3648_v36, %v9262_v3 }
 0x51b   :  { %v5031_v29 = vadd.f32 %v8295_v5, %v5030_v51  ;;  %v6046_v44 = vpop.f32.mrb[66].mxu1  ;;  %v3971_v43 = vsel %vm3913_vm9, %v3906_v32, %v3192_v48 }
 0x51c   :  { %v5302_v45 = vadd.f32 %v6278_v34, %v5036_v46  ;;  %v4494_v22 = vadd.f32 %v8242_v2, %v6046_v44  ;;  %v4488_v30 = vpop.f32.mrb[67].mxu1  ;;  %v2426_v6 = vpop.permute.xlu1 %2425  ;;  %v6282_v46 = vld [vmem:[#allocation3 + $0x78] sm:$0xff] }
 0x51d   :  { %v5301_v14 = vadd.f32 %v6279_v13, %v5031_v29  ;;  %v4489_v58 = vadd.f32 %v8242_v2, %v4488_v30  ;;  %v3777_v16 = vsel %vm113_vm2, %v3713_v7, %v2426_v6  ;;  %v6287_v7 = vld [vmem:[#allocation3 + $0x80] sm:$0xff] }
 0x51e   :  { %v5366_v59 = vmax.f32 %v5302_v45, 0.0  ;;  %v2428_v55 = vpop.permute.xlu0 %2427  ;;  %v4672_v42 = vmax.f32 %v4494_v22, 0.0 }
 0x51f   :  { %v5365_v60 = vmax.f32 %v5301_v14, 0.0  ;;  %v4671_v49 = vmax.f32 %v4489_v58, 0.0  ;;  %v3778_v40 = vsel %vm113_vm2, %v3714_v10, %v2428_v55 }
 0x520   :  { %5430 = vst.msk [vmem:[%s8979_s7 + $0x68] sm:$0xff] %vm113_vm2, %v5366_v59  ;;  %v3446_v26 = vpop.permute.xlu1 %3445 }
 0x521   :  { %5429 = vst.msk [vmem:[%s8979_s7 + $0x60] sm:$0xff] %vm113_vm2, %v5365_v60  ;;  %6142 = vmatprep.mubr.msk.f32.mxu0 %vm755_vm0, %v4671_v49  ;;  %v4035_v47 = vsel %vm3978_vm10, %v3970_v23, %v3446_v26 }
 0x522   :  { %v3448_v21 = vpop.permute.xlu0 %3447  ;;  %6143 = vmatmul.mubr.msk.f32.gmra.mrb[66].mxu0 %vm755_vm0, %v4672_v42  ;;  %6077 = vmatprep.mubr.msk.f32.mxu1 %vm4055_vm11, %v4035_v47  ;;  %v9264_v42 = vld [vmem:[#allocation95_spill] sm:$0xff]  ;;  %v6285_v47 = vld [vmem:[#allocation2 + $0x517] sm:$0xff] }
 0x523   :  { %v4036_v61 = vsel %vm3978_vm10, %v3971_v43, %v3448_v21  ;;  %v3585_v23 = vsel %vm755_vm0, %v6284_v53, %v9264_v42  ;;  %v9265_v21 = vld [vmem:[#allocation98_spill] sm:$0xff] }
 0x524   :  { %6078 = vmatmul.mubr.msk.f32.gmra.mrb[88].mxu1 %vm4055_vm11, %v4036_v61  ;;  %v2682_v20 = vpop.permute.xlu1 %2681  ;;  %v3586_v61 = vsel %vm755_vm0, %v6285_v47, %v9265_v21 }
 0x525   :  { %v3842_v19 = vsel %vm3783_vm7, %v3777_v16, %v2682_v20  ;;  %v9266_v20 = vld [vmem:[#allocation99_spill] sm:$0xff]  ;;  %v3651_v18 = vsel %vm3589_vm5, %v3586_v61, %v9267_v8  ;;  %v8680_v8 = vld [vmem:[%s8976_s4] ss:$0 sm:$0xff] }
 0x526   :  { %v2938_v24 = vpop.permute.xlu0 %2937  ;;  %v3716_v15 = vsel %vm3654_vm6, %v3651_v18, %v9269_v11 }
 0x527   :  { %v3907_v54 = vsel %vm3848_vm8, %v3842_v19, %v2938_v24  ;;  %v3650_v24 = vsel %vm3589_vm5, %v3585_v23, %v9266_v20 }
 0x528   :  { %v2684_v0 = vpop.permute.xlu1 %2683 }
 0x529   :  { %v3843_v33 = vsel %vm3783_vm7, %v3778_v40, %v2684_v0 }
 0x52a   :  { %v3194_v12 = vpop.permute.xlu0 %3193 }
 0x52b   :  { %v3972_v13 = vsel %vm3913_vm9, %v3907_v54, %v3194_v12  ;;  %v9271_v54 = vld [vmem:[#allocation107_spill] sm:$0xff] }
 0x52c   :  { %v2940_v28 = vpop.permute.xlu1 %2939 }
 0x52d   :  { %v6114_v62 = vpop.f32.mrb[46].mxu0  ;;  %v3908_v45 = vsel %vm3848_vm8, %v3843_v33, %v2940_v28  ;;  %v9268_v28 = vld [vmem:[#allocation149_spill] sm:$0xff] }
 0x52e   :  { %v5046_v1 = vadd.f32 %v6114_v62, %v8295_v5  ;;  %v3196_v50 = vpop.permute.xlu0 %3195  ;;  %v5040_v57 = vpop.f32.mrb[47].mxu0  ;;  %v3715_v62 = vsel %vm3654_vm6, %v3650_v24, %v9268_v28  ;;  %v9274_v24 = vld [vmem:[#allocation110_spill] sm:$0xff] }
 0x52f   :  { %v5041_v41 = vadd.f32 %v8295_v5, %v5040_v57  ;;  %v6049_v63 = vpop.f32.mrb[68].mxu1  ;;  %v3973_v58 = vsel %vm3913_vm9, %v3908_v45, %v3196_v50  ;;  %v9270_v45 = vld [vmem:[#allocation103_spill] sm:$0xff] }
 0x530   :  { %v5304_v48 = vadd.f32 %v6282_v46, %v5046_v1  ;;  %v4504_v51 = vadd.f32 %v8242_v2, %v6049_v63  ;;  %v4498_v38 = vpop.f32.mrb[69].mxu1  ;;  %v2430_v27 = vpop.permute.xlu1 %2429  ;;  %v6286_v1 = vld [vmem:[#allocation3 + $0x88] sm:$0xff] }
 0x531   :  { %v5303_v29 = vadd.f32 %v6283_v17, %v5041_v41  ;;  %v4499_v44 = vadd.f32 %v8242_v2, %v4498_v38  ;;  %v3779_v36 = vsel %vm113_vm2, %v3715_v62, %v2430_v27  ;;  %v9275_v62 = vld [vmem:[#allocation153_spill] sm:$0xff] }
 0x532   :  { %v5368_v35 = vmax.f32 %v5304_v48, 0.0  ;;  %v2432_v34 = vpop.permute.xlu0 %2431  ;;  %v4674_v52 = vmax.f32 %v4504_v51, 0.0 }
 0x533   :  { %v5367_v22 = vmax.f32 %v5303_v29, 0.0  ;;  %v4673_v30 = vmax.f32 %v4499_v44, 0.0  ;;  %v3780_v4 = vsel %vm113_vm2, %v3716_v15, %v2432_v34  ;;  %v6288_v34 = vld [vmem:[#allocation2 + $0x537] sm:$0xff] }
 0x534   :  { %5432 = vst.msk [vmem:[%s8979_s7 + $0x78] sm:$0xff] %vm113_vm2, %v5368_v35  ;;  %v3450_v14 = vpop.permute.xlu1 %3449 }
 0x535   :  { %5431 = vst.msk [vmem:[%s8979_s7 + $0x70] sm:$0xff] %vm113_vm2, %v5367_v22  ;;  %6145 = vmatprep.mubr.msk.f32.mxu0 %vm755_vm0, %v4673_v30  ;;  %v4037_v6 = vsel %vm3978_vm10, %v3972_v13, %v3450_v14  ;;  %v3587_v22 = vsel %vm755_vm0, %v6288_v34, %v9270_v45  ;;  %v9272_v13 = vld [vmem:[#allocation151_spill] sm:$0xff] }
 0x536   :  { %v3452_v31 = vpop.permute.xlu0 %3451  ;;  %6146 = vmatmul.mubr.msk.f32.gmra.mrb[68].mxu0 %vm755_vm0, %v4674_v52  ;;  %6080 = vmatprep.mubr.msk.f32.mxu1 %vm4055_vm11, %v4037_v6  ;;  %v3652_v52 = vsel %vm3589_vm5, %v3587_v22, %v9271_v54 }
 0x537   :  { %v4038_v59 = vsel %vm3978_vm10, %v3973_v58, %v3452_v31  ;;  %v3717_v14 = vsel %vm3654_vm6, %v3652_v52, %v9272_v13  ;;  %v6295_v13 = vld [vmem:[#allocation3 + $0xb8] sm:$0xff] }
 0x538   :  { %6081 = vmatmul.mubr.msk.f32.gmra.mrb[90].mxu1 %vm4055_vm11, %v4038_v59  ;;  %v2686_v55 = vpop.permute.xlu1 %2685 }
 0x539   :  { %v3844_v3 = vsel %vm3783_vm7, %v3779_v36, %v2686_v55 }
 0x53a   :  { %v2942_v32 = vpop.permute.xlu0 %2941 }
 0x53b   :  { %v3909_v40 = vsel %vm3848_vm8, %v3844_v3, %v2942_v32 }
 0x53c   :  { %v2688_v60 = vpop.permute.xlu1 %2687 }
 0x53d   :  { %v3845_v10 = vsel %vm3783_vm7, %v3780_v4, %v2688_v60 }
 0x53e   :  { %v3198_v49 = vpop.permute.xlu0 %3197 }
 0x53f   :  { %v3974_v17 = vsel %vm3913_vm9, %v3909_v40, %v3198_v49 }
 0x540   :  { %v2944_v26 = vpop.permute.xlu1 %2943 }
 0x541   :  { %v6117_v43 = vpop.f32.mrb[48].mxu0  ;;  %v3910_v48 = vsel %vm3848_vm8, %v3845_v10, %v2944_v26  ;;  %v6289_v26 = vld [vmem:[#allocation2 + $0x53f] sm:$0xff] }
 0x542   :  { %v5056_v0 = vadd.f32 %v6117_v43, %v8295_v5  ;;  %v3200_v12 = vpop.permute.xlu0 %3199  ;;  %v5050_v56 = vpop.f32.mrb[49].mxu0  ;;  %v9273_v43 = vld [vmem:[#allocation106_spill] sm:$0xff] }
 0x543   :  { %v5051_v39 = vadd.f32 %v8295_v5, %v5050_v56  ;;  %v6052_v9 = vpop.f32.mrb[70].mxu1  ;;  %v3975_v29 = vsel %vm3913_vm9, %v3910_v48, %v3200_v12  ;;  %v3588_v47 = vsel %vm755_vm0, %v6289_v26, %v9273_v43  ;;  %v6290_v12 = vld [vmem:[#allocation3 + $0x98] sm:$0xff] }
 0x544   :  { %v5306_v50 = vadd.f32 %v6286_v1, %v5056_v0  ;;  %v4514_v57 = vadd.f32 %v8242_v2, %v6052_v9  ;;  %v4508_v25 = vpop.f32.mrb[71].mxu1  ;;  %v2434_v37 = vpop.permute.xlu1 %2433  ;;  %v3653_v0 = vsel %vm3589_vm5, %v3588_v47, %v9274_v24  ;;  %v6292_v9 = vld [vmem:[#allocation3 + $0x90] sm:$0xff] }
 0x545   :  { %v5305_v41 = vadd.f32 %v6287_v7, %v5051_v39  ;;  %v4509_v63 = vadd.f32 %v8242_v2, %v4508_v25  ;;  %v3781_v58 = vsel %vm113_vm2, %v3717_v14, %v2434_v37  ;;  %v3718_v39 = vsel %vm3654_vm6, %v3653_v0, %v9275_v62  ;;  %v6299_v0 = vld [vmem:[#allocation3 + $0xc0] sm:$0xff] }
 0x546   :  { %v5370_v16 = vmax.f32 %v5306_v50, 0.0  ;;  %v2436_v46 = vpop.permute.xlu0 %2435  ;;  %v4676_v19 = vmax.f32 %v4514_v57, 0.0 }
 0x547   :  { %v5369_v51 = vmax.f32 %v5305_v41, 0.0  ;;  %v4675_v38 = vmax.f32 %v4509_v63, 0.0  ;;  %v3782_v1 = vsel %vm113_vm2, %v3718_v39, %v2436_v46 }
 0x548   :  { %5434 = vst.msk [vmem:[%s8979_s7 + $0x88] sm:$0xff] %vm113_vm2, %v5370_v16  ;;  %v3454_v2 = vpop.permute.xlu1 %3453 }
 0x549   :  { %5433 = vst.msk [vmem:[%s8979_s7 + $0x80] sm:$0xff] %vm113_vm2, %v5369_v51  ;;  %6148 = vmatprep.mubr.msk.f32.mxu0 %vm755_vm0, %v4675_v38  ;;  %v4039_v44 = vsel %vm3978_vm10, %v3974_v17, %v3454_v2  ;;  %v6293_v38 = vld [vmem:[#allocation3 + $0xa8] sm:$0xff]  ;;  %v6294_v2 = vld [vmem:[#allocation3 + $0xa0] sm:$0xff] }
 0x54a   :  { %v3456_v27 = vpop.permute.xlu0 %3455  ;;  %6149 = vmatmul.mubr.msk.f32.gmra.mrb[70].mxu0 %vm755_vm0, %v4676_v19  ;;  %6083 = vmatprep.mubr.msk.f32.mxu1 %vm4055_vm11, %v4039_v44 }
 0x54b   :  { %v4040_v33 = vsel %vm3978_vm10, %v3975_v29, %v3456_v27 }
 0x54c   :  { %6084 = vmatmul.mubr.msk.f32.gmra.mrb[92].mxu1 %vm4055_vm11, %v4040_v33  ;;  %v2690_v35 = vpop.permute.xlu1 %2689 }
 0x54d   :  { %v3846_v31 = vsel %vm3783_vm7, %v3781_v58, %v2690_v35 }
 0x54e   :  { %v2946_v30 = vpop.permute.xlu0 %2945 }
 0x54f   :  { %v3911_v55 = vsel %vm3848_vm8, %v3846_v31, %v2946_v30  ;;  %v6296_v31 = vld [vmem:[#allocation3 + $0xb0] sm:$0xff] }
 0x550   :  { %v2692_v6 = vpop.permute.xlu1 %2691 }
 0x551   :  { %v3847_v57 = vsel %vm3783_vm7, %v3782_v1, %v2692_v6 }
 0x552   :  { %v3202_v59 = vpop.permute.xlu0 %3201 }
 0x553   :  { %v3976_v49 = vsel %vm3913_vm9, %v3911_v55, %v3202_v59 }
 0x554   :  { %v2948_v32 = vpop.permute.xlu1 %2947 }
 0x555   :  { %v6120_v60 = vpop.f32.mrb[50].mxu0  ;;  %v3912_v3 = vsel %vm3848_vm8, %v3847_v57, %v2948_v32 }
 0x556   :  { %v5066_v53 = vadd.f32 %v6120_v60, %v8295_v5  ;;  %v3458_v42 = vpop.permute.xlu0 %3457  ;;  %v5060_v23 = vpop.f32.mrb[51].mxu0 }
 0x557   :  { %v4041_v21 = vsel %vm3978_vm10, %v3976_v49, %v3458_v42  ;;  %v5061_v61 = vadd.f32 %v8295_v5, %v5060_v23  ;;  %v6055_v20 = vpop.f32.mrb[72].mxu1  ;;  %v8734_v42 = vld [vmem:[%s8978_s6] ss:$0 sm:$0xff] }
 0x558   :  { %v5308_v56 = vadd.f32 %v6290_v12, %v5066_v53  ;;  %v4524_v18 = vadd.f32 %v8680_v8, %v6055_v20  ;;  %v4518_v28 = vpop.f32.mrb[73].mxu1  ;;  %6086 = vmatprep.mubr.msk.f32.mxu1 %vm4055_vm11, %v4041_v21  ;;  %v3204_v36 = vpop.permute.xlu1 %3203  ;;  %v6298_v21 = vld [vmem:[#allocation3 + $0xc8] sm:$0xff] }
 0x559   :  { %v5307_v11 = vadd.f32 %v6292_v9, %v5061_v61  ;;  %v4519_v15 = vadd.f32 %v8680_v8, %v4518_v28  ;;  %v3977_v41 = vsel %vm3913_vm9, %v3912_v3, %v3204_v36  ;;  %v6301_v3 = vld [vmem:[#allocation3 + $0xd0] sm:$0xff] }
 0x55a   :  { %v5372_v50 = vmax.f32 %v5308_v56, 0.0  ;;  %v4678_v7 = vmax.f32 %v4524_v18, 0.0 }
 0x55b   :  { %v5371_v25 = vmax.f32 %v5307_v11, 0.0  ;;  %v4677_v4 = vmax.f32 %v4519_v15, 0.0 }
 0x55c   :  { %5436 = vst.msk [vmem:[%s8979_s7 + $0x98] sm:$0xff] %vm113_vm2, %v5372_v50  ;;  %v3460_v63 = vpop.permute.xlu1 %3459  ;;  %v6300_v50 = vld [vmem:[#allocation3 + $0xd8] sm:$0xff] }
 0x55d   :  { %5435 = vst.msk [vmem:[%s8979_s7 + $0x90] sm:$0xff] %vm113_vm2, %v5371_v25  ;;  %6151 = vmatprep.mubr.msk.f32.mxu0 %vm755_vm0, %v4677_v4  ;;  %v4042_v37 = vsel %vm3978_vm10, %v3977_v41, %v3460_v63 }
 0x55e   :  { %6152 = vmatmul.mubr.msk.f32.gmra.mrb[72].mxu0 %vm755_vm0, %v4678_v7  ;;  %6087 = vmatmul.mubr.msk.f32.gmra.mrb[94].mxu1 %vm4055_vm11, %v4042_v37 }
 0x569   :  { %v6123_v10 = vpop.f32.mrb[52].mxu0 }
 0x56a   :  { %v5076_v16 = vadd.f32 %v6123_v10, %v8295_v5  ;;  %v5070_v46 = vpop.f32.mrb[53].mxu0 }
 0x56b   :  { %v5071_v48 = vadd.f32 %v8295_v5, %v5070_v46  ;;  %v6058_v51 = vpop.f32.mrb[74].mxu1 }
 0x56c   :  { %v5310_v40 = vadd.f32 %v6293_v38, %v5076_v16  ;;  %v4534_v19 = vadd.f32 %v8680_v8, %v6058_v51  ;;  %v4528_v17 = vpop.f32.mrb[75].mxu1 }
 0x56d   :  { %v5309_v29 = vadd.f32 %v6294_v2, %v5071_v48  ;;  %v4529_v44 = vadd.f32 %v8680_v8, %v4528_v17 }
 0x56e   :  { %v5374_v27 = vmax.f32 %v5310_v40, 0.0  ;;  %v4680_v34 = vmax.f32 %v4534_v19, 0.0  ;;  %v6302_v19 = vld [vmem:[#allocation3 + $0xe8] sm:$0xff] }
 0x56f   :  { %v5373_v33 = vmax.f32 %v5309_v29, 0.0  ;;  %v4679_v35 = vmax.f32 %v4529_v44, 0.0  ;;  %v6303_v44 = vld [vmem:[#allocation3 + $0xe0] sm:$0xff] }
 0x570   :  { %5438 = vst.msk [vmem:[%s8979_s7 + $0xa8] sm:$0xff] %vm113_vm2, %v5374_v27 }
 0x571   :  { %5437 = vst.msk [vmem:[%s8979_s7 + $0xa0] sm:$0xff] %vm113_vm2, %v5373_v33  ;;  %6154 = vmatprep.mubr.msk.f32.mxu0 %vm755_vm0, %v4679_v35 }
 0x572   :  { %6155 = vmatmul.mubr.msk.f32.gmra.mrb[74].mxu0 %vm755_vm0, %v4680_v34 }
 0x57d   :  { %v6126_v45 = vpop.f32.mrb[54].mxu0 }
 0x57e   :  { %v5086_v22 = vadd.f32 %v6126_v45, %v8295_v5  ;;  %v5080_v30 = vpop.f32.mrb[55].mxu0 }
 0x57f   :  { %v5081_v54 = vadd.f32 %v8295_v5, %v5080_v30  ;;  %v6061_v52 = vpop.f32.mrb[76].mxu1 }
 0x580   :  { %v5312_v14 = vadd.f32 %v6295_v13, %v5086_v22  ;;  %v4544_v58 = vadd.f32 %v8680_v8, %v6061_v52  ;;  %v4538_v6 = vpop.f32.mrb[77].mxu1 }
 0x581   :  { %v5311_v59 = vadd.f32 %v6296_v31, %v5081_v54  ;;  %v4539_v55 = vadd.f32 %v8680_v8, %v4538_v6 }
 0x582   :  { %v5376_v32 = vmax.f32 %v5312_v14, 0.0  ;;  %v4682_v53 = vmax.f32 %v4544_v58, 0.0  ;;  %v6304_v58 = vld [vmem:[#allocation3 + $0xf8] sm:$0xff] }
 0x583   :  { %v5375_v60 = vmax.f32 %v5311_v59, 0.0  ;;  %v4681_v49 = vmax.f32 %v4539_v55, 0.0  ;;  %v6305_v55 = vld [vmem:[#allocation3 + $0xf0] sm:$0xff] }
 0x584   :  { %5440 = vst.msk [vmem:[%s8979_s7 + $0xb8] sm:$0xff] %vm113_vm2, %v5376_v32 }
 0x585   :  { %5439 = vst.msk [vmem:[%s8979_s7 + $0xb0] sm:$0xff] %vm113_vm2, %v5375_v60  ;;  %6157 = vmatprep.mubr.msk.f32.mxu0 %vm755_vm0, %v4681_v49 }
 0x586   :  { %6158 = vmatmul.mubr.msk.f32.gmra.mrb[76].mxu0 %vm755_vm0, %v4682_v53 }
 0x591   :  { %v6129_v5 = vpop.f32.mrb[56].mxu0 }
 0x592   :  { %v5096_v23 = vadd.f32 %v8734_v42, %v6129_v5  ;;  %v5090_v26 = vpop.f32.mrb[57].mxu0 }
 0x593   :  { %v5091_v43 = vadd.f32 %v8734_v42, %v5090_v26  ;;  %v6064_v47 = vpop.f32.mrb[78].mxu1 }
 0x594   :  { %v5314_v61 = vadd.f32 %v6298_v21, %v5096_v23  ;;  %v4554_v20 = vadd.f32 %v8680_v8, %v6064_v47  ;;  %v4548_v24 = vpop.f32.mrb[79].mxu1 }
 0x595   :  { %v5313_v12 = vadd.f32 %v6299_v0, %v5091_v43  ;;  %v4549_v56 = vadd.f32 %v8680_v8, %v4548_v24 }
 0x596   :  { %v5378_v18 = vmax.f32 %v5314_v61, 0.0  ;;  %v4684_v39 = vmax.f32 %v4554_v20, 0.0  ;;  %v6306_v20 = vld [vmem:[#allocation3 + $0x108] sm:$0xff] }
 0x597   :  { %v5377_v28 = vmax.f32 %v5313_v12, 0.0  ;;  %v4683_v62 = vmax.f32 %v4549_v56, 0.0  ;;  %v6307_v56 = vld [vmem:[#allocation3 + $0x100] sm:$0xff] }
 0x598   :  { %5442 = vst.msk [vmem:[%s8979_s7 + $0xc8] sm:$0xff] %vm113_vm2, %v5378_v18 }
 0x599   :  { %5441 = vst.msk [vmem:[%s8979_s7 + $0xc0] sm:$0xff] %vm113_vm2, %v5377_v28  ;;  %6160 = vmatprep.mubr.msk.f32.mxu0 %vm755_vm0, %v4683_v62 }
 0x59a   :  { %6161 = vmatmul.mubr.msk.f32.gmra.mrb[78].mxu0 %vm755_vm0, %v4684_v39 }
 0x5a5   :  { %v6132_v9 = vpop.f32.mrb[58].mxu0 }
 0x5a6   :  { %v5106_v11 = vadd.f32 %v8734_v42, %v6132_v9  ;;  %v5100_v15 = vpop.f32.mrb[59].mxu0 }
 0x5a7   :  { %v5101_v36 = vadd.f32 %v8734_v42, %v5100_v15  ;;  %v6067_v1 = vpop.f32.mrb[80].mxu1 }
 0x5a8   :  { %v5316_v57 = vadd.f32 %v6300_v50, %v5106_v11  ;;  %v4564_v25 = vadd.f32 %v8680_v8, %v6067_v1  ;;  %v4558_v4 = vpop.f32.mrb[81].mxu1 }
 0x5a9   :  { %v5315_v7 = vadd.f32 %v6301_v3, %v5101_v36  ;;  %v4559_v41 = vadd.f32 %v8680_v8, %v4558_v4 }
 0x5aa   :  { %v5380_v63 = vmax.f32 %v5316_v57, 0.0  ;;  %v4686_v16 = vmax.f32 %v4564_v25, 0.0  ;;  %v6308_v25 = vld [vmem:[#allocation3 + $0x118] sm:$0xff] }
 0x5ab   :  { %v5379_v37 = vmax.f32 %v5315_v7, 0.0  ;;  %v4685_v10 = vmax.f32 %v4559_v41, 0.0  ;;  %v6309_v41 = vld [vmem:[#allocation3 + $0x110] sm:$0xff] }
 0x5ac   :  { %5444 = vst.msk [vmem:[%s8979_s7 + $0xd8] sm:$0xff] %vm113_vm2, %v5380_v63 }
 0x5ad   :  { %5443 = vst.msk [vmem:[%s8979_s7 + $0xd0] sm:$0xff] %vm113_vm2, %v5379_v37  ;;  %6163 = vmatprep.mubr.msk.f32.mxu0 %vm755_vm0, %v4685_v10 }
 0x5ae   :  { %6164 = vmatmul.mubr.msk.f32.gmra.mrb[80].mxu0 %vm755_vm0, %v4686_v16 }
 0x5b9   :  { %v6135_v46 = vpop.f32.mrb[60].mxu0 }
 0x5ba   :  { %v5116_v48 = vadd.f32 %v8734_v42, %v6135_v46  ;;  %v5110_v51 = vpop.f32.mrb[61].mxu0 }
 0x5bb   :  { %v5111_v38 = vadd.f32 %v8734_v42, %v5110_v51  ;;  %v6070_v40 = vpop.f32.mrb[82].mxu1 }
 0x5bc   :  { %v5318_v17 = vadd.f32 %v6302_v19, %v5116_v48  ;;  %v4574_v2 = vadd.f32 %v8680_v8, %v6070_v40  ;;  %v4568_v29 = vpop.f32.mrb[83].mxu1 }
 0x5bd   :  { %v5317_v27 = vadd.f32 %v6303_v44, %v5111_v38  ;;  %v4569_v33 = vadd.f32 %v8680_v8, %v4568_v29 }
 0x5be   :  { %v5382_v35 = vmax.f32 %v5318_v17, 0.0  ;;  %v4688_v22 = vmax.f32 %v4574_v2, 0.0  ;;  %v6310_v2 = vld [vmem:[#allocation3 + $0x128] sm:$0xff] }
 0x5bf   :  { %v5381_v34 = vmax.f32 %v5317_v27, 0.0  ;;  %v4687_v45 = vmax.f32 %v4569_v33, 0.0  ;;  %v6311_v33 = vld [vmem:[#allocation3 + $0x120] sm:$0xff] }
 0x5c0   :  { %5446 = vst.msk [vmem:[%s8979_s7 + $0xe8] sm:$0xff] %vm113_vm2, %v5382_v35 }
 0x5c1   :  { %5445 = vst.msk [vmem:[%s8979_s7 + $0xe0] sm:$0xff] %vm113_vm2, %v5381_v34  ;;  %6166 = vmatprep.mubr.msk.f32.mxu0 %vm755_vm0, %v4687_v45 }
 0x5c2   :  { %6167 = vmatmul.mubr.msk.f32.gmra.mrb[82].mxu0 %vm755_vm0, %v4688_v22 }
 0x5cd   :  { %v6138_v30 = vpop.f32.mrb[62].mxu0 }
 0x5ce   :  { %v5126_v54 = vadd.f32 %v8734_v42, %v6138_v30  ;;  %v5120_v52 = vpop.f32.mrb[63].mxu0 }
 0x5cf   :  { %v5121_v13 = vadd.f32 %v8734_v42, %v5120_v52  ;;  %v6073_v14 = vpop.f32.mrb[84].mxu1 }
 0x5d0   :  { %v5320_v6 = vadd.f32 %v6304_v58, %v5126_v54  ;;  %v4584_v31 = vadd.f32 %v8680_v8, %v6073_v14  ;;  %v4578_v59 = vpop.f32.mrb[85].mxu1 }
 0x5d1   :  { %v5319_v32 = vadd.f32 %v6305_v55, %v5121_v13  ;;  %v4579_v60 = vadd.f32 %v8680_v8, %v4578_v59 }
 0x5d2   :  { %v5384_v49 = vmax.f32 %v5320_v6, 0.0  ;;  %v4690_v23 = vmax.f32 %v4584_v31, 0.0  ;;  %v6312_v31 = vld [vmem:[#allocation3 + $0x138] sm:$0xff] }
 0x5d3   :  { %v5383_v53 = vmax.f32 %v5319_v32, 0.0  ;;  %v4689_v5 = vmax.f32 %v4579_v60, 0.0  ;;  %v6313_v60 = vld [vmem:[#allocation3 + $0x130] sm:$0xff] }
 0x5d4   :  { %5448 = vst.msk [vmem:[%s8979_s7 + $0xf8] sm:$0xff] %vm113_vm2, %v5384_v49 }
 0x5d5   :  { %5447 = vst.msk [vmem:[%s8979_s7 + $0xf0] sm:$0xff] %vm113_vm2, %v5383_v53  ;;  %6169 = vmatprep.mubr.msk.f32.mxu0 %vm755_vm0, %v4689_v5 }
 0x5d6   :  { %6170 = vmatmul.mubr.msk.f32.gmra.mrb[84].mxu0 %vm755_vm0, %v4690_v23 }
 0x5e1   :  { %v6141_v26 = vpop.f32.mrb[64].mxu0 }
 0x5e2   :  { %v5136_v43 = vadd.f32 %v8734_v42, %v6141_v26  ;;  %v5130_v47 = vpop.f32.mrb[65].mxu0 }
 0x5e3   :  { %v5131_v21 = vadd.f32 %v8734_v42, %v5130_v47  ;;  %v6076_v61 = vpop.f32.mrb[86].mxu1 }
 0x5e4   :  { %v5322_v24 = vadd.f32 %v6306_v20, %v5136_v43  ;;  %v4594_v0 = vadd.f32 %v8680_v8, %v6076_v61  ;;  %v4588_v12 = vpop.f32.mrb[87].mxu1 }
 0x5e5   :  { %v5321_v18 = vadd.f32 %v6307_v56, %v5131_v21  ;;  %v4589_v28 = vadd.f32 %v8680_v8, %v4588_v12  ;;  %v6314_v56 = vld [vmem:[#allocation3 + $0x148] sm:$0xff] }
 0x5e6   :  { %v5386_v62 = vmax.f32 %v5322_v24, 0.0  ;;  %v4692_v11 = vmax.f32 %v4594_v0, 0.0 }
 0x5e7   :  { %v5385_v39 = vmax.f32 %v5321_v18, 0.0  ;;  %v4691_v9 = vmax.f32 %v4589_v28, 0.0 }
 0x5e8   :  { %5450 = vst.msk [vmem:[%s8979_s7 + $0x108] sm:$0xff] %vm113_vm2, %v5386_v62  ;;  %v6315_v62 = vld [vmem:[#allocation3 + $0x140] sm:$0xff] }
 0x5e9   :  { %5449 = vst.msk [vmem:[%s8979_s7 + $0x100] sm:$0xff] %vm113_vm2, %v5385_v39  ;;  %6172 = vmatprep.mubr.msk.f32.mxu0 %vm755_vm0, %v4691_v9 }
 0x5ea   :  { %6173 = vmatmul.mubr.msk.f32.gmra.mrb[86].mxu0 %vm755_vm0, %v4692_v11 }
 0x5f5   :  { %v6144_v15 = vpop.f32.mrb[66].mxu0 }
 0x5f6   :  { %v5146_v36 = vadd.f32 %v8734_v42, %v6144_v15  ;;  %v5140_v1 = vpop.f32.mrb[67].mxu0 }
 0x5f7   :  { %v5141_v50 = vadd.f32 %v8734_v42, %v5140_v1  ;;  %v6079_v57 = vpop.f32.mrb[88].mxu1 }
 0x5f8   :  { %v5324_v4 = vadd.f32 %v6308_v25, %v5146_v36  ;;  %v4604_v3 = vadd.f32 %v8680_v8, %v6079_v57  ;;  %v4598_v7 = vpop.f32.mrb[89].mxu1  ;;  %v6316_v25 = vld [vmem:[#allocation3 + $0x158] sm:$0xff] }
 0x5f9   :  { %v5323_v63 = vadd.f32 %v6309_v41, %v5141_v50  ;;  %v4599_v37 = vadd.f32 %v8680_v8, %v4598_v7 }
 0x5fa   :  { %v5388_v10 = vmax.f32 %v5324_v4, 0.0  ;;  %v4694_v48 = vmax.f32 %v4604_v3, 0.0  ;;  %v6317_v3 = vld [vmem:[#allocation3 + $0x150] sm:$0xff] }
 0x5fb   :  { %v5387_v16 = vmax.f32 %v5323_v63, 0.0  ;;  %v4693_v46 = vmax.f32 %v4599_v37, 0.0 }
 0x5fc   :  { %5452 = vst.msk [vmem:[%s8979_s7 + $0x118] sm:$0xff] %vm113_vm2, %v5388_v10 }
 0x5fd   :  { %5451 = vst.msk [vmem:[%s8979_s7 + $0x110] sm:$0xff] %vm113_vm2, %v5387_v16  ;;  %6175 = vmatprep.mubr.msk.f32.mxu0 %vm755_vm0, %v4693_v46 }
 0x5fe   :  { %6176 = vmatmul.mubr.msk.f32.gmra.mrb[88].mxu0 %vm755_vm0, %v4694_v48  ;;  %v6318_v48 = vld [vmem:[#allocation3 + $0x168] sm:$0xff] }
 0x609   :  { %v6147_v51 = vpop.f32.mrb[68].mxu0 }
 0x60a   :  { %v5156_v38 = vadd.f32 %v8734_v42, %v6147_v51  ;;  %v5150_v40 = vpop.f32.mrb[69].mxu0 }
 0x60b   :  { %v5151_v19 = vadd.f32 %v8734_v42, %v5150_v40  ;;  %v6082_v17 = vpop.f32.mrb[90].mxu1 }
 0x60c   :  { %v5326_v29 = vadd.f32 %v6310_v2, %v5156_v38  ;;  %v4614_v44 = vadd.f32 %v8680_v8, %v6082_v17  ;;  %v4608_v27 = vpop.f32.mrb[91].mxu1  ;;  %v6319_v38 = vld [vmem:[#allocation3 + $0x160] sm:$0xff] }
 0x60d   :  { %v5325_v35 = vadd.f32 %v6311_v33, %v5151_v19  ;;  %v4609_v34 = vadd.f32 %v8680_v8, %v4608_v27  ;;  %v6320_v33 = vld [vmem:[#allocation3 + $0x178] sm:$0xff] }
 0x60e   :  { %v5390_v45 = vmax.f32 %v5326_v29, 0.0  ;;  %v4696_v54 = vmax.f32 %v4614_v44, 0.0 }
 0x60f   :  { %v5389_v22 = vmax.f32 %v5325_v35, 0.0  ;;  %v4695_v30 = vmax.f32 %v4609_v34, 0.0  ;;  %v6321_v34 = vld [vmem:[#allocation3 + $0x170] sm:$0xff] }
 0x610   :  { %5454 = vst.msk [vmem:[%s8979_s7 + $0x128] sm:$0xff] %vm113_vm2, %v5390_v45 }
 0x611   :  { %5453 = vst.msk [vmem:[%s8979_s7 + $0x120] sm:$0xff] %vm113_vm2, %v5389_v22  ;;  %6178 = vmatprep.mubr.msk.f32.mxu0 %vm755_vm0, %v4695_v30 }
 0x612   :  { %6179 = vmatmul.mubr.msk.f32.gmra.mrb[90].mxu0 %vm755_vm0, %v4696_v54 }
 0x61d   :  { %v6150_v52 = vpop.f32.mrb[70].mxu0 }
 0x61e   :  { %v5166_v13 = vadd.f32 %v8734_v42, %v6150_v52  ;;  %v5160_v14 = vpop.f32.mrb[71].mxu0 }
 0x61f   :  { %v5161_v58 = vadd.f32 %v8734_v42, %v5160_v14  ;;  %v6085_v6 = vpop.f32.mrb[92].mxu1 }
 0x620   :  { %v5328_v59 = vadd.f32 %v6312_v31, %v5166_v13  ;;  %v4624_v55 = vadd.f32 %v8680_v8, %v6085_v6  ;;  %v4618_v32 = vpop.f32.mrb[93].mxu1  ;;  %v6323_v31 = vld [vmem:[#allocation3 + $0x180] sm:$0xff] }
 0x621   :  { %v5327_v49 = vadd.f32 %v6313_v60, %v5161_v58  ;;  %v4619_v53 = vadd.f32 %v8680_v8, %v4618_v32  ;;  %v6322_v58 = vld [vmem:[#allocation3 + $0x188] sm:$0xff] }
 0x622   :  { %v5392_v5 = vmax.f32 %v5328_v59, 0.0  ;;  %v4698_v43 = vmax.f32 %v4624_v55, 0.0 }
 0x623   :  { %v5391_v23 = vmax.f32 %v5327_v49, 0.0  ;;  %v4697_v26 = vmax.f32 %v4619_v53, 0.0 }
 0x624   :  { %5456 = vst.msk [vmem:[%s8979_s7 + $0x138] sm:$0xff] %vm113_vm2, %v5392_v5 }
 0x625   :  { %5455 = vst.msk [vmem:[%s8979_s7 + $0x130] sm:$0xff] %vm113_vm2, %v5391_v23  ;;  %6181 = vmatprep.mubr.msk.f32.mxu0 %vm755_vm0, %v4697_v26  ;;  %v6324_v23 = vld [vmem:[#allocation3 + $0x198] sm:$0xff] }
 0x626   :  { %6182 = vmatmul.mubr.msk.f32.gmra.mrb[92].mxu0 %vm755_vm0, %v4698_v43  ;;  %v6325_v43 = vld [vmem:[#allocation3 + $0x190] sm:$0xff] }
 0x631   :  { %v6153_v47 = vpop.f32.mrb[72].mxu0  ;;  %v6088_v61 = vpop.f32.mrb[94].mxu1 }
 0x632   :  { %v5176_v21 = vadd.f32 %v8734_v42, %v6153_v47  ;;  %v5170_v20 = vpop.f32.mrb[73].mxu0  ;;  %v4634_v24 = vadd.f32 %v8680_v8, %v6088_v61  ;;  %v4628_v12 = vpop.f32.mrb[95].mxu1 }
 0x633   :  { %v5171_v0 = vadd.f32 %v8734_v42, %v5170_v20  ;;  %v4629_v28 = vadd.f32 %v8680_v8, %v4628_v12 }
 0x634   :  { %v5330_v18 = vadd.f32 %v6314_v56, %v5176_v21  ;;  %v4700_v15 = vmax.f32 %v4634_v24, 0.0  ;;  %v6326_v56 = vld [vmem:[#allocation3 + $0x1a8] sm:$0xff] }
 0x635   :  { %v5329_v39 = vadd.f32 %v6315_v62, %v5171_v0  ;;  %v4699_v11 = vmax.f32 %v4629_v28, 0.0  ;;  %v6327_v28 = vld [vmem:[#allocation3 + $0x1a0] sm:$0xff] }
 0x636   :  { %v5394_v9 = vmax.f32 %v5330_v18, 0.0 }
 0x637   :  { %v5393_v36 = vmax.f32 %v5329_v39, 0.0  ;;  %6184 = vmatprep.mubr.msk.f32.mxu0 %vm755_vm0, %v4699_v11 }
 0x638   :  { %5458 = vst.msk [vmem:[%s8979_s7 + $0x148] sm:$0xff] %vm113_vm2, %v5394_v9  ;;  %6185 = vmatmul.mubr.msk.f32.gmra.mrb[94].mxu0 %vm755_vm0, %v4700_v15 }
 0x639   :  { %5457 = vst.msk [vmem:[%s8979_s7 + $0x140] sm:$0xff] %vm113_vm2, %v5393_v36 }
 0x645   :  { %v6156_v8 = vpop.f32.mrb[74].mxu0 }
 0x646   :  { %v5186_v1 = vadd.f32 %v8734_v42, %v6156_v8  ;;  %v5180_v50 = vpop.f32.mrb[75].mxu0 }
 0x647   :  { %v5181_v57 = vadd.f32 %v8734_v42, %v5180_v50 }
 0x648   :  { %v5332_v4 = vadd.f32 %v6316_v25, %v5186_v1  ;;  %v6328_v1 = vld [vmem:[#allocation3 + $0x1b8] sm:$0xff] }
 0x649   :  { %v5331_v7 = vadd.f32 %v6317_v3, %v5181_v57  ;;  %v6329_v57 = vld [vmem:[#allocation3 + $0x1b0] sm:$0xff] }
 0x64a   :  { %v5396_v41 = vmax.f32 %v5332_v4, 0.0 }
 0x64b   :  { %v5395_v63 = vmax.f32 %v5331_v7, 0.0 }
 0x64c   :  { %5460 = vst.msk [vmem:[%s8979_s7 + $0x158] sm:$0xff] %vm113_vm2, %v5396_v41 }
 0x64d   :  { %5459 = vst.msk [vmem:[%s8979_s7 + $0x150] sm:$0xff] %vm113_vm2, %v5395_v63 }
 0x659   :  { %v6159_v37 = vpop.f32.mrb[76].mxu0 }
 0x65a   :  { %v5196_v10 = vadd.f32 %v8734_v42, %v6159_v37  ;;  %v5190_v16 = vpop.f32.mrb[77].mxu0 }
 0x65b   :  { %v5191_v46 = vadd.f32 %v8734_v42, %v5190_v16 }
 0x65c   :  { %v5334_v51 = vadd.f32 %v6318_v48, %v5196_v10  ;;  %v6330_v10 = vld [vmem:[#allocation3 + $0x1c8] sm:$0xff] }
 0x65d   :  { %v5333_v40 = vadd.f32 %v6319_v38, %v5191_v46  ;;  %v6331_v46 = vld [vmem:[#allocation3 + $0x1c0] sm:$0xff] }
 0x65e   :  { %v5398_v19 = vmax.f32 %v5334_v51, 0.0 }
 0x65f   :  { %v5397_v17 = vmax.f32 %v5333_v40, 0.0 }
 0x660   :  { %5462 = vst.msk [vmem:[%s8979_s7 + $0x168] sm:$0xff] %vm113_vm2, %v5398_v19 }
 0x661   :  { %5461 = vst.msk [vmem:[%s8979_s7 + $0x160] sm:$0xff] %vm113_vm2, %v5397_v17 }
 0x66d   :  { %v6162_v2 = vpop.f32.mrb[78].mxu0 }
 0x66e   :  { %v5206_v29 = vadd.f32 %v8734_v42, %v6162_v2  ;;  %v5200_v44 = vpop.f32.mrb[79].mxu0 }
 0x66f   :  { %v5201_v27 = vadd.f32 %v8734_v42, %v5200_v44 }
 0x670   :  { %v5336_v35 = vadd.f32 %v6320_v33, %v5206_v29  ;;  %v6332_v29 = vld [vmem:[#allocation3 + $0x1d8] sm:$0xff] }
 0x671   :  { %v5335_v45 = vadd.f32 %v6321_v34, %v5201_v27  ;;  %v6333_v27 = vld [vmem:[#allocation3 + $0x1d0] sm:$0xff] }
 0x672   :  { %v5400_v22 = vmax.f32 %v5336_v35, 0.0 }
 0x673   :  { %v5399_v30 = vmax.f32 %v5335_v45, 0.0 }
 0x674   :  { %5464 = vst.msk [vmem:[%s8979_s7 + $0x178] sm:$0xff] %vm113_vm2, %v5400_v22 }
 0x675   :  { %5463 = vst.msk [vmem:[%s8979_s7 + $0x170] sm:$0xff] %vm113_vm2, %v5399_v30 }
 0x681   :  { %v6165_v54 = vpop.f32.mrb[80].mxu0 }
 0x682   :  { %v5216_v52 = vadd.f32 %v8734_v42, %v6165_v54  ;;  %v5210_v13 = vpop.f32.mrb[81].mxu0 }
 0x683   :  { %v5211_v14 = vadd.f32 %v8734_v42, %v5210_v13 }
 0x684   :  { %v5338_v6 = vadd.f32 %v6322_v58, %v5216_v52  ;;  %v6334_v52 = vld [vmem:[#allocation3 + $0x1e8] sm:$0xff] }
 0x685   :  { %v5337_v59 = vadd.f32 %v6323_v31, %v5211_v14  ;;  %v6335_v14 = vld [vmem:[#allocation3 + $0x1e0] sm:$0xff] }
 0x686   :  { %v5402_v55 = vmax.f32 %v5338_v6, 0.0 }
 0x687   :  { %v5401_v32 = vmax.f32 %v5337_v59, 0.0 }
 0x688   :  { %5466 = vst.msk [vmem:[%s8979_s7 + $0x188] sm:$0xff] %vm113_vm2, %v5402_v55 }
 0x689   :  { %5465 = vst.msk [vmem:[%s8979_s7 + $0x180] sm:$0xff] %vm113_vm2, %v5401_v32 }
 0x695   :  { %v6168_v60 = vpop.f32.mrb[82].mxu0 }
 0x696   :  { %v5226_v49 = vadd.f32 %v8734_v42, %v6168_v60  ;;  %v5220_v53 = vpop.f32.mrb[83].mxu0 }
 0x697   :  { %v5221_v5 = vadd.f32 %v8734_v42, %v5220_v53 }
 0x698   :  { %v5340_v26 = vadd.f32 %v6324_v23, %v5226_v49  ;;  %v6336_v49 = vld [vmem:[#allocation3 + $0x1f8] sm:$0xff] }
 0x699   :  { %v5339_v47 = vadd.f32 %v6325_v43, %v5221_v5  ;;  %v6337_v5 = vld [vmem:[#allocation3 + $0x1f0] sm:$0xff] }
 0x69a   :  { %v5404_v21 = vmax.f32 %v5340_v26, 0.0 }
 0x69b   :  { %v5403_v61 = vmax.f32 %v5339_v47, 0.0 }
 0x69c   :  { %5468 = vst.msk [vmem:[%s8979_s7 + $0x198] sm:$0xff] %vm113_vm2, %v5404_v21 }
 0x69d   :  { %5467 = vst.msk [vmem:[%s8979_s7 + $0x190] sm:$0xff] %vm113_vm2, %v5403_v61 }
 0x6a9   :  { %v6171_v20 = vpop.f32.mrb[84].mxu0 }
 0x6aa   :  { %v5236_v24 = vadd.f32 %v8734_v42, %v6171_v20  ;;  %v5230_v0 = vpop.f32.mrb[85].mxu0 }
 0x6ab   :  { %v5231_v12 = vadd.f32 %v8734_v42, %v5230_v0 }
 0x6ac   :  { %v5342_v18 = vadd.f32 %v6326_v56, %v5236_v24 }
 0x6ad   :  { %v5341_v62 = vadd.f32 %v6327_v28, %v5231_v12 }
 0x6ae   :  { %v5406_v39 = vmax.f32 %v5342_v18, 0.0 }
 0x6af   :  { %v5405_v9 = vmax.f32 %v5341_v62, 0.0 }
 0x6b0   :  { %5470 = vst.msk [vmem:[%s8979_s7 + $0x1a8] sm:$0xff] %vm113_vm2, %v5406_v39 }
 0x6b1   :  { %5469 = vst.msk [vmem:[%s8979_s7 + $0x1a0] sm:$0xff] %vm113_vm2, %v5405_v9 }
 0x6bd   :  { %v6174_v11 = vpop.f32.mrb[86].mxu0 }
 0x6be   :  { %v5246_v15 = vadd.f32 %v8734_v42, %v6174_v11  ;;  %v5240_v36 = vpop.f32.mrb[87].mxu0 }
 0x6bf   :  { %v5241_v8 = vadd.f32 %v8734_v42, %v5240_v36 }
 0x6c0   :  { %v5344_v50 = vadd.f32 %v6328_v1, %v5246_v15 }
 0x6c1   :  { %v5343_v25 = vadd.f32 %v6329_v57, %v5241_v8 }
 0x6c2   :  { %v5408_v4 = vmax.f32 %v5344_v50, 0.0 }
 0x6c3   :  { %v5407_v3 = vmax.f32 %v5343_v25, 0.0 }
 0x6c4   :  { %5472 = vst.msk [vmem:[%s8979_s7 + $0x1b8] sm:$0xff] %vm113_vm2, %v5408_v4 }
 0x6c5   :  { %5471 = vst.msk [vmem:[%s8979_s7 + $0x1b0] sm:$0xff] %vm113_vm2, %v5407_v3 }
 0x6d1   :  { %v6177_v7 = vpop.f32.mrb[88].mxu0 }
 0x6d2   :  { %v5256_v41 = vadd.f32 %v8734_v42, %v6177_v7  ;;  %v5250_v63 = vpop.f32.mrb[89].mxu0 }
 0x6d3   :  { %v5251_v37 = vadd.f32 %v8734_v42, %v5250_v63 }
 0x6d4   :  { %v5346_v16 = vadd.f32 %v6330_v10, %v5256_v41 }
 0x6d5   :  { %v5345_v48 = vadd.f32 %v6331_v46, %v5251_v37 }
 0x6d6   :  { %v5410_v51 = vmax.f32 %v5346_v16, 0.0 }
 0x6d7   :  { %v5409_v38 = vmax.f32 %v5345_v48, 0.0 }
 0x6d8   :  { %5474 = vst.msk [vmem:[%s8979_s7 + $0x1c8] sm:$0xff] %vm113_vm2, %v5410_v51 }
 0x6d9   :  { %5473 = vst.msk [vmem:[%s8979_s7 + $0x1c0] sm:$0xff] %vm113_vm2, %v5409_v38 }
 0x6e5   :  { %v6180_v40 = vpop.f32.mrb[90].mxu0 }
 0x6e6   :  { %v5266_v19 = vadd.f32 %v8734_v42, %v6180_v40  ;;  %v5260_v17 = vpop.f32.mrb[91].mxu0 }
 0x6e7   :  { %v5261_v2 = vadd.f32 %v8734_v42, %v5260_v17 }
 0x6e8   :  { %v5348_v44 = vadd.f32 %v6332_v29, %v5266_v19 }
 0x6e9   :  { %v5347_v33 = vadd.f32 %v6333_v27, %v5261_v2 }
 0x6ea   :  { %v5412_v35 = vmax.f32 %v5348_v44, 0.0 }
 0x6eb   :  { %v5411_v34 = vmax.f32 %v5347_v33, 0.0 }
 0x6ec   :  { %5476 = vst.msk [vmem:[%s8979_s7 + $0x1d8] sm:$0xff] %vm113_vm2, %v5412_v35 }
 0x6ed   :  { %5475 = vst.msk [vmem:[%s8979_s7 + $0x1d0] sm:$0xff] %vm113_vm2, %v5411_v34 }
 0x6f9   :  { %v6183_v45 = vpop.f32.mrb[92].mxu0 }
 0x6fa   :  { %v5276_v22 = vadd.f32 %v8734_v42, %v6183_v45  ;;  %v5270_v30 = vpop.f32.mrb[93].mxu0 }
 0x6fb   :  { %v5271_v54 = vadd.f32 %v8734_v42, %v5270_v30 }
 0x6fc   :  { %v5350_v13 = vadd.f32 %v6334_v52, %v5276_v22 }
 0x6fd   :  { %v5349_v58 = vadd.f32 %v6335_v14, %v5271_v54 }
 0x6fe   :  { %v5414_v6 = vmax.f32 %v5350_v13, 0.0 }
 0x6ff   :  { %v5413_v31 = vmax.f32 %v5349_v58, 0.0 }
 0x700   :  { %5478 = vst.msk [vmem:[%s8979_s7 + $0x1e8] sm:$0xff] %vm113_vm2, %v5414_v6 }
 0x701   :  { %5477 = vst.msk [vmem:[%s8979_s7 + $0x1e0] sm:$0xff] %vm113_vm2, %v5413_v31 }
 0x70b   :  { %v6186_v59 = vpop.f32.mrb[94].mxu0 }
 0x70c   :  { %v5286_v55 = vadd.f32 %v8734_v42, %v6186_v59  ;;  %v5280_v32 = vpop.f32.mrb[95].mxu0 }
 0x70d   :  { %v5281_v60 = vadd.f32 %v8734_v42, %v5280_v32 }
 0x70e   :  { %v5352_v53 = vadd.f32 %v6336_v49, %v5286_v55 }
 0x70f   :  { %v5351_v23 = vadd.f32 %v6337_v5, %v5281_v60 }
 0x710   :  { %v5416_v26 = vmax.f32 %v5352_v53, 0.0 }
 0x711   :  { %v5415_v43 = vmax.f32 %v5351_v23, 0.0 }
 0x712   :  { %5480 = vst.msk [vmem:[%s8979_s7 + $0x1f8] sm:$0xff] %vm113_vm2, %v5416_v26 }
 0x713   :  { %5479 = vst.msk [vmem:[%s8979_s7 + $0x1f0] sm:$0xff] %vm113_vm2, %v5415_v43 }
 0x714   :  { %5485 = vsyncpa [#allocation4], 1 }

</bundles_post_ra>
